<compile_context>
chip_gen: v5e
topology: v5e:2x2
jax: 0.10.0
libtpu: 0.0.40
codegen_flags: <defaults>
</compile_context>

<pallas_src>
import numpy as np
import jax
import jax.numpy as jnp
from jax import lax
from jax.experimental import pallas as pl
from jax.experimental.pallas import tpu as pltpu

_LANE = 128
_VMEM_LIMIT = None


def _round_up(n, m):
    return ((n + m - 1) // m) * m


def _pad_rows(x, n_pad):
    n = x.shape[0]
    if n == n_pad:
        return x
    return jnp.pad(x, ((0, n_pad - n),) + ((0, 0),) * (x.ndim - 1))


def _row_tile(n_pad, cap=512):
    """Largest multiple-of-128 tile <= cap that divides n_pad, preferring >= 2
    blocks (keeps a 'parallel' grid axis busy on both v7x TensorCores)."""
    best = None
    t = _LANE
    while t <= min(cap, n_pad):
        if n_pad % t == 0:
            if n_pad // t >= 2:
                best = t
            elif best is None:
                best = t
        t += _LANE
    return best if best is not None else _LANE


def _vmem_limit_bytes():
    cap = 64 * 1024 * 1024
    try:
        info = pltpu.get_tpu_info()
        cap = int(getattr(info, "vmem_capacity_bytes", cap))
    except Exception:
        pass
    # ~75% of physical: ~96 MiB on v5e/v6e (128 MiB), ~48 MiB on v7x (64 MiB)
    return int(min(cap * 3 // 4, 112 * 1024 * 1024))


def _cparams(sem):
    global _VMEM_LIMIT
    if _VMEM_LIMIT is None:
        _VMEM_LIMIT = _vmem_limit_bytes()
    return pltpu.CompilerParams(dimension_semantics=sem,
                                vmem_limit_bytes=_VMEM_LIMIT)


# --------------------------------------------------------------------------
# Fourier encoder kernel:  out[:, :Ld] = sin(multiscale(x)), out[:, Ld:] = cos
# Scaling is a VPU broadcast multiply-add; halves are written directly.
# --------------------------------------------------------------------------
def _fourier_kernel(x_ref, m_ref, o_ref):
    x = x_ref[...]                                # (TR, d) f32
    half = m_ref.shape[-1]                        # L * d
    ms = x[:, 0:1] * m_ref[0:1, :]
    for j in range(1, x.shape[-1]):               # d is tiny and static
        ms = ms + x[:, j:j + 1] * m_ref[j:j + 1, :]
    o_ref[:, :half] = jnp.sin(ms)                 # transcendentals stay f32
    o_ref[:, half:] = jnp.cos(ms)


def fourier_apply(x_pad, m):
    n_pad, d = x_pad.shape
    half = m.shape[1]
    tile = _row_tile(n_pad)
    return pl.pallas_call(
        _fourier_kernel,
        out_shape=jax.ShapeDtypeStruct((n_pad, 2 * half), jnp.float32),
        grid=(n_pad // tile,),
        in_specs=[pl.BlockSpec((tile, d), lambda i: (i, 0)),
                  pl.BlockSpec((d, half), lambda i: (0, 0))],
        out_specs=pl.BlockSpec((tile, 2 * half), lambda i: (i, 0)),
        compiler_params=_cparams(("parallel",)),
    )(x_pad, m)


# --------------------------------------------------------------------------
# Per-node linear kernel (folds the per-edge Linear layers onto the nodes
# before the gather:  gather(x) @ W + b == gather(x @ W + b)).
# --------------------------------------------------------------------------
def _linear_kernel(x_ref, w_ref, b_ref, o_ref):
    y = jnp.dot(x_ref[...], w_ref[...], preferred_element_type=jnp.float32) + b_ref[...]
    o_ref[...] = y.astype(o_ref.dtype)


def linear_apply(x_pad, w, b, out_dtype=jnp.float32):
    n_pad, din = x_pad.shape
    dout = w.shape[1]
    tile = _row_tile(n_pad)
    return pl.pallas_call(
        _linear_kernel,
        out_shape=jax.ShapeDtypeStruct((n_pad, dout), out_dtype),
        grid=(n_pad // tile,),
        in_specs=[pl.BlockSpec((tile, din), lambda i: (i, 0)),
                  pl.BlockSpec((din, dout), lambda i: (0, 0)),
                  pl.BlockSpec((1, dout), lambda i: (0, 0))],
        out_specs=pl.BlockSpec((tile, dout), lambda i: (i, 0)),
        compiler_params=_cparams(("parallel",)),
    )(x_pad, w, b)


# --------------------------------------------------------------------------
# Message kernel (tiled over edges, "parallel"):
#   msg = ReLU( right_l[tgt] + left_r[src] + e * W_edge ) @ W_final + b_final
# The gathers use one-hot operators built IN-KERNEL from streamed int32 ids
# (padded edges carry id -1 -> all-zero row); the node matrices stay resident.
# --------------------------------------------------------------------------
def _message_kernel(tgt_ref, src_ref, e_ref, rl_ref, lr_ref, we_ref, wf_ref,
                    bf_ref, msg_ref):
    te = tgt_ref.shape[0]
    nr = rl_ref.shape[0]
    nl = lr_ref.shape[0]
    tgt = tgt_ref[...]                            # (TE, 1) int32
    src = src_ref[...]
    oh_t = jnp.where(lax.broadcasted_iota(jnp.int32, (te, nr), 1) == tgt,
                     1.0, 0.0).astype(jnp.bfloat16)
    oh_s = jnp.where(lax.broadcasted_iota(jnp.int32, (te, nl), 1) == src,
                     1.0, 0.0).astype(jnp.bfloat16)
    fi = jnp.dot(oh_t, rl_ref[...], preferred_element_type=jnp.float32)   # right_l[tgt]
    fj = jnp.dot(oh_s, lr_ref[...], preferred_element_type=jnp.float32)   # left_r[src]
    m = fi + fj + e_ref[...] * we_ref[...]        # K=1 edge linear on the VPU
    # PreNormLayer(1, shift=False) with ones() scale -> identity (folded away)
    m = jnp.maximum(m, 0.0)
    m = jnp.dot(m, wf_ref[...], preferred_element_type=jnp.float32) + bf_ref[...]
    msg_ref[...] = m.astype(msg_ref.dtype)


def message_apply(tgt_col, src_col, edge_attr, right_l, left_r,
                  w_edge, w_final, b_final, tile_e):
    e_pad = tgt_col.shape[0]
    nr, h = right_l.shape
    nl = left_r.shape[0]
    return pl.pallas_call(
        _message_kernel,
        out_shape=jax.ShapeDtypeStruct((e_pad, h), jnp.bfloat16),
        grid=(e_pad // tile_e,),
        in_specs=[pl.BlockSpec((tile_e, 1), lambda k: (k, 0)),
                  pl.BlockSpec((tile_e, 1), lambda k: (k, 0)),
                  pl.BlockSpec((tile_e, 1), lambda k: (k, 0)),
                  pl.BlockSpec((nr, h), lambda k: (0, 0)),   # resident node block
                  pl.BlockSpec((nl, h), lambda k: (0, 0)),   # resident node block
                  pl.BlockSpec((1, h), lambda k: (0, 0)),
                  pl.BlockSpec((h, h), lambda k: (0, 0)),
                  pl.BlockSpec((1, h), lambda k: (0, 0))],
        out_specs=pl.BlockSpec((tile_e, h), lambda k: (k, 0)),
        compiler_params=_cparams(("parallel",)),
    )(tgt_col, src_col, edge_attr, right_l, left_r, w_edge, w_final, b_final)


# --------------------------------------------------------------------------
# Aggregate + output kernel.  Grid = (node tiles "parallel", edge tiles
# "arbitrary").  The scatter operator is a (TILE_N, TILE_E) one-hot built
# IN-KERNEL (already node-major -> plain jnp.dot, no transpose anywhere);
# messages accumulate into an f32 VMEM scratch; on the last edge tile the
# output MLP (W_out1 split -> no concat) + LayerNorm are applied.
# --------------------------------------------------------------------------
def _agg_out_kernel(tgt_ref, msg_ref, right_ref, wo1a_ref, wo1b_ref, bo1_ref,
                    wo2_ref, bo2_ref, lng_ref, lnb_ref, out_ref, acc_ref):
    i = pl.program_id(0)
    k = pl.program_id(1)
    te = msg_ref.shape[0]
    tn = acc_ref.shape[0]

    @pl.when(k == 0)
    def _():
        acc_ref[...] = jnp.zeros_like(acc_ref)

    node_ids = lax.broadcasted_iota(jnp.int32, (tn, te), 0) + i * tn
    ohT = jnp.where(node_ids == tgt_ref[...], 1.0, 0.0).astype(jnp.bfloat16)
    acc_ref[...] += jnp.dot(ohT, msg_ref[...], preferred_element_type=jnp.float32)

    @pl.when(k == pl.num_programs(1) - 1)
    def _():
        agg = acc_ref[...]                 # post_conv PreNorm(scale=1) == identity
        right = right_ref[...]
        h = (jnp.dot(agg, wo1a_ref[...], preferred_element_type=jnp.float32)
             + jnp.dot(right, wo1b_ref[...], preferred_element_type=jnp.float32)
             + bo1_ref[...])
        h = jnp.maximum(h, 0.0)
        h = jnp.dot(h, wo2_ref[...], preferred_element_type=jnp.float32) + bo2_ref[...]
        mu = jnp.mean(h, axis=-1, keepdims=True)
        var = jnp.mean((h - mu) ** 2, axis=-1, keepdims=True)
        hn = (h - mu) * lax.rsqrt(var + 1e-5)
        out_ref[...] = hn * lng_ref[...] + lnb_ref[...]


def agg_out_apply(tgt_row, msg, right, p, tile_e):
    e_pad = msg.shape[0]
    nr_pad, h = right.shape
    tile_n = _row_tile(nr_pad)
    return pl.pallas_call(
        _agg_out_kernel,
        out_shape=jax.ShapeDtypeStruct((nr_pad, h), jnp.float32),
        grid=(nr_pad // tile_n, e_pad // tile_e),
        in_specs=[pl.BlockSpec((1, tile_e), lambda i, k: (0, k)),
                  pl.BlockSpec((tile_e, h), lambda i, k: (k, 0)),
                  pl.BlockSpec((tile_n, h), lambda i, k: (i, 0)),
                  pl.BlockSpec((h, h), lambda i, k: (0, 0)),
                  pl.BlockSpec((h, h), lambda i, k: (0, 0)),
                  pl.BlockSpec((1, h), lambda i, k: (0, 0)),
                  pl.BlockSpec((h, h), lambda i, k: (0, 0)),
                  pl.BlockSpec((1, h), lambda i, k: (0, 0)),
                  pl.BlockSpec((1, h), lambda i, k: (0, 0)),
                  pl.BlockSpec((1, h), lambda i, k: (0, 0))],
        out_specs=pl.BlockSpec((tile_n, h), lambda i, k: (i, 0)),
        scratch_shapes=[pltpu.VMEM((tile_n, h), jnp.float32)],
        compiler_params=_cparams(("parallel", "arbitrary")),
    )(tgt_row, msg, right, p['W_out1_a'], p['W_out1_b'], p['b_out1'],
      p['W_out2'], p['b_out2'], p['ln_g'], p['ln_b'])


def bgc_apply(p, left, right, src_col, tgt_col, tgt_row, edge_attr, tile_e):
    # fold per-edge Linear layers onto the nodes (exact: each edge reads one row)
    right_l = linear_apply(right, p['W_left'], p['b_left'], out_dtype=jnp.bfloat16)
    left_r = linear_apply(left, p['W_right'], p['b_zero'], out_dtype=jnp.bfloat16)
    msg = message_apply(tgt_col, src_col, edge_attr, right_l, left_r,
                        p['W_edge'], p['W_final'], p['b_final'], tile_e)
    return agg_out_apply(tgt_row, msg, right, p, tile_e)


# --------------------------------------------------------------------------
# Fused VAE head kernel: one call computes BOTH mu and logsigma heads
# (W1 concatenated on lane axis, block-diagonal W2), tiled over node rows.
# Linear -> (eval-mode BatchNorm folded to affine) -> ReLU -> Linear.
# --------------------------------------------------------------------------
def _head_kernel(x_ref, w1_ref, b1_ref, s_ref, t_ref, w2_ref, b2_ref, o_ref):
    h = jnp.dot(x_ref[...], w1_ref[...], preferred_element_type=jnp.float32) + b1_ref[...]
    h = h * s_ref[...] + t_ref[...]           # BatchNorm1d (eval, running stats)
    h = jnp.maximum(h, 0.0)
    o_ref[...] = jnp.dot(h, w2_ref[...], preferred_element_type=jnp.float32) + b2_ref[...]


def head_apply(x_pad, w1, b1, bn_s, bn_b, w2, b2):
    n_pad, jk = x_pad.shape
    mh2 = w1.shape[1]
    d2 = w2.shape[1]
    tile = _row_tile(n_pad)
    return pl.pallas_call(
        _head_kernel,
        out_shape=jax.ShapeDtypeStruct((n_pad, d2), jnp.float32),
        grid=(n_pad // tile,),
        in_specs=[pl.BlockSpec((tile, jk), lambda i: (i, 0)),
                  pl.BlockSpec((jk, mh2), lambda i: (0, 0)),
                  pl.BlockSpec((1, mh2), lambda i: (0, 0)),
                  pl.BlockSpec((1, mh2), lambda i: (0, 0)),
                  pl.BlockSpec((1, mh2), lambda i: (0, 0)),
                  pl.BlockSpec((mh2, d2), lambda i: (0, 0)),
                  pl.BlockSpec((1, d2), lambda i: (0, 0))],
        out_specs=pl.BlockSpec((tile, d2), lambda i: (i, 0)),
        compiler_params=_cparams(("parallel",)),
    )(x_pad, w1, b1, bn_s, bn_b, w2, b2)


# --------------------------------------------------------------------------
# Parameter init (deterministic, PyTorch-style uniform bounds).
# --------------------------------------------------------------------------
def _uniform(key, shape, bound):
    return jax.random.uniform(key, shape, jnp.float32, -bound, bound)


def init_linear(key, fan_in, fan_out, bias=True):
    kw, kb = jax.random.split(key)
    bound = 1.0 / np.sqrt(fan_in)
    w = _uniform(kw, (fan_in, fan_out), bound)
    b = _uniform(kb, (1, fan_out), bound) if bias else None
    return w, b


def init_bgc_params(key, h):
    ks = jax.random.split(key, 6)
    w_left, b_left = init_linear(ks[0], h, h)
    w_edge, _ = init_linear(ks[1], 1, h, bias=False)
    w_right, _ = init_linear(ks[2], h, h, bias=False)
    w_final, b_final = init_linear(ks[3], h, h)
    w_out1, b_out1 = init_linear(ks[4], 2 * h, h)
    w_out2, b_out2 = init_linear(ks[5], h, h)
    return dict(W_left=w_left, b_left=b_left, W_edge=w_edge, W_right=w_right,
                W_final=w_final, b_final=b_final,
                W_out1_a=w_out1[:h], W_out1_b=w_out1[h:], b_out1=b_out1,
                W_out2=w_out2, b_out2=b_out2,
                ln_g=jnp.ones((1, h), jnp.float32), ln_b=jnp.zeros((1, h), jnp.float32),
                b_zero=jnp.zeros((1, h), jnp.float32))


def init_fused_head_params(key, jk_dim, mh, enc_dim):
    k = jax.random.split(key, 4)
    w1_mu, b1_mu = init_linear(k[0], jk_dim, mh)
    w1_ls, b1_ls = init_linear(k[1], jk_dim, mh)
    w2_mu, b2_mu = init_linear(k[2], mh, enc_dim)
    w2_ls, b2_ls = init_linear(k[3], mh, enc_dim)
    w1c = jnp.concatenate([w1_mu, w1_ls], axis=1)
    b1c = jnp.concatenate([b1_mu, b1_ls], axis=1)
    bn_scale = jnp.full((1, 2 * mh), 1.0 / np.sqrt(1.0 + 1e-5), jnp.float32)
    bn_shift = jnp.zeros((1, 2 * mh), jnp.float32)
    w2c = jnp.zeros((2 * mh, 2 * enc_dim), jnp.float32)
    w2c = w2c.at[:mh, :enc_dim].set(w2_mu).at[mh:, enc_dim:].set(w2_ls)
    b2c = jnp.concatenate([b2_mu, b2_ls], axis=1)
    return dict(W1c=w1c, b1c=b1c, bn_scale=bn_scale, bn_shift=bn_shift,
                W2c=w2c, b2c=b2c,
                ref=dict(W1_mu=w1_mu, b1_mu=b1_mu, W1_ls=w1_ls, b1_ls=b1_ls,
                         W2_mu=w2_mu, b2_mu=b2_mu, W2_ls=w2_ls, b2_ls=b2_ls))


def _fourier_matrix(d, level):
    L = int(level)
    scales = 2.0 ** (np.arange(L, dtype=np.float64) - L / 2.0)     # 2^arange(-L/2, L/2)
    m = np.concatenate([np.eye(d) / s for s in scales], axis=1).astype(np.float32)
    return jnp.asarray(m)                                          # (d, L*d)


def init_encoder_params(key, input_dim_xs, input_dim_xt, num_layers,
                        hidden_dim, mlp_hidden_dim, enc_dim):
    assert hidden_dim % (2 * input_dim_xs) == 0 and hidden_dim % (2 * input_dim_xt) == 0, \
        "FourierEncoder level must be an integer so the lifted width equals hidden_dim"
    level_s = hidden_dim // (2 * input_dim_xs)
    level_t = hidden_dim // (2 * input_dim_xt)
    keys = jax.random.split(key, 2 * num_layers + 2)
    conv_s_t = [init_bgc_params(keys[i], hidden_dim) for i in range(num_layers)]
    conv_t_s = [init_bgc_params(keys[num_layers + i], hidden_dim) for i in range(num_layers)]
    jk_dim = hidden_dim * num_layers                               # jk_mode='cat'
    heads_s = init_fused_head_params(keys[2 * num_layers], jk_dim, mlp_hidden_dim, enc_dim)
    heads_t = init_fused_head_params(keys[2 * num_layers + 1], jk_dim, mlp_hidden_dim, enc_dim)
    return dict(hidden_dim=hidden_dim, enc_dim=enc_dim,
                level_s=level_s, level_t=level_t,
                M_s=_fourier_matrix(input_dim_xs, level_s),
                M_t=_fourier_matrix(input_dim_xt, level_t),
                conv_s_t=conv_s_t, conv_t_s=conv_t_s,
                heads_s=heads_s, heads_t=heads_t)


# --------------------------------------------------------------------------
# Encoder forward (Pallas kernels + glue).
# --------------------------------------------------------------------------
def encoder_forward(params, x_s, x_t, edge_index, edge_attr):
    ns, nt = x_s.shape[0], x_t.shape[0]
    e = edge_attr.shape[0]
    enc_dim = params['enc_dim']

    ns_p = _round_up(ns, _LANE)
    nt_p = _round_up(nt, _LANE)
    e_p = _round_up(e, _LANE)
    tile_e = _row_tile(e_p)

    x_s_p = _pad_rows(x_s, ns_p)
    x_t_p = _pad_rows(x_t, nt_p)
    ea_p = _pad_rows(edge_attr, e_p)

    # int32 edge ids streamed as (E,1) columns (gather) / (1,E) rows (scatter);
    # padded edges carry id -1 so their in-kernel one-hot rows are all-zero and
    # contribute nothing anywhere.
    src = edge_index[0].astype(jnp.int32)
    tgt = edge_index[1].astype(jnp.int32)
    src_pad = jnp.pad(src, (0, e_p - e), constant_values=-1)
    tgt_pad = jnp.pad(tgt, (0, e_p - e), constant_values=-1)
    src_col, tgt_col = src_pad[:, None], tgt_pad[:, None]
    src_row, tgt_row = src_pad[None, :], tgt_pad[None, :]

    hs = fourier_apply(x_s_p, params['M_s'])       # (ns_p, H)
    ht = fourier_apply(x_t_p, params['M_t'])       # (nt_p, H)

    hs_outs, ht_outs = [], []
    for p_st, p_ts in zip(params['conv_s_t'], params['conv_t_s']):
        ht = bgc_apply(p_st, left=hs, right=ht, src_col=src_col, tgt_col=tgt_col,
                       tgt_row=tgt_row, edge_attr=ea_p, tile_e=tile_e)
        # inverse edge index: source/target roles swap
        hs = bgc_apply(p_ts, left=ht, right=hs, src_col=tgt_col, tgt_col=src_col,
                       tgt_row=src_row, edge_attr=ea_p, tile_e=tile_e)
        hs_outs.append(hs)
        ht_outs.append(ht)

    hs_cat = jnp.concatenate(hs_outs, axis=-1)      # JumpingKnowledge('cat')
    ht_cat = jnp.concatenate(ht_outs, axis=-1)

    ph_s, ph_t = params['heads_s'], params['heads_t']
    out_s = head_apply(hs_cat, ph_s['W1c'], ph_s['b1c'], ph_s['bn_scale'],
                       ph_s['bn_shift'], ph_s['W2c'], ph_s['b2c'])
    out_t = head_apply(ht_cat, ph_t['W1c'], ph_t['b1c'], ph_t['bn_scale'],
                       ph_t['bn_shift'], ph_t['W2c'], ph_t['b2c'])

    xs_mu, xs_logsigma = out_s[:ns, :enc_dim], out_s[:ns, enc_dim:]
    xt_mu, xt_logsigma = out_t[:nt, :enc_dim], out_t[:nt, enc_dim:]

    # TODO(synk): training-mode reparametrize (mu + randn * exp(clamp(logsigma, 20)))
    # is stochastic; eval-mode semantics return mu as z.
    xs_z, xt_z = xs_mu, xt_mu
    return xs_mu, xs_logsigma, xs_z, xt_mu, xt_logsigma, xt_z


# --------------------------------------------------------------------------
# Pure-JAX f32 reference (independent scatter via segment_sum) for verification.
# --------------------------------------------------------------------------
def reference_forward(params, x_s, x_t, edge_index, edge_attr):
    def fourier_ref(x, level):
        L = int(level)
        scales = 2.0 ** (np.arange(L, dtype=np.float64) - L / 2.0)
        ms = jnp.concatenate([x / float(s) for s in scales], axis=1)
        return jnp.concatenate([jnp.sin(ms), jnp.cos(ms)], axis=1)

    def bgc_ref(p, left, right, src, tgt, eattr):
        fi = right[tgt]
        fj = left[src]
        m = fi @ p['W_left'] + p['b_left'] + eattr @ p['W_edge'] + fj @ p['W_right']
        m = jnp.maximum(m, 0.0) @ p['W_final'] + p['b_final']
        agg = jax.ops.segment_sum(m, tgt, num_segments=right.shape[0])
        w_out1 = jnp.concatenate([p['W_out1_a'], p['W_out1_b']], axis=0)
        h = jnp.concatenate([agg, right], axis=-1)
        h = jnp.maximum(h @ w_out1 + p['b_out1'], 0.0) @ p['W_out2'] + p['b_out2']
        mu = h.mean(-1, keepdims=True)
        var = ((h - mu) ** 2).mean(-1, keepdims=True)
        return (h - mu) / jnp.sqrt(var + 1e-5) * p['ln_g'] + p['ln_b']

    def head_ref(hp, x):
        bn = 1.0 / np.sqrt(1.0 + 1e-5)
        h_mu = jnp.maximum((x @ hp['W1_mu'] + hp['b1_mu']) * bn, 0.0) @ hp['W2_mu'] + hp['b2_mu']
        h_ls = jnp.maximum((x @ hp['W1_ls'] + hp['b1_ls']) * bn, 0.0) @ hp['W2_ls'] + hp['b2_ls']
        return h_mu, h_ls

    xs = fourier_ref(x_s, params['level_s'])
    xt = fourier_ref(x_t, params['level_t'])
    src, tgt = edge_index[0], edge_index[1]
    xs_outs, xt_outs = [], []
    for p_st, p_ts in zip(params['conv_s_t'], params['conv_t_s']):
        xt = bgc_ref(p_st, xs, xt, src, tgt, edge_attr)
        xs = bgc_ref(p_ts, xt, xs, tgt, src, edge_attr)
        xs_outs.append(xs)
        xt_outs.append(xt)
    xs_cat = jnp.concatenate(xs_outs, -1)
    xt_cat = jnp.concatenate(xt_outs, -1)
    xs_mu, xs_ls = head_ref(params['heads_s']['ref'], xs_cat)
    xt_mu, xt_ls = head_ref(params['heads_t']['ref'], xt_cat)
    return xs_mu, xs_ls, xs_mu, xt_mu, xt_ls, xt_mu


if __name__ == "__main__":
    # small synthetic bipartite graph (multi-block grids: nodes pad to 256, edges to 768)
    input_dim_xs = 2
    input_dim_xt = 2
    hidden_dim = 32
    num_layers = 2
    mlp_hidden_dim = 16
    enc_dim = 8
    Ns, Nt, E = 200, 150, 700

    root = jax.random.PRNGKey(0)
    k_param, k_xs, k_xt, k_ei, k_ea = jax.random.split(root, 5)

    params = init_encoder_params(k_param, input_dim_xs, input_dim_xt,
                                 num_layers, hidden_dim, mlp_hidden_dim, enc_dim)

    x_s = jax.random.normal(k_xs, (Ns, input_dim_xs), jnp.float32)
    x_t = jax.random.normal(k_xt, (Nt, input_dim_xt), jnp.float32)
    ks1, ks2 = jax.random.split(k_ei)
    edge_index = jnp.stack([
        jax.random.randint(ks1, (E,), 0, Ns, jnp.int32),   # row 0: left/source nodes
        jax.random.randint(ks2, (E,), 0, Nt, jnp.int32),   # row 1: right/target nodes
    ], axis=0)
    edge_attr = jax.random.normal(k_ea, (E, 1), jnp.float32)

    outs = jax.block_until_ready(
        encoder_forward(params, x_s, x_t, edge_index, edge_attr))

    refs = reference_forward(params, x_s, x_t, edge_index, edge_attr)
    # bf16 node-feature / message rounding + default matmul precision -> 3e-2 tolerance
    for o, r in zip(outs, refs):
        np.testing.assert_allclose(np.asarray(o), np.asarray(r), rtol=3e-2, atol=3e-2)

    print("KERNEL_OK")
</pallas_src>

<mosaic_0001>
module attributes {stable_mosaic.version = 11 : i64} {
  func.func @_fourier_kernel(%arg0: i32, %arg1: memref<128x2xf32, #tpu.memory_space<vmem>>, %arg2: memref<2x16xf32, #tpu.memory_space<vmem>>, %arg3: memref<128x32xf32, #tpu.memory_space<vmem>>) attributes {dimension_semantics = [#tpu.dimension_semantics<parallel>], iteration_bounds = array<i64: 2>, scalar_prefetch = 0 : i64, scratch_operands = 0 : i64, tpu.core_type = #tpu.core_type<tc>, window_params = [{transform_indices = @transform_0, window_bounds = array<i64: 128, 2>}, {pipeline_mode = #tpu.pipeline_mode<synchronous>, transform_indices = @transform_1, window_bounds = array<i64: 2, 16>}, {transform_indices = @transform_2, window_bounds = array<i64: 128, 32>}]} {
    %c0 = arith.constant 0 : index
    %c0_0 = arith.constant 0 : index
    %0 = vector.load %arg1[%c0, %c0_0] : memref<128x2xf32, #tpu.memory_space<vmem>>, vector<128x2xf32>
    %1 = vector.extract_strided_slice %0 {offsets = [0, 0], sizes = [128, 1], strides = [1, 1]} : vector<128x2xf32> to vector<128x1xf32>
    %c0_1 = arith.constant 0 : index
    %c0_2 = arith.constant 0 : index
    %2 = vector.load %arg2[%c0_1, %c0_2] : memref<2x16xf32, #tpu.memory_space<vmem>>, vector<1x16xf32>
    %3 = vector.broadcast %1 : vector<128x1xf32> to vector<128x16xf32>
    %4 = vector.broadcast %2 : vector<1x16xf32> to vector<128x16xf32>
    %5 = arith.mulf %3, %4 : vector<128x16xf32>
    %6 = vector.extract_strided_slice %0 {offsets = [0, 1], sizes = [128, 1], strides = [1, 1]} : vector<128x2xf32> to vector<128x1xf32>
    %c1 = arith.constant 1 : index
    %c0_3 = arith.constant 0 : index
    %7 = vector.load %arg2[%c1, %c0_3] : memref<2x16xf32, #tpu.memory_space<vmem>>, vector<1x16xf32>
    %8 = vector.broadcast %6 : vector<128x1xf32> to vector<128x16xf32>
    %9 = vector.broadcast %7 : vector<1x16xf32> to vector<128x16xf32>
    %10 = arith.mulf %8, %9 : vector<128x16xf32>
    %11 = arith.addf %5, %10 : vector<128x16xf32>
    %12 = math.sin %11 : vector<128x16xf32>
    %c0_4 = arith.constant 0 : index
    %c0_5 = arith.constant 0 : index
    %13 = vector.load %arg3[%c0_4, %c0_5] : memref<128x32xf32, #tpu.memory_space<vmem>>, vector<128x16xf32>
    tpu.vector_store %arg3[%c0_4, %c0_5], %12 {strides = array<i32>} : memref<128x32xf32, #tpu.memory_space<vmem>>, vector<128x16xf32>,
    %14 = math.cos %11 : vector<128x16xf32>
    %c0_6 = arith.constant 0 : index
    %c16 = arith.constant 16 : index
    %15 = vector.load %arg3[%c0_6, %c16] : memref<128x32xf32, #tpu.memory_space<vmem>>, vector<128x16xf32>
    tpu.vector_store %arg3[%c0_6, %c16], %14 {strides = array<i32>} : memref<128x32xf32, #tpu.memory_space<vmem>>, vector<128x16xf32>,
    return
  }
  func.func @transform_0(%arg0: i32) -> (i32, i32) {
    %c0_i32 = arith.constant 0 : i32
    %c0_i32_0 = arith.constant 0 : i32
    return %arg0, %c0_i32 : i32, i32
  }
  func.func @transform_1(%arg0: i32) -> (i32, i32) {
    %c0_i32 = arith.constant 0 : i32
    %c0_i32_0 = arith.constant 0 : i32
    %c0_i32_1 = arith.constant 0 : i32
    return %c0_i32, %c0_i32_0 : i32, i32
  }
  func.func @transform_2(%arg0: i32) -> (i32, i32) {
    %c0_i32 = arith.constant 0 : i32
    %c0_i32_0 = arith.constant 0 : i32
    return %arg0, %c0_i32 : i32, i32
  }
}

</mosaic_0001>

<bundles_post_ra>
// kernel: tpu_custom_call.1
= control target key start
LH: loop header
LB: loop body
LE: loop exit
PB: predicated region body
PF: predicated region fallthrough
CT: control target
= control target key end

     0   :  { %s5622_s9 = smov 0   ;;  %s8519_s0 = inlined_call_operand.vmem [shape: f32[256,2], index: 0, kind: input, shape index: {}]   ;;  %s8520_s1 = inlined_call_operand.vmem [shape: f32[2,16], index: 1, kind: input, shape index: {}]   ;;  %s8521_s2 = inlined_call_operand.vmem [shape: f32[256,32], index: 2, kind: output, shape index: {}]  }
   0x1 LB: > { %s5457_s10 = sadd.s32 4294967295, %s5596_s9   ;;  %p5461_p0 = scmp.ge.s32.totalorder %s5596_s9, 1  ;;  %s5596_s9 = sphi %s5622_s9, %s12_s9  }
   0x2   : > { %p113_p1 = scmp.lt.s32.totalorder %s5596_s9, 3 }
   0x4   : > { %p114_p2 = pnand %p5461_p0, %p113_p1 }
   0x6   : > { %117 = sbr.rel (%p114_p2) target bundleno = 931 (0x3a3), region = 28 }
   0xb   : > { %s5462_s11 = sshll.u32 %s5457_s10, 4  ;;  %v8529_v0 = vmov 0   ;;  %v5599_v17 = vmov 1   ;;  %v5662_v30 = vld [vmem:[%s8520_s1 + $0x1] ss:$0 sm:$0xff]  ;;  %s5606_s23 = smov 16  }
   0xc   : > { %5583 = vset.pattern.permute.xlu2 %v8529_v0  ;;  %5582 = vset.pattern.permute.xlu1 %v8529_v0  ;;  %p136_p3 = scmp.lt.s32.totalorder %s5462_s11, 31  ;;  %v5667_v32 = vld [vmem:[%s8520_s1] ss:$0 sm:$0xff] }
   0xd   : > { %5581 = vset.pattern.permute.xlu0 %v8529_v0 }
   0xe   : > { %s8805_s11 = smov (!%p136_p3, %s5462_s11), 31 }
   0xf   : > { %s5463_s12 = sshll.u32 %s8805_s11, 3 }
  0x10   : > { %s5641_s15 = scalar_lea.vmem %s8519_s0, %s5463_s12  ;;  %s6358_s22 = scalar_lea.vmem %s8521_s2, %s5463_s12 }
  0x11   : > { %v151_v1 = vld [vmem:[%s5641_s15 + $0x20] sm:$0xff]  ;;  %v149_v2 = vld [vmem:[%s5641_s15 + $0x10] sm:$0xff]  ;;  %v152_v4 = vld [vmem:[%s5641_s15 + $0x28] sm:$0xff] }
  0x12   : > { %v147_v3 = vld [vmem:[%s5641_s15] sm:$0xff]  ;;  %186 = vperm.xlu2 %5583, %v151_v1   ;;  %176 = vperm.xlu1 %5582, %v149_v2   ;;  %v150_v5 = vld [vmem:[%s5641_s15 + $0x18] sm:$0xff]  ;;  %v148_v6 = vld [vmem:[%s5641_s15 + $0x8] sm:$0xff] }
  0x13   : > { %166 = vperm.xlu0 %5581, %v147_v3   ;;  %v155_v7 = vld [vmem:[%s5641_s15 + $0x40] sm:$0xff]  ;;  %v154_v8 = vld [vmem:[%s5641_s15 + $0x38] sm:$0xff]  ;;  %v153_v9 = vld [vmem:[%s5641_s15 + $0x30] sm:$0xff] }
  0x14   : > { %v158_v10 = vld [vmem:[%s5641_s15 + $0x58] sm:$0xff]  ;;  %v157_v11 = vld [vmem:[%s5641_s15 + $0x50] sm:$0xff]  ;;  %v156_v12 = vld [vmem:[%s5641_s15 + $0x48] sm:$0xff] }
  0x15   : > { %v161_v13 = vld [vmem:[%s5641_s15 + $0x70] sm:$0xff]  ;;  %v160_v14 = vld [vmem:[%s5641_s15 + $0x68] sm:$0xff]  ;;  %v159_v15 = vld [vmem:[%s5641_s15 + $0x60] sm:$0xff] }
  0x16   : > { %v162_v16 = vld [vmem:[%s5641_s15 + $0x78] sm:$0xff] }
  0x1a   : > { %191 = vperm.xlu2 %5583, %v152_v4   ;;  %181 = vperm.xlu1 %5582, %v150_v5  }
  0x1b   : > { %171 = vperm.xlu0 %5581, %v148_v6  }
  0x22   : > { %206 = vperm.xlu2 %5583, %v155_v7   ;;  %201 = vperm.xlu1 %5582, %v154_v8  }
  0x23   : > { %196 = vperm.xlu0 %5581, %v153_v9  }
  0x2a   : > { %221 = vperm.xlu2 %5583, %v158_v10   ;;  %216 = vperm.xlu1 %5582, %v157_v11  }
  0x2b   : > { %211 = vperm.xlu0 %5581, %v156_v12  }
  0x32   : > { %236 = vperm.xlu2 %5583, %v161_v13   ;;  %231 = vperm.xlu1 %5582, %v160_v14  }
  0x33   : > { %226 = vperm.xlu0 %5581, %v159_v15  }
  0x3a   : > { %5585 = vset.pattern.permute.xlu2 %v5599_v17  ;;  %5584 = vset.pattern.permute.xlu1 %v5599_v17 }
  0x3b   : > { %241 = vperm.xlu0 %5581, %v162_v16   ;;  %267 = vperm.xlu2 %5585, %v148_v6  }
  0x3c   : > { %263 = vperm.xlu1 %5584, %v147_v3  }
  0x43   : > { %5586 = vset.pattern.permute.xlu0 %v5599_v17  ;;  %279 = vperm.xlu2 %5585, %v151_v1  }
  0x44   : > { %275 = vperm.xlu1 %5584, %v150_v5   ;;  %271 = vperm.xlu0 %5586, %v149_v2  }
  0x4b   : > { %287 = vperm.xlu2 %5585, %v153_v9  }
  0x4c   : > { %283 = vperm.xlu1 %5584, %v152_v4   ;;  %291 = vperm.xlu0 %5586, %v154_v8  }
  0x53   : > { %299 = vperm.xlu2 %5585, %v156_v12  }
  0x54   : > { %295 = vperm.xlu1 %5584, %v155_v7   ;;  %303 = vperm.xlu0 %5586, %v157_v11  }
  0x5b   : > { %311 = vperm.xlu2 %5585, %v159_v15  }
  0x5c   : > { %307 = vperm.xlu1 %5584, %v158_v10   ;;  %315 = vperm.xlu0 %5586, %v160_v14  }
  0x63   : > { %323 = vperm.xlu2 %5585, %v162_v16  }
  0x64   : > { %319 = vperm.xlu1 %5584, %v161_v13  }
  0x6c   : > { %v187_v18 = vpop.permute.xlu2 %186 }
  0x6d   : > { %v249_v41 = vmul.f32 %v5667_v32, %v187_v18 }
  0x74   : > { %v192_v19 = vpop.permute.xlu2 %191 }
  0x75   : > { %v5698_v6 = vmul.f32 %v5667_v32, %v192_v19 }
  0x7c   : > { %v207_v20 = vpop.permute.xlu2 %206 }
  0x7d   : > { %v5702_v11 = vmul.f32 %v5667_v32, %v207_v20 }
  0x84   : > { %v222_v21 = vpop.permute.xlu2 %221  ;;  %v177_v22 = vpop.permute.xlu1 %176 }
  0x85   : > { %v167_v23 = vpop.permute.xlu0 %166  ;;  %v5705_v12 = vmul.f32 %v5667_v32, %v222_v21  ;;  %v247_v13 = vmul.f32 %v5667_v32, %v177_v22 }
  0x86   : > { %v245_v63 = vmul.f32 %v5667_v32, %v167_v23 }
  0x8c   : > { %v237_v24 = vpop.permute.xlu2 %236  ;;  %v182_v25 = vpop.permute.xlu1 %181 }
  0x8d   : > { %v172_v26 = vpop.permute.xlu0 %171  ;;  %v5710_v16 = vmul.f32 %v5667_v32, %v237_v24  ;;  %v248_v17 = vmul.f32 %v5667_v32, %v182_v25 }
  0x8e   : > { %v246_v35 = vmul.f32 %v5667_v32, %v172_v26 }
  0x8f   : > { %8631 = vst [vmem:[#allocation4_spill] sm:$0xff] %v5710_v16 }
  0x94   : > { %v202_v28 = vpop.permute.xlu1 %201 }
  0x95   : > { %v268_v27 = vpop.permute.xlu2 %267  ;;  %v197_v29 = vpop.permute.xlu0 %196  ;;  %v5717_v20 = vmul.f32 %v5667_v32, %v202_v28 }
  0x96   : > { %v328_v33 = vmul.f32 %v5662_v30, %v268_v27  ;;  %v251_v50 = vmul.f32 %v5667_v32, %v197_v29 }
  0x98   : > { %v5671_v36 = vadd.f32 %v328_v33, %v246_v35 }
  0x9a   : > { %v517_v38 = vand.u32 2139095040, %v5671_v36  ;;  %v8522_v52 = vand.u32 2147483647, %v5671_v36 }
  0x9c   : > { %v217_v34 = vpop.permute.xlu1 %216  ;;  %v518_v43 = vshrl.u32 %v517_v38, 23  ;;  %v521_v60 = vand.u32 8388607, %v8522_v52 }
  0x9d   : > { %v280_v31 = vpop.permute.xlu2 %279  ;;  %v212_v37 = vpop.permute.xlu0 %211  ;;  %v5721_v26 = vmul.f32 %v5667_v32, %v217_v34 }
  0x9e   : > { %v331_v40 = vmul.f32 %v5662_v30, %v280_v31  ;;  %v5469_v46 = vadd.s32 4294967169, %v518_v43  ;;  %v254_v57 = vmul.f32 %v5667_v32, %v212_v37  ;;  %v522_v5 = vor.u32 8388608, %v521_v60 }
  0x9f   : > { %v8531_v43 = vmov 920167782  }
  0xa0   : > { %v5676_v44 = vadd.f32 %v331_v40, %v249_v41  ;;  %v524_v51 = vadd.s32 1, %v5469_v46  ;;  %v5714_v19 = vshll.u32 %v522_v5, 8  ;;  %v8537_v40 = vmov 2102212464  }
  0xa1   : > { %v8527_v5 = vmov 683565275  }
  0xa2   : > { %v982_v47 = vand.u32 2139095040, %v5676_v44  ;;  %vm525_vm0 = vcmp.gt.s32.totalorder %v524_v51, 0  ;;  %v5729_v28 = vand.u32 65535, %v5714_v19 }
  0xa3   : > { %v526_v2 = vsel %vm525_vm0, %v524_v51, 0  ;;  %v8535_v51 = vmov 1326507024  }
  0xa4   : > { %v232_v42 = vpop.permute.xlu1 %231  ;;  %v983_v53 = vshrl.u32 %v982_v47, 23  ;;  %v528_v9 = vand.u32 31, %v526_v2  ;;  %v5726_v31 = vshrl.u32 %v526_v2, 5 }
  0xa5   : > { %v288_v39 = vpop.permute.xlu2 %287  ;;  %v227_v45 = vpop.permute.xlu0 %226  ;;  %v5732_v37 = vmul.f32 %v5667_v32, %v232_v42 }
  0xa6   : > { %v333_v48 = vmul.f32 %v5662_v30, %v288_v39  ;;  %v5478_v61 = vadd.s32 4294967169, %v983_v53  ;;  %v257_v21 = vmul.f32 %v5667_v32, %v227_v45  ;;  %v529_v22 = vsub.s32 32, %v528_v9 }
  0xa7   : > { %8633 = vst [vmem:[#allocation6_spill] sm:$0xff] %v5732_v37  ;;  %v5736_v39 = vshrl.u32 %v5714_v19, 16  ;;  %v540_v41 = vshll.u32 %v8537_v40, %v528_v9  ;;  %vm549_vm2 = vcmp.lt.s32.totalorder %v5726_v31, 4  ;;  %vm546_vm5 = vcmp.lt.s32.totalorder %v5726_v31, 1 }
  0xa8   : > { %v5683_v56 = vadd.f32 %v333_v48, %v251_v50  ;;  %v989_v7 = vadd.s32 1, %v5478_v61  ;;  %v541_v45 = vshrl.u32 %v8531_v43, %v529_v22  ;;  %v543_v48 = vshll.u32 %v8531_v43, %v528_v9 }
  0xa9   : > { %v538_v50 = vshrl.u32 %v8537_v40, %v529_v22  ;;  %v544_v53 = vshrl.u32 %v8535_v51, %v529_v22  ;;  %v8523_v61 = vmov 2131351028   ;;  %vm548_vm7 = vcmp.lt.s32.totalorder %v5726_v31, 3 }
  0xaa   : > { %8629 = vst [vmem:[#allocation2_spill] sm:$0xff] %v5683_v56  ;;  %v1292_v1 = vand.u32 2139095040, %v5683_v56  ;;  %vm990_vm1 = vcmp.gt.s32.totalorder %v989_v7, 0  ;;  %v5754_v2 = vor.u32 %v541_v45, %v540_v41  ;;  %vm547_vm8 = vcmp.lt.s32.totalorder %v5726_v31, 2 }
  0xab   : > { %v991_v33 = vsel %vm990_vm1, %v989_v7, 0  ;;  %v531_v7 = vshll.u32 %v8527_v5, %v528_v9 }
  0xac   : > { %v1293_v10 = vshrl.u32 %v1292_v1, 23  ;;  %v537_v1 = vshll.u32 %v8523_v61, %v528_v9 }
  0xad   : > { %v300_v49 = vpop.permute.xlu2 %299  ;;  %v5686_v58 = vpop.permute.xlu0 %241 }
  0xae   : > { %v336_v54 = vmul.f32 %v5662_v30, %v300_v49  ;;  %v264_v55 = vpop.permute.xlu1 %263  ;;  %v5484_v27 = vadd.s32 4294967169, %v1293_v10  ;;  %v5743_v49 = vand.u32 31, %v991_v33 }
  0xaf   : > { %v327_v59 = vmul.f32 %v5662_v30, %v264_v55  ;;  %v8525_v55 = vmov 2475754826  }
  0xb0   : > { %v5691_v62 = vadd.f32 %v336_v54, %v254_v57  ;;  %v1299_v46 = vadd.s32 1, %v5484_v27  ;;  %v532_v57 = vshrl.u32 %v8525_v55, %v529_v22 }
  0xb1   : > { %v5695_v3 = vadd.f32 %v327_v59, %v245_v63  ;;  %v535_v63 = vshrl.u32 %v8523_v61, %v529_v22 }
  0xb2   : > { %8630 = vst [vmem:[#allocation3_spill] sm:$0xff] %v5691_v62  ;;  %v1757_v8 = vand.u32 2139095040, %v5691_v62  ;;  %vm1300_vm3 = vcmp.gt.s32.totalorder %v1299_v46, 0 }
  0xb3   : > { %v362_v18 = vand.u32 2139095040, %v5695_v3 }
  0xb4   : > { %v1758_v23 = vshrl.u32 %v1757_v8, 23  ;;  %v5759_v8 = vsub.s32 32, %v5743_v49 }
  0xb5   : > { %v312_v4 = vpop.permute.xlu2 %311  ;;  %v363_v35 = vshrl.u32 %v362_v18, 23  ;;  %v530_v18 = vshrl.u32 %v8527_v5, %v529_v22  ;;  %v260_v22 = vmul.f32 %v5667_v32, %v5686_v58  ;;  %v1008_v32 = vshll.u32 %v8531_v43, %v5743_v49 }
  0xb6   : > { %v339_v14 = vmul.f32 %v5662_v30, %v312_v4  ;;  %v276_v15 = vpop.permute.xlu1 %275  ;;  %v272_v29 = vpop.permute.xlu0 %271  ;;  %v5493_v38 = vadd.s32 4294967169, %v1758_v23  ;;  %v1301_v23 = vsel %vm1300_vm3, %v1299_v46, 0 }
  0xb7   : > { %v330_v24 = vmul.f32 %v5662_v30, %v276_v15  ;;  %v329_v34 = vmul.f32 %v5662_v30, %v272_v29  ;;  %v5466_v54 = vadd.s32 4294967169, %v363_v35  ;;  %v545_v15 = vor.u32 %v544_v53, %v543_v48 }
  0xb8   : > { %v5724_v25 = vadd.f32 %v339_v14, %v257_v21  ;;  %v1764_v59 = vadd.s32 1, %v5493_v38  ;;  %v5762_v14 = vor.u32 %v538_v50, %v537_v1  ;;  %v533_v21 = vor.u32 %v532_v57, %v531_v7 }
  0xb9   : > { %v5740_v47 = vadd.f32 %v330_v24, %v248_v17  ;;  %v5750_v60 = vadd.f32 %v329_v34, %v247_v13  ;;  %v534_v13 = vshll.u32 %v8525_v55, %v528_v9  ;;  %v369_v17 = vadd.s32 1, %v5466_v54 }
  0xba   : > { %8632 = vst [vmem:[#allocation5_spill] sm:$0xff] %v5724_v25  ;;  %v2222_v42 = vand.u32 2139095040, %v5724_v25  ;;  %vm1765_vm4 = vcmp.gt.s32.totalorder %v1764_v59, 0  ;;  %v555_v35 = vsel %vm549_vm2, %v5754_v2, 920167782  ;;  %v5769_v38 = vshrl.u32 %v991_v33, 5 }
  0xbb   : > { %8634 = vst [vmem:[#allocation7_spill] sm:$0xff] %v5750_v60  ;;  %v827_v4 = vand.u32 2139095040, %v5740_v47  ;;  %v672_v27 = vand.u32 2139095040, %v5750_v60  ;;  %v536_v29 = vor.u32 %v535_v63, %v534_v13  ;;  %v1006_v34 = vshrl.u32 %v8531_v43, %v5759_v8 }
  0xbc   : > { %v2223_v10 = vshrl.u32 %v2222_v42, 23  ;;  %v551_v45 = vsel %vm549_vm2, %v5762_v14, 2102212464  ;;  %v5779_v46 = vand.u32 31, %v1301_v23  ;;  %v1766_v48 = vsel %vm1765_vm4, %v1764_v59, 0 }
  0xbd   : > { %v324_v24 = vpop.permute.xlu2 %323  ;;  %v828_v9 = vshrl.u32 %v827_v4, 23  ;;  %vm370_vm6 = vcmp.gt.s32.totalorder %v369_v17, 0  ;;  %v1005_v42 = vshll.u32 %v8537_v40, %v5743_v49  ;;  %v1009_v50 = vshrl.u32 %v8535_v51, %v5759_v8 }
  0xbe   : > { %v5502_v41 = vadd.s32 4294967169, %v2223_v10  ;;  %8635 = vst [vmem:[#allocation8_spill] sm:$0xff] %v5779_v46  ;;  %v342_v33 = vmul.f32 %v5662_v30, %v324_v24  ;;  %v673_v53 = vshrl.u32 %v672_v27, 23  ;;  %v550_v54 = vsel %vm546_vm5, %v530_v18, %v533_v21 }
  0xbf   : > { %v5475_v58 = vadd.s32 4294967169, %v828_v9  ;;  %v554_v57 = vsel %vm546_vm5, %v533_v21, %v536_v29  ;;  %v5793_v59 = vand.u32 31, %v1766_v48  ;;  %v371_v63 = vsel %vm370_vm6, %v369_v17, 0 }
  0xc0   : > { %v2229_v1 = vadd.s32 1, %v5502_v41  ;;  %v552_v4 = vsel %vm548_vm7, %v536_v29, %v551_v45  ;;  %v5797_v7 = vor.u32 %v1006_v34, %v1005_v42  ;;  %v5800_v10 = vsub.s32 32, %v5779_v46 }
  0xc1   : > { %8636 = vst [vmem:[#allocation9_spill] sm:$0xff] %v5793_v59  ;;  %v5802_v13 = vadd.f32 %v342_v33, %v260_v22  ;;  %v556_v18 = vsel %vm548_vm7, %v5762_v14, %v555_v35  ;;  %v559_v21 = vsel %vm549_vm2, %v545_v15, 1326507024  ;;  %v1010_v27 = vor.u32 %v1009_v50, %v1008_v32  ;;  %v284_v15 = vpop.permute.xlu1 %283 }
  0xc2   : > { %8637 = vst [vmem:[#allocation10_spill] sm:$0xff] %v5800_v10  ;;  %v5472_v17 = vadd.s32 4294967169, %v673_v53  ;;  %vm1014_vm9 = vcmp.lt.s32.totalorder %v5769_v38, 4  ;;  %v5811_v24 = vand.u32 31, %v371_v63  ;;  %v834_v9 = vadd.s32 1, %v5475_v58 }
  0xc3   : > { %8638 = vst [vmem:[#allocation11_spill] sm:$0xff] %v5802_v13  ;;  %v5815_v34 = vsel %vm547_vm8, %v550_v54, %v552_v4  ;;  %v5817_v22 = vshrl.u32 %v1301_v23, 5  ;;  %v5820_v35 = vsub.s32 32, %v5793_v59  ;;  %vm2230_vm10 = vcmp.gt.s32.totalorder %v2229_v1, 0 }
  0xc4   : > { %v5824_v41 = vsel %vm547_vm8, %v554_v57, %v556_v18  ;;  %v5829_v45 = vsel %vm1014_vm9, %v5797_v7, 920167782  ;;  %v1316_v33 = vshrl.u32 %v8531_v43, %v5800_v10  ;;  %v1319_v23 = vshrl.u32 %v8535_v51, %v5800_v10  ;;  %v292_v18 = vpop.permute.xlu0 %291 }
  0xc5   : > { %8639 = vst [vmem:[#allocation12_spill] sm:$0xff] %v5817_v22  ;;  %v2687_v42 = vand.u32 2139095040, %v5802_v13  ;;  %v5838_v50 = vsel %vm1014_vm9, %v1010_v27, 1326507024  ;;  %v1315_v53 = vshll.u32 %v8537_v40, %v5779_v46  ;;  %v1318_v32 = vshll.u32 %v8531_v43, %v5779_v46 }
  0xc6   : > { %8640 = vst [vmem:[#allocation13_spill] sm:$0xff] %v5820_v35  ;;  %v679_v58 = vadd.s32 1, %v5472_v17  ;;  %v5845_v54 = vsub.s32 32, %v5811_v24  ;;  %v2231_v57 = vsel %vm2230_vm10, %v2229_v1, 0  ;;  %vm835_vm11 = vcmp.gt.s32.totalorder %v834_v9, 0 }
  0xc7   : > { %v332_v4 = vmul.f32 %v5662_v30, %v284_v15  ;;  %vm1324_vm12 = vcmp.lt.s32.totalorder %v5817_v22, 4  ;;  %v1781_v27 = vshrl.u32 %v8531_v43, %v5820_v35  ;;  %v558_v52 = vsel %vm546_vm5, %v536_v29, %v5762_v14 }
  0xc8   : > { %v560_v17 = vsel %vm548_vm7, %v5754_v2, %v559_v21  ;;  %v5857_v61 = vor.u32 %v1316_v33, %v1315_v53  ;;  %v1320_v1 = vor.u32 %v1319_v23, %v1318_v32  ;;  %v1780_v15 = vshll.u32 %v8537_v40, %v5793_v59 }
  0xc9   : > { %v2688_v55 = vshrl.u32 %v2687_v42, 23  ;;  %v1784_v5 = vshrl.u32 %v8535_v51, %v5820_v35  ;;  %v5863_v0 = vand.u32 31, %v2231_v57  ;;  %v836_v43 = vsel %vm835_vm11, %v834_v9, 0 }
  0xca   : > { %8641 = vst [vmem:[#allocation14_spill] sm:$0xff] %v5857_v61  ;;  %vm680_vm13 = vcmp.gt.s32.totalorder %v679_v58, 0  ;;  %v5865_v13 = vshrl.u32 %v1766_v48, 5  ;;  %v8644_v14 = vmov 920167782   ;;  %v389_v2 = vshrl.u32 %v8535_v51, %v5845_v54 }
  0xcb   : > { %8642 = vst [vmem:[#allocation15_spill] sm:$0xff] %v5863_v0  ;;  %v386_v29 = vshrl.u32 %v8644_v14, %v5845_v54  ;;  %v5872_v21 = vadd.f32 %v332_v4, %v5698_v6  ;;  %v5874_v33 = vor.u32 %v1781_v27, %v1780_v15  ;;  %v1783_v23 = vshll.u32 %v8644_v14, %v5793_v59 }
  0xcc   : > { %8643 = vst [vmem:[#allocation16_spill] sm:$0xff] %v5865_v13  ;;  %v5878_v42 = vshrl.u32 %v371_v63, 5  ;;  %v385_v48 = vshll.u32 %v8537_v40, %v5811_v24  ;;  %v388_v9 = vshll.u32 %v8644_v14, %v5811_v24  ;;  %v5884_v53 = vand.u32 31, %v836_v43  ;;  %v296_v63 = vpop.permute.xlu1 %295 }
  0xcd   : > { %8645 = vst [vmem:[#allocation17_spill] sm:$0xff] %v5872_v21  ;;  %v681_v32 = vsel %vm680_vm13, %v679_v58, 0  ;;  %v5511_v51 = vadd.s32 4294967169, %v2688_v55  ;;  %v5889_v6 = vsel %vm1324_vm12, %v5857_v61, 920167782  ;;  %v1785_v4 = vor.u32 %v1784_v5, %v1783_v23  ;;  %v304_v23 = vpop.permute.xlu0 %303 }
  0xce   : > { %8646 = vst [vmem:[#allocation18_spill] sm:$0xff] %v5874_v33  ;;  %v5892_v27 = vsub.s32 32, %v5863_v0  ;;  %v5896_v15 = vsel %vm547_vm8, %v558_v52, %v560_v17  ;;  %vm8617_vm14 = vcmp.lt.s32.totalorder %v5865_v13, 4  ;;  %v5899_v40 = vor.u32 %v386_v29, %v385_v48 }
  0xcf   : > { %8647 = vst [vmem:[#allocation19_spill] sm:$0xff] %v5889_v6  ;;  %v390_v58 = vor.u32 %v389_v2, %v388_v9  ;;  %v1137_v55 = vand.u32 2139095040, %v5872_v21  ;;  %v5904_v25 = vsel %vm1324_vm12, %v1320_v1, 1326507024  ;;  %v5909_v5 = vsel %vm8617_vm14, %v5874_v33, 920167782 }
  0xd0   : > { %8648 = vst [vmem:[#allocation20_spill] sm:$0xff] %v5892_v27  ;;  %vm394_vm15 = vcmp.lt.s32.totalorder %v5878_v42, 4  ;;  %v5912_v52 = vand.u32 31, %v681_v32  ;;  %v5915_v31 = vsub.s32 32, %v5884_v53  ;;  %v2694_v17 = vadd.s32 1, %v5511_v51 }
  0xd1   : > { %8649 = vst [vmem:[#allocation21_spill] sm:$0xff] %v5904_v25  ;;  %v334_v29 = vmul.f32 %v5662_v30, %v292_v18  ;;  %v335_v2 = vmul.f32 %v5662_v30, %v296_v63  ;;  %v5921_v1 = vsel %vm8617_vm14, %v1785_v4, 1326507024  ;;  %v5923_v48 = vshrl.u32 %v2231_v57, 5 }
  0xd2   : > { %8650 = vst [vmem:[#allocation22_spill] sm:$0xff] %v5909_v5  ;;  %v2246_v9 = vshrl.u32 %v8644_v14, %v5892_v27  ;;  %v5927_v5 = vshrl.u32 %v836_v43, 5  ;;  %v5932_v51 = vsel %vm394_vm15, %v5899_v40, 920167782  ;;  %v5936_v18 = vsel %vm394_vm15, %v390_v58, 1326507024 }
  0xd3   : > { %8651 = vst [vmem:[#allocation23_spill] sm:$0xff] %v5912_v52  ;;  %v8654_v63 = vmov 1326507024   ;;  %v1138_v33 = vshrl.u32 %v1137_v55, 23  ;;  %v8655_v57 = vmov 2102212464   ;;  %v2248_v43 = vshll.u32 %v8644_v14, %v5863_v0 }
  0xd4   : > { %8652 = vst [vmem:[#allocation24_spill] sm:$0xff] %v5921_v1  ;;  %v2249_v4 = vshrl.u32 %v8654_v63, %v5892_v27  ;;  %v2245_v1 = vshll.u32 %v8655_v57, %v5863_v0  ;;  %v5945_v13 = vsub.s32 32, %v5912_v52  ;;  %v337_v35 = vmul.f32 %v5662_v30, %v304_v23 }
  0xd5   : > { %8653 = vst [vmem:[#allocation25_spill] sm:$0xff] %v5923_v48  ;;  %v851_v59 = vshrl.u32 %v8644_v14, %v5915_v31  ;;  %vm2695_vm0 = vcmp.gt.s32.totalorder %v2694_v17, 0  ;;  %v5951_v58 = vadd.f32 %v334_v29, %v5717_v20  ;;  %v5954_v55 = vadd.f32 %v335_v2, %v5702_v11 }
  0xd6   : > { %8656 = vst [vmem:[#allocation26_spill] sm:$0xff] %v5945_v13  ;;  %v5956_v27 = vor.u32 %v2246_v9, %v2245_v1  ;;  %vm8616_vm1 = vcmp.lt.s32.totalorder %v5923_v48, 4  ;;  %v850_v0 = vshll.u32 %v8655_v57, %v5884_v53  ;;  %v854_v23 = vshrl.u32 %v8654_v63, %v5915_v31 }
  0xd7   : > { %8657 = vst [vmem:[#allocation27_spill] sm:$0xff] %v5951_v58  ;;  %v2250_v62 = vor.u32 %v2249_v4, %v2248_v43  ;;  %v853_v16 = vshll.u32 %v8644_v14, %v5884_v53  ;;  %vm859_vm2 = vcmp.lt.s32.totalorder %v5927_v5, 4  ;;  %v5481_v20 = vadd.s32 4294967169, %v1138_v33  ;;  %v308_v43 = vpop.permute.xlu1 %307 }
  0xd8   : > { %8658 = vst [vmem:[#allocation28_spill] sm:$0xff] %v5954_v55  ;;  %v5966_v29 = vshrl.u32 %v681_v32, 5  ;;  %v696_v11 = vshrl.u32 %v8644_v14, %v5945_v13  ;;  %v2696_v2 = vsel %vm2695_vm0, %v2694_v17, 0  ;;  %v5971_v1 = vadd.f32 %v337_v35, %v5721_v26 }
  0xd9   : > { %8659 = vst [vmem:[#allocation29_spill] sm:$0xff] %v5956_v27  ;;  %v5973_v9 = vor.u32 %v851_v59, %v850_v0  ;;  %v1447_v21 = vand.u32 2139095040, %v5951_v58  ;;  %v1602_v4 = vand.u32 2139095040, %v5954_v55  ;;  %v566_v6 = vshrl.u32 %v5896_v15, 16 }
  0xda   : > { %8660 = vst [vmem:[#allocation30_spill] sm:$0xff] %v5966_v29  ;;  %v5981_v33 = vsel %vm8616_vm1, %v5956_v27, 920167782  ;;  %v855_v32 = vor.u32 %v854_v23, %v853_v16  ;;  %v695_v17 = vshll.u32 %v8655_v57, %v5912_v52  ;;  %v565_v26 = vand.u32 65535, %v5896_v15 }
  0xdb   : > { %8661 = vst [vmem:[#allocation31_spill] sm:$0xff] %v5971_v1  ;;  %v5988_v0 = vsel %vm8616_vm1, %v2250_v62, 1326507024  ;;  %v699_v59 = vshrl.u32 %v8654_v63, %v5945_v13  ;;  %v5992_v35 = vand.u32 31, %v2696_v2  ;;  %v1144_v55 = vadd.s32 1, %v5481_v20 }
  0xdc   : > { %8662 = vst [vmem:[#allocation32_spill] sm:$0xff] %v5981_v33  ;;  %v5994_v58 = vor.u32 %v696_v11, %v695_v17  ;;  %v1912_v33 = vand.u32 2139095040, %v5971_v1  ;;  %v338_v16 = vmul.f32 %v5662_v30, %v308_v43  ;;  %v568_v23 = vmul.u32 %v566_v6, %v5729_v28 }
  0xdd   : > { %8663 = vst [vmem:[#allocation33_spill] sm:$0xff] %v5988_v0  ;;  %v6002_v15 = vsel %vm859_vm2, %v5973_v9, 920167782  ;;  %v698_v62 = vshll.u32 %v8644_v14, %v5912_v52  ;;  %v1448_v27 = vshrl.u32 %v1447_v21, 23  ;;  %v1603_v0 = vshrl.u32 %v1602_v4, 23 }
  0xde   : > { %8664 = vst [vmem:[#allocation34_spill] sm:$0xff] %v5992_v35  ;;  %v6008_v20 = vsel %vm859_vm2, %v855_v32, 1326507024  ;;  %v567_v11 = vmul.u32 %v565_v26, %v5729_v28  ;;  %v6012_v43 = vmul.u32 %v565_v26, %v5736_v39  ;;  %v571_v17 = vshll.u32 %v568_v23, 16 }
  0xdf   : > { %8665 = vst [vmem:[#allocation35_spill] sm:$0xff] %v5994_v58  ;;  %v700_v48 = vor.u32 %v699_v59, %v698_v62  ;;  %vm704_vm3 = vcmp.lt.s32.totalorder %v5966_v29, 4  ;;  %v6016_v1 = vsub.s32 32, %v5992_v35  ;;  %vm1145_vm4 = vcmp.gt.s32.totalorder %v1144_v55, 0 }
  0xe0   : > { %v6021_v21 = vsel %vm704_vm3, %v5994_v58, 920167782  ;;  %v1913_v4 = vshrl.u32 %v1912_v33, 23  ;;  %v6024_v32 = vadd.f32 %v338_v16, %v5705_v12  ;;  %vm575_vm5 = vc.u32 %v567_v11, %v571_v17 }
  0xe1   : > { %8666 = vst [vmem:[#allocation36_spill] sm:$0xff] %v6016_v1  ;;  %v5487_v26 = vadd.s32 4294967169, %v1448_v27  ;;  %v5490_v61 = vadd.s32 4294967169, %v1603_v0  ;;  %v570_v59 = vmul.u32 %v566_v6, %v5736_v39  ;;  %v8669_v62 = vmov 0   ;;  %v316_v0 = vpop.permute.xlu0 %315 }
  0xe2   : > { %8667 = vst [vmem:[#allocation37_spill] sm:$0xff] %v6021_v21  ;;  %v576_v25 = vsel %vm575_vm5, 1, %v8669_v62  ;;  %v1146_v22 = vsel %vm1145_vm4, %v1144_v55, 0  ;;  %v573_v46 = vshll.u32 %v6012_v43, 16  ;;  %v577_v10 = vadd.s32 %v571_v17, %v567_v11 }
  0xe3   : > { %8668 = vst [vmem:[#allocation38_spill] sm:$0xff] %v6024_v32  ;;  %v588_v56 = vshrl.u32 %v5824_v41, 16  ;;  %v6032_v21 = vsel %vm704_vm3, %v700_v48, 1326507024  ;;  %v2711_v12 = vshrl.u32 %v8644_v14, %v6016_v1  ;;  %v578_v33 = vadd.s32 %v576_v25, %v570_v59 }
  0xe4   : > { %8670 = vst [vmem:[#allocation39_spill] sm:$0xff] %v6032_v21  ;;  %v587_v27 = vand.u32 65535, %v5824_v41  ;;  %v6039_v6 = vshrl.u32 %v8654_v63, %v6016_v1  ;;  %v2067_v55 = vand.u32 2139095040, %v6024_v32  ;;  %vm579_vm6 = vc.u32 %v577_v10, %v573_v46 }
  0xe5   : > { %v590_v16 = vmul.u32 %v588_v56, %v5729_v28  ;;  %v6043_v11 = vshrl.u32 %v2696_v2, 5  ;;  %v6045_v48 = vand.u32 31, %v1146_v22  ;;  %v5496_v17 = vadd.s32 4294967169, %v1913_v4 }
  0xe6   : > { %8671 = vst [vmem:[#allocation40_spill] sm:$0xff] %v6039_v6  ;;  %v580_v58 = vsel %vm579_vm6, 1, %v8669_v62  ;;  %v2710_v25 = vshll.u32 %v8655_v57, %v5992_v35  ;;  %v6052_v41 = vshll.u32 %v8644_v14, %v5992_v35  ;;  %v1454_v59 = vadd.s32 1, %v5487_v26 }
  0xe7   : > { %8672 = vst [vmem:[#allocation41_spill] sm:$0xff] %v6043_v11  ;;  %v1609_v1 = vadd.s32 1, %v5490_v61  ;;  %v6055_v46 = vmul.f32 %v5662_v30, %v316_v0  ;;  %v582_v10 = vadd.s32 %v580_v58, %v578_v33  ;;  %v591_v2 = vmul.u32 %v587_v27, %v5736_v39 }
  0xe8   : > { %8673 = vst [vmem:[#allocation42_spill] sm:$0xff] %v6045_v48  ;;  %v593_v11 = vshll.u32 %v590_v16, 16  ;;  %v6058_v32 = vor.u32 %v2711_v12, %v2710_v25  ;;  %v2068_v21 = vshrl.u32 %v2067_v55, 23  ;;  %v589_v29 = vmul.u32 %v587_v27, %v5729_v28 }
  0xe9   : > { %8674 = vst [vmem:[#allocation43_spill] sm:$0xff] %v6052_v41  ;;  %v6063_v52 = vshrl.u32 %v1146_v22, 5  ;;  %v6066_v26 = vsub.s32 32, %v6045_v48  ;;  %v6068_v61 = vadd.s32 1, %v5496_v17  ;;  %v572_v30 = vshrl.u32 %v568_v23, 16 }
  0xea   : > { %8675 = vst [vmem:[#allocation44_spill] sm:$0xff] %v6055_v46  ;;  %vm1455_vm7 = vcmp.gt.s32.totalorder %v1454_v59, 0  ;;  %vm1610_vm8 = vcmp.gt.s32.totalorder %v1609_v1, 0  ;;  %v592_v58 = vmul.u32 %v588_v56, %v5736_v39  ;;  %vm597_vm10 = vc.u32 %v589_v29, %v593_v11 }
  0xeb   : > { %8676 = vst [vmem:[#allocation45_spill] sm:$0xff] %v6058_v32  ;;  %v583_v12 = vadd.s32 %v582_v10, %v572_v30  ;;  %v595_v33 = vshll.u32 %v591_v2, 16  ;;  %v598_v0 = vsel %vm597_vm10, 1, %v8669_v62  ;;  %v599_v55 = vadd.s32 %v593_v11, %v589_v29 }
  0xec   : > { %8677 = vst [vmem:[#allocation46_spill] sm:$0xff] %v6063_v52  ;;  %v1160_v28 = vshll.u32 %v8655_v57, %v6045_v48  ;;  %v6076_v22 = vshll.u32 %v8644_v14, %v6045_v48  ;;  %v5499_v27 = vadd.s32 4294967169, %v2068_v21  ;;  %v600_v17 = vadd.s32 %v598_v0, %v592_v58 }
  0xed   : > { %8678 = vst [vmem:[#allocation47_spill] sm:$0xff] %v6066_v26  ;;  %v1161_v23 = vshrl.u32 %v8644_v14, %v6066_v26  ;;  %v574_v56 = vshrl.u32 %v6012_v43, 16  ;;  %vm601_vm11 = vc.u32 %v599_v55, %v595_v33  ;;  %v8588_v39 = vand.u32 2147483647, %v5676_v44 }
  0xee   : > { %v6084_v29 = vshrl.u32 %v8654_v63, %v6066_v26  ;;  %v1456_v11 = vsel %vm1455_vm7, %v1454_v59, 0  ;;  %v1611_v25 = vsel %vm1610_vm8, %v1609_v1, 0  ;;  %v602_v10 = vsel %vm601_vm11, 1, %v8669_v62 }
  0xef   : > { %v6089_v21 = vadd.s32 %v583_v12, %v574_v56  ;;  %v594_v30 = vshrl.u32 %v590_v16, 16  ;;  %v596_v58 = vshrl.u32 %v591_v2, 16  ;;  %v604_v0 = vadd.s32 %v602_v10, %v600_v17 }
  0xf0   : > { %vm1920_vm13 = vcmp.gt.s32.totalorder %v6068_v61, 0  ;;  %v986_v43 = vand.u32 8388607, %v8588_v39  ;;  %v8679_v4 = vmov 683565275   ;;  %v1003_v17 = vshrl.u32 %v8655_v57, %v5759_v8 }
  0xf1   : > { %v996_v35 = vshll.u32 %v8679_v4, %v5743_v49  ;;  %v8680_v41 = vmov 2475754826   ;;  %v605_v6 = vadd.s32 %v604_v0, %v594_v30  ;;  %v8681_v12 = vmov 2131351028  }
  0xf2   : > { %v997_v59 = vshrl.u32 %v8680_v41, %v5759_v8  ;;  %v999_v1 = vshll.u32 %v8680_v41, %v5743_v49  ;;  %v1000_v16 = vshrl.u32 %v8681_v12, %v5759_v8  ;;  %v1002_v2 = vshll.u32 %v8681_v12, %v5743_v49 }
  0xf3   : > { %v6106_v56 = vshrl.u32 %v1456_v11, 5  ;;  %v6108_v10 = vadd.s32 %v599_v55, %v595_v33  ;;  %v987_v39 = vor.u32 8388608, %v986_v43  ;;  %v606_v26 = vadd.s32 %v605_v6, %v596_v58 }
  0xf4   : > { %v998_v32 = vor.u32 %v997_v59, %v996_v35  ;;  %v1001_v48 = vor.u32 %v1000_v16, %v999_v1  ;;  %v1004_v13 = vor.u32 %v1003_v17, %v1002_v2  ;;  %vm1013_vm0 = vcmp.lt.s32.totalorder %v5769_v38, 3 }
  0xf5   : > { %8682 = vst [vmem:[#allocation48_spill] sm:$0xff] %v6106_v56  ;;  %vm609_vm4 = vc.u32 %v6089_v21, %v6108_v10  ;;  %vm1011_vm5 = vcmp.lt.s32.totalorder %v5769_v38, 1  ;;  %v1025_v49 = vsel %vm1013_vm0, %v5797_v7, %v5838_v50  ;;  %v6118_v30 = vshll.u32 %v987_v39, 8 }
  0xf6   : > { %v610_v33 = vadd.s32 1, %v606_v26  ;;  %vm1012_vm6 = vcmp.lt.s32.totalorder %v5769_v38, 2  ;;  %v1019_v35 = vsel %vm1011_vm5, %v998_v32, %v1001_v48  ;;  %v1021_v6 = vsel %vm1013_vm0, %v1004_v13, %v5829_v45 }
  0xf7   : > { %v6126_v55 = vand.u32 31, %v1456_v11  ;;  %v607_v58 = vmul.u32 %v5714_v19, %v5815_v34  ;;  %v1022_v7 = vsel %vm1012_vm6, %v1019_v35, %v1021_v6  ;;  %v1023_v50 = vsel %vm1011_vm5, %v1001_v48, %v1004_v13 }
  0xf8   : > { %v6134_v39 = vshrl.u32 %v1611_v25, 5  ;;  %v611_v0 = vsel %vm609_vm4, %v610_v33, %v606_v26  ;;  %v1026_v43 = vsel %vm1012_vm6, %v1023_v50, %v1025_v49  ;;  %v1028_v59 = vand.u32 65535, %v6118_v30 }
  0xf9   : > { %8683 = vst [vmem:[#allocation49_spill] sm:$0xff] %v6126_v55  ;;  %v612_v45 = vadd.s32 %v611_v0, %v607_v58  ;;  %v1029_v11 = vshrl.u32 %v6118_v30, 16  ;;  %v1030_v1 = vand.u32 65535, %v1026_v43  ;;  %v1031_v16 = vshrl.u32 %v1026_v43, 16 }
  0xfa   : > { %8684 = vst [vmem:[#allocation50_spill] sm:$0xff] %v6134_v39  ;;  %v6140_v19 = vor.u32 %v1161_v23, %v1160_v28  ;;  %v6142_v34 = vand.u32 31, %v1611_v25  ;;  %v1052_v2 = vand.u32 65535, %v1022_v7  ;;  %v1053_v17 = vshrl.u32 %v1022_v7, 16 }
  0xfb   : > { %v1165_v35 = vor.u32 %v6084_v29, %v6076_v22  ;;  %v613_v26 = vadd.s32 536870912, %v612_v45  ;;  %v1033_v33 = vmul.u32 %v1031_v16, %v1028_v59  ;;  %v1034_v6 = vmul.u32 %v1030_v1, %v1029_v11 }
  0xfc   : > { %8685 = vst [vmem:[#allocation51_spill] sm:$0xff] %v6140_v19  ;;  %v6149_v49 = vsel %vm1920_vm13, %v6068_v61, 0  ;;  %v6151_v58 = vadd.s32 1, %v5499_v27  ;;  %v995_v28 = vshrl.u32 %v8679_v4, %v5759_v8  ;;  %v1055_v23 = vmul.u32 %v1053_v17, %v1028_v59 }
  0xfd   : > { %8686 = vst [vmem:[#allocation52_spill] sm:$0xff] %v6142_v34  ;;  %v614_v25 = vshrl.u32 %v613_v26, 30  ;;  %v1016_v7 = vsel %vm1014_vm9, %v1004_v13, 2102212464  ;;  %v1032_v50 = vmul.u32 %v1030_v1, %v1028_v59  ;;  %v1036_v22 = vshll.u32 %v1033_v33, 16 }
  0xfe   : > { %8687 = vst [vmem:[#allocation53_spill] sm:$0xff] %v6151_v58  ;;  %vm516_vm7 = vcmp.lt.s32.totalorder %v5671_v36, 0  ;;  %v1035_v29 = vmul.u32 %v1031_v16, %v1029_v11  ;;  %v1054_v0 = vmul.u32 %v1052_v2, %v1028_v59  ;;  %v1056_v43 = vmul.u32 %v1052_v2, %v1029_v11 }
  0xff   : > { %v1058_v39 = vshll.u32 %v1055_v23, 16  ;;  %vm8618_vm8 = vcmp.lt.s32.totalorder %v6063_v52, 4  ;;  %v615_v61 = vshll.u32 %v614_v25, 30  ;;  %v1038_v27 = vshll.u32 %v1034_v6, 16 }
 0x100   : > { %vm1040_vm10 = vc.u32 %v1032_v50, %v1036_v22  ;;  %v1042_v58 = vadd.s32 %v1036_v22, %v1032_v50  ;;  %v1015_v8 = vsel %vm1011_vm5, %v995_v28, %v998_v32  ;;  %v1017_v13 = vsel %vm1013_vm0, %v1001_v48, %v1016_v7 }
 0x101   : > { %v1041_v1 = vsel %vm1040_vm10, 1, %v8669_v62  ;;  %vm1062_vm9 = vc.u32 %v1054_v0, %v1058_v39  ;;  %v8688_v16 = vand.u32 2147483647, %v5671_v36  ;;  %v616_v2 = vsub.s32 %v612_v45, %v615_v61 }
 0x102   : > { %v1043_v26 = vadd.s32 %v1041_v1, %v1035_v29  ;;  %vm1044_vm13 = vc.u32 %v1042_v58, %v1038_v27  ;;  %v1057_v56 = vmul.u32 %v1053_v17, %v1029_v11  ;;  %v1060_v22 = vshll.u32 %v1056_v43, 16 }
 0x103   : > { %vm6166_vm11 = vcmp.le.f32.partialorder %v8688_v16, 0.7853982  ;;  %v1045_v50 = vsel %vm1044_vm13, 1, %v8669_v62  ;;  %v1063_v32 = vsel %vm1062_vm9, 1, %v8669_v62  ;;  %v1064_v28 = vadd.s32 %v1058_v39, %v1054_v0 }
 0x104   : > { %v6173_v48 = vsub.s32 32, %v6126_v55  ;;  %vm617_vm0 = vcmp.lt.s32.totalorder %v616_v2, 0  ;;  %v618_v7 = vsub.s32 0, %v616_v2  ;;  %v638_v60 = vsub.s32 4, %v614_v25 }
 0x105   : > { %v1037_v16 = vshrl.u32 %v1033_v33, 16  ;;  %v1047_v46 = vadd.s32 %v1045_v50, %v1043_v26  ;;  %v1065_v37 = vadd.s32 %v1063_v32, %v1057_v56  ;;  %vm1066_vm4 = vc.u32 %v1064_v28, %v1060_v22 }
 0x106   : > { %8691 = vst [vmem:[#allocation54_spill] sm:$0xff] %v6173_v48  ;;  %v6177_v45 = vshll.u32 %v8655_v57, %v6126_v55  ;;  %v6181_v11 = vshll.u32 %v8644_v14, %v6126_v55  ;;  %v619_v17 = vsel %vm617_vm0, %v618_v7, %v616_v2  ;;  %v1018_v39 = vsel %vm1012_vm6, %v1015_v8, %v1017_v13 }
 0x107   : > { %v620_v58 = vclz %v619_v17  ;;  %v1039_v29 = vshrl.u32 %v1034_v6, 16  ;;  %v1048_v0 = vadd.s32 %v1047_v46, %v1037_v16  ;;  %v1067_v33 = vsel %vm1066_vm4, 1, %v8669_v62 }
 0x108   : > { %v639_v56 = vsel %vm516_vm7, %v638_v60, %v614_v25  ;;  %v1059_v61 = vshrl.u32 %v1055_v23, 16  ;;  %v1069_v27 = vadd.s32 %v1067_v33, %v1065_v37  ;;  %v8601_v1 = vand.u32 2147483647, %v5695_v3 }
 0x109   : > { %v6192_v26 = vsel %vm8618_vm8, %v6140_v19, 920167782  ;;  %v6196_v38 = vsel %vm8618_vm8, %v1165_v35, 1326507024  ;;  %v5470_v6 = vadd.s32 4294967294, %v620_v58  ;;  %v6198_v46 = vadd.s32 %v1048_v0, %v1039_v29 }
 0x10a   : > { %8692 = vst [vmem:[#allocation55_spill] sm:$0xff] %v6192_v26  ;;  %v6201_v8 = vsub.s32 32, %v6142_v34  ;;  %v608_v37 = vadd.s32 %v6108_v10, %v6089_v21  ;;  %v1061_v60 = vshrl.u32 %v1056_v43, 16  ;;  %v1070_v23 = vadd.s32 %v1069_v27, %v1059_v61 }
 0x10b   : > { %8693 = vst [vmem:[#allocation56_spill] sm:$0xff] %v6196_v38  ;;  %vm5471_vm5 = vcmp.lt.s32.totalorder %v5470_v6, 0  ;;  %v641_v25 = vsel %vm6166_vm11, 0, %v639_v56  ;;  %v6207_v13 = vadd.s32 %v1064_v28, %v1060_v22  ;;  %v1072_v35 = vmul.u32 %v6118_v30, %v1018_v39 }
 0x10c   : > { %8694 = vst [vmem:[#allocation57_spill] sm:$0xff] %v6201_v8  ;;  %v623_v50 = vsel %vm5471_vm5, 0, %v5470_v6  ;;  %v1071_v32 = vadd.s32 %v1070_v23, %v1061_v60  ;;  %v366_v7 = vand.u32 8388607, %v8601_v1  ;;  %v376_v16 = vshll.u32 %v8679_v4, %v5811_v24 }
 0x10d   : > { %v624_v17 = vsub.s32 32, %v623_v50  ;;  %v628_v21 = vsub.s32 4294967266, %v623_v50  ;;  %vm1074_vm6 = vc.u32 %v6198_v46, %v6207_v13  ;;  %v379_v10 = vshll.u32 %v8680_v41, %v5811_v24 }
 0x10e   : > { %v1075_v43 = vadd.s32 1, %v1071_v32  ;;  %v380_v30 = vshrl.u32 %v8681_v12, %v5845_v54  ;;  %v382_v22 = vshll.u32 %v8681_v12, %v5811_v24  ;;  %v383_v28 = vshrl.u32 %v8655_v57, %v5845_v54 }
 0x10f   : > { %v625_v39 = vshll.u32 %v616_v2, %v623_v50  ;;  %v626_v58 = vshrl.u32 %v608_v37, %v624_v17  ;;  %v629_v29 = vadd.s32 127, %v628_v21  ;;  %v377_v0 = vshrl.u32 %v8680_v41, %v5845_v54 }
 0x110   : > { %v1076_v33 = vsel %vm1074_vm6, %v1075_v43, %v1071_v32  ;;  %v367_v56 = vor.u32 8388608, %v366_v7  ;;  %v6226_v61 = vor.u32 %v380_v30, %v379_v10  ;;  %v384_v27 = vor.u32 %v383_v28, %v382_v22 }
 0x111   : > { %v627_v6 = vor.u32 %v626_v58, %v625_v39  ;;  %v630_v60 = vshll.u32 %v629_v29, 23  ;;  %v1077_v23 = vadd.s32 %v1076_v33, %v1072_v35  ;;  %vm391_vm10 = vcmp.lt.s32.totalorder %v5878_v42, 1 }
 0x112   : > { %v6231_v24 = vshrl.u32 %v8644_v14, %v6173_v48  ;;  %v6235_v2 = vshrl.u32 %v8654_v63, %v6173_v48  ;;  %v6239_v37 = vshll.u32 %v8655_v57, %v6142_v34  ;;  %v403_v50 = vsel %vm391_vm10, %v6226_v61, %v384_v27 }
 0x113   : > { %v631_v32 = vor.u32 4788187, %v630_v60  ;;  %v1078_v35 = vadd.s32 536870912, %v1077_v23  ;;  %v378_v7 = vor.u32 %v377_v0, %v376_v16  ;;  %vm393_vm9 = vcmp.lt.s32.totalorder %v5878_v42, 3 }
 0x114   : > { %v658_v17 = vadd.s32 3, %v641_v25  ;;  %vm392_vm13 = vcmp.lt.s32.totalorder %v5878_v42, 2  ;;  %v405_v21 = vsel %vm393_vm9, %v5899_v40, %v5936_v18  ;;  %v6250_v10 = vshll.u32 %v367_v56, 8 }
 0x115   : > { %v632_v43 = vand.u32 2147483647, %v631_v32  ;;  %v634_v30 = vcvt.s32.f32 %v627_v6  ;;  %v1079_v22 = vshrl.u32 %v1078_v35, 30  ;;  %v406_v28 = vsel %vm392_vm13, %v403_v50, %v405_v21 }
 0x116   : > { %v6256_v16 = vshll.u32 %v8644_v14, %v6142_v34  ;;  %v408_v39 = vand.u32 65535, %v6250_v10  ;;  %v410_v58 = vand.u32 65535, %v406_v28  ;;  %v411_v29 = vshrl.u32 %v406_v28, 16 }
 0x117   : > { %v635_v0 = vmul.f32 %v634_v30, %v632_v43  ;;  %v1080_v33 = vshll.u32 %v1079_v22, 30  ;;  %v399_v40 = vsel %vm391_vm10, %v378_v7, %v6226_v61  ;;  %v401_v18 = vsel %vm393_vm9, %v384_v27, %v5932_v51 }
 0x118   : > { %v6267_v56 = vshrl.u32 %v8644_v14, %v6201_v8  ;;  %v6271_v6 = vshrl.u32 %v8654_v63, %v6201_v8  ;;  %v6274_v60 = vshrl.u32 %v6149_v49, 5  ;;  %v6276_v50 = vmul.u32 %v411_v29, %v408_v39 }
 0x119   : > { %v636_v32 = vxor.u32 2147483648, %v635_v0  ;;  %v6278_v35 = vand.u32 3, %v658_v17  ;;  %v6280_v21 = vand.u32 3, %v641_v25  ;;  %vm981_vm0 = vcmp.lt.s32.totalorder %v5676_v44, 0 }
 0x11a   : > { %8695 = vst [vmem:[#allocation58_spill] sm:$0xff] %v6274_v60  ;;  %v6283_v51 = vsub.s32 %v1077_v23, %v1080_v33  ;;  %v402_v43 = vsel %vm392_vm13, %v399_v40, %v401_v18  ;;  %v409_v30 = vshrl.u32 %v6250_v10, 16  ;;  %v412_v28 = vmul.u32 %v410_v58, %v408_v39 }
 0x11b   : > { %v416_v1 = vshll.u32 %v6276_v50, 16  ;;  %v637_v8 = vsel %vm516_vm7, %v636_v32, %v635_v0  ;;  %v375_v17 = vshrl.u32 %v8679_v4, %v5845_v54  ;;  %v396_v33 = vsel %vm394_vm15, %v384_v27, 2102212464 }
 0x11c   : > { %vm1082_vm4 = vcmp.lt.s32.totalorder %v6283_v51, 0  ;;  %v1083_v25 = vsub.s32 0, %v6283_v51  ;;  %v6298_v23 = vsel %vm6166_vm11, %v5671_v36, %v637_v8  ;;  %v6302_v40 = vmul.u32 %v410_v58, %v409_v30 }
 0x11d   : > { %vm420_vm5 = vc.u32 %v412_v28, %v416_v1  ;;  %v642_v0 = vmul.f32 %v6298_v23, %v6298_v23  ;;  %v433_v34 = vshrl.u32 %v402_v43, 16  ;;  %v1103_v60 = vsub.s32 4, %v1079_v22 }
 0x11e   : > { %v1084_v18 = vsel %vm1082_vm4, %v1083_v25, %v6283_v51  ;;  %v421_v32 = vsel %vm420_vm5, 1, %v8669_v62  ;;  %v415_v55 = vmul.u32 %v411_v29, %v409_v30  ;;  %v432_v59 = vand.u32 65535, %v402_v43 }
 0x11f   : > { %v1085_v54 = vclz %v1084_v18  ;;  %v643_v8 = vmul.f32 -0.001358992, %v642_v0  ;;  %v650_v48 = vmul.f32 -0.00019511016, %v642_v0  ;;  %v1073_v27 = vadd.s32 %v6207_v13, %v6198_v46 }
 0x120   : > { %v395_v58 = vsel %vm391_vm10, %v375_v17, %v378_v7  ;;  %v418_v19 = vshll.u32 %v6302_v40, 16  ;;  %v422_v38 = vadd.s32 %v416_v1, %v412_v28  ;;  %v423_v25 = vadd.s32 %v421_v32, %v415_v55 }
 0x121   : > { %v5479_v26 = vadd.s32 4294967294, %v1085_v54  ;;  %v644_v52 = vadd.f32 0.041655596, %v643_v8  ;;  %v651_v63 = vadd.f32 0.008332121, %v650_v48  ;;  %v397_v29 = vsel %vm393_vm9, %v6226_v61, %v396_v33 }
 0x122   : > { %v6316_v43 = vmul.u32 %v433_v34, %v408_v39  ;;  %v8696_v18 = vand.u32 2147483647, %v5676_v44  ;;  %v1104_v13 = vsel %vm981_vm0, %v1103_v60, %v1079_v22  ;;  %vm424_vm11 = vc.u32 %v422_v38, %v418_v19 }
 0x123   : > { %vm5480_vm7 = vcmp.lt.s32.totalorder %v5479_v26, 0  ;;  %v434_v55 = vmul.u32 %v432_v59, %v408_v39  ;;  %v645_v1 = vmul.f32 %v644_v52, %v642_v0  ;;  %v652_v48 = vmul.f32 %v651_v63, %v642_v0 }
 0x124   : > { %vm6320_vm15 = vcmp.le.f32.partialorder %v8696_v18, 0.7853982  ;;  %v1088_v7 = vsel %vm5480_vm7, 0, %v5479_v26  ;;  %v425_v28 = vsel %vm424_vm11, 1, %v8669_v62  ;;  %v436_v32 = vmul.u32 %v432_v59, %v409_v30 }
 0x125   : > { %v1089_v61 = vsub.s32 32, %v1088_v7  ;;  %v1093_v17 = vsub.s32 4294967266, %v1088_v7  ;;  %v427_v33 = vadd.s32 %v425_v28, %v423_v25  ;;  %v646_v54 = vadd.f32 -0.4999988, %v645_v1 }
 0x126   : > { %v653_v8 = vadd.f32 -0.16666654, %v652_v48  ;;  %vm3159_vm6 = vcmp.eq.s32.totalorder %v6280_v21, 2  ;;  %v417_v18 = vshrl.u32 %v6276_v50, 16  ;;  %v438_v14 = vshll.u32 %v6316_v43, 16 }
 0x127   : > { %vm661_vm10 = vcmp.eq.s32.totalorder %v6278_v35, 0  ;;  %vm664_vm9 = vcmp.eq.s32.totalorder %v6278_v35, 2  ;;  %vm3156_vm4 = vcmp.eq.s32.totalorder %v6280_v21, 0  ;;  %v1090_v52 = vshll.u32 %v6283_v51, %v1088_v7 }
 0x128   : > { %v1091_v63 = vshrl.u32 %v1073_v27, %v1089_v61  ;;  %v1094_v19 = vadd.s32 127, %v1093_v17  ;;  %v437_v26 = vmul.u32 %v433_v34, %v409_v30  ;;  %v647_v38 = vmul.f32 %v646_v54, %v642_v0 }
 0x129   : > { %v654_v22 = vmul.f32 %v653_v8, %v642_v0  ;;  %vm660_vm5 = vcmp.lt.s32.totalorder %v6278_v35, 2  ;;  %vm3155_vm7 = vcmp.lt.s32.totalorder %v6280_v21, 2  ;;  %v428_v39 = vadd.s32 %v427_v33, %v417_v18 }
 0x12a   : > { %vm442_vm11 = vc.u32 %v434_v55, %v438_v14  ;;  %vm657_vm1 = vweird.f32 %v5671_v36  ;;  %v1092_v60 = vor.u32 %v1091_v63, %v1090_v52  ;;  %v1095_v50 = vshll.u32 %v1094_v19, 23 }
 0x12b   : > { %v440_v59 = vshll.u32 %v436_v32, 16  ;;  %v443_v25 = vsel %vm442_vm11, 1, %v8669_v62  ;;  %v648_v1 = vadd.f32 1.0, %v647_v38  ;;  %v655_v51 = vadd.f32 1.0, %v654_v22 }
 0x12c   : > { %v444_v27 = vadd.s32 %v438_v14, %v434_v55  ;;  %v445_v48 = vadd.s32 %v443_v25, %v437_v26  ;;  %vm2839_vm14 = vcmask 130048   ;;  %v1096_v34 = vor.u32 4788187, %v1095_v50 }
 0x12d   : > { %v398_v30 = vsel %vm392_vm13, %v395_v58, %v397_v29  ;;  %v419_v0 = vshrl.u32 %v6302_v40, 16  ;;  %v656_v7 = vmul.f32 %v655_v51, %v6298_v23  ;;  %v665_v28 = vxor.u32 2147483648, %v648_v1 }
 0x12e   : > { %v1106_v61 = vsel %vm6320_vm15, 0, %v1104_v13  ;;  %vm446_vm8 = vc.u32 %v444_v27, %v440_v59  ;;  %v1097_v17 = vand.u32 2147483647, %v1096_v34  ;;  %v1099_v33 = vcvt.s32.f32 %v1092_v60 }
 0x12f   : > { %v6344_v54 = vadd.s32 %v428_v39, %v419_v0  ;;  %v447_v14 = vsel %vm446_vm8, 1, %v8669_v62  ;;  %v662_v55 = vxor.u32 2147483648, %v656_v7  ;;  %v439_v42 = vshrl.u32 %v6316_v43, 16 }
 0x130   : > { %v449_v58 = vadd.s32 %v447_v14, %v445_v48  ;;  %v824_v40 = vand.u32 2147483647, %v5740_v47  ;;  %v3161_v23 = vsel %vm3159_vm6, %v665_v28, %v656_v7  ;;  %v1100_v29 = vmul.f32 %v1099_v33, %v1097_v17 }
 0x131   : > { %v441_v8 = vshrl.u32 %v436_v32, 16  ;;  %v6351_v18 = vadd.s32 %v444_v27, %v440_v59  ;;  %v3158_v43 = vsel %vm3156_vm4, %v648_v1, %v662_v55  ;;  %v663_v13 = vsel %vm661_vm10, %v648_v1, %v662_v55 }
 0x132   : > { %v666_v52 = vsel %vm664_vm9, %v665_v28, %v656_v7  ;;  %v450_v63 = vadd.s32 %v449_v58, %v439_v42  ;;  %v3162_v32 = vsel %vm3155_vm7, %v3158_v43, %v3161_v23  ;;  %v1101_v26 = vxor.u32 2147483648, %v1100_v29 }
 0x133   : > { %v667_v19 = vsel %vm660_vm5, %v663_v13, %v666_v52  ;;  %vm454_vm8 = vc.u32 %v6344_v54, %v6351_v18  ;;  %v3163_v38 = vsel %vm657_vm1, nan, %v3162_v32  ;;  %v831_v60 = vand.u32 8388607, %v824_v40 }
 0x134   : > { %v668_v22 = vsel %vm657_vm1, nan, %v667_v19  ;;  %v451_v39 = vadd.s32 %v450_v63, %v441_v8  ;;  %5338 = vrot.lane.b32.xlu1 %v3163_v38, %s5606_s23  ;;  %v1102_v35 = vsel %vm981_vm0, %v1101_v26, %v1100_v29  ;;  %v1123_v21 = vadd.s32 3, %v1106_v61 }
 0x135   : > { %2841 = vst.msk [vmem:[%s6358_s22 + $0x8] sm:$0xff] %vm2839_vm14, %v668_v22  ;;  %v841_v50 = vshll.u32 %v8679_v4, %v5884_v53  ;;  %v842_v36 = vshrl.u32 %v8680_v41, %v5915_v31  ;;  %v6390_v59 = vsel %vm6320_vm15, %v5676_v44, %v1102_v35  ;;  %v844_v1 = vshll.u32 %v8680_v41, %v5884_v53 }
 0x136   : > { %v455_v25 = vadd.s32 1, %v451_v39  ;;  %v845_v51 = vshrl.u32 %v8681_v12, %v5915_v31  ;;  %v1107_v27 = vmul.f32 %v6390_v59, %v6390_v59  ;;  %v452_v48 = vmul.u32 %v6250_v10, %v398_v30 }
 0x137   : > { %v847_v34 = vshll.u32 %v8681_v12, %v5884_v53  ;;  %v848_v46 = vshrl.u32 %v8655_v57, %v5915_v31  ;;  %v832_v7 = vor.u32 8388608, %v831_v60  ;;  %v843_v28 = vor.u32 %v842_v36, %v841_v50 }
 0x138   : > { %v456_v0 = vsel %vm454_vm8, %v455_v25, %v451_v39  ;;  %v846_v17 = vor.u32 %v845_v51, %v844_v1  ;;  %v1108_v33 = vmul.f32 -0.001358992, %v1107_v27  ;;  %v1115_v14 = vmul.f32 -0.00019511016, %v1107_v27 }
 0x139   : > { %v457_v55 = vadd.s32 %v456_v0, %v452_v48  ;;  %v849_v42 = vor.u32 %v848_v46, %v847_v34  ;;  %v6406_v58 = vand.u32 3, %v1123_v21  ;;  %v6408_v10 = vand.u32 3, %v1106_v61 }
 0x13a   : > { %vm856_vm1 = vcmp.lt.s32.totalorder %v5927_v5, 1  ;;  %vm858_vm13 = vcmp.lt.s32.totalorder %v5927_v5, 3  ;;  %v1109_v53 = vadd.f32 0.041655596, %v1108_v33  ;;  %v1116_v30 = vadd.f32 0.008332121, %v1115_v14 }
 0x13b   : > { %v458_v23 = vadd.s32 536870912, %v457_v55  ;;  %v870_v29 = vsel %vm858_vm13, %v5973_v9, %v6008_v20  ;;  %v864_v8 = vsel %vm856_vm1, %v843_v28, %v846_v17  ;;  %v866_v61 = vsel %vm858_vm13, %v849_v42, %v6002_v15 }
 0x13c   : > { %v868_v43 = vsel %vm856_vm1, %v846_v17, %v849_v42  ;;  %v6423_v13 = vshll.u32 %v832_v7, 8  ;;  %v1110_v52 = vmul.f32 %v1109_v53, %v1107_v27  ;;  %v1117_v63 = vmul.f32 %v1116_v30, %v1107_v27 }
 0x13d   : > { %v6425_v32 = vshrl.u32 %v458_v23, 30  ;;  %vm857_vm0 = vcmp.lt.s32.totalorder %v5927_v5, 2  ;;  %v6430_v9 = vor.u32 %v6231_v24, %v6177_v45  ;;  %v1475_v20 = vor.u32 %v6235_v2, %v6181_v11 }
 0x13e   : > { %v6435_v15 = vand.u32 31, %v6149_v49  ;;  %v871_v19 = vsel %vm857_vm0, %v868_v43, %v870_v29  ;;  %v1111_v26 = vadd.f32 -0.4999988, %v1110_v52  ;;  %v1118_v38 = vadd.f32 -0.16666654, %v1117_v63 }
 0x13f   : > { %v460_v22 = vshll.u32 %v6425_v32, 30  ;;  %v6442_v39 = vsel %vm857_vm0, %v864_v8, %v866_v61  ;;  %vm3618_vm15 = vcmp.eq.s32.totalorder %v6408_v10, 0  ;;  %vm3621_vm6 = vcmp.eq.s32.totalorder %v6408_v10, 2 }
 0x140   : > { %v873_v45 = vand.u32 65535, %v6423_v13  ;;  %v876_v24 = vshrl.u32 %v871_v19, 16  ;;  %v1112_v49 = vmul.f32 %v1111_v26, %v1107_v27  ;;  %v1119_v60 = vmul.f32 %v1118_v38, %v1107_v27 }
 0x141   : > { %vm1125_vm10 = vcmp.lt.s32.totalorder %v6406_v58, 2  ;;  %vm3617_vm9 = vcmp.lt.s32.totalorder %v6408_v10, 2  ;;  %v6449_v35 = vsub.s32 %v457_v55, %v460_v22  ;;  %v840_v21 = vshrl.u32 %v8679_v4, %v5915_v31 }
 0x142   : > { %vm1122_vm4 = vweird.f32 %v5676_v44  ;;  %v861_v50 = vsel %vm859_vm2, %v849_v42, 2102212464  ;;  %v6456_v36 = vmul.u32 %v876_v24, %v873_v45  ;;  %v897_v25 = vand.u32 65535, %v6442_v39 }
 0x143   : > { %v898_v1 = vshrl.u32 %v6442_v39, 16  ;;  %v1113_v51 = vadd.f32 1.0, %v1112_v49  ;;  %v1120_v27 = vadd.f32 1.0, %v1119_v60  ;;  %vm462_vm5 = vcmp.lt.s32.totalorder %v6449_v35, 0 }
 0x144   : > { %v463_v48 = vsub.s32 0, %v6449_v35  ;;  %vm1126_vm7 = vcmp.eq.s32.totalorder %v6406_v58, 0  ;;  %vm1129_vm11 = vcmp.eq.s32.totalorder %v6406_v58, 2  ;;  %vm361_vm8 = vcmp.lt.s32.totalorder %v5695_v3, 0 }
 0x145   : > { %v453_v31 = vadd.s32 %v6351_v18, %v6344_v54  ;;  %v875_v34 = vand.u32 65535, %v871_v19  ;;  %v1121_v46 = vmul.f32 %v1120_v27, %v6390_v59  ;;  %v1130_v0 = vxor.u32 2147483648, %v1113_v51 }
 0x146   : > { %v464_v7 = vsel %vm462_vm5, %v463_v48, %v6449_v35  ;;  %v860_v33 = vsel %vm856_vm1, %v840_v21, %v843_v28  ;;  %v862_v55 = vsel %vm858_vm13, %v846_v17, %v861_v50  ;;  %v874_v42 = vshrl.u32 %v6423_v13, 16 }
 0x147   : > { %v465_v14 = vclz %v464_v7  ;;  %v881_v53 = vshll.u32 %v6456_v36, 16  ;;  %v1127_v30 = vxor.u32 2147483648, %v1121_v46  ;;  %v483_v54 = vsub.s32 4, %v6425_v32 }
 0x148   : > { %v899_v18 = vmul.u32 %v897_v25, %v873_v45  ;;  %v6476_v23 = vmul.u32 %v898_v1, %v873_v45  ;;  %v877_v29 = vmul.u32 %v875_v34, %v873_v45  ;;  %v879_v8 = vmul.u32 %v875_v34, %v874_v42 }
 0x149   : > { %v5467_v59 = vadd.s32 4294967294, %v465_v14  ;;  %v880_v61 = vmul.u32 %v876_v24, %v874_v42  ;;  %v1128_v28 = vsel %vm1126_vm7, %v1113_v51, %v1127_v30  ;;  %v1131_v17 = vsel %vm1129_vm11, %v1130_v0, %v1121_v46 }
 0x14a   : > { %v3620_v43 = vsel %vm3618_vm15, %v1113_v51, %v1127_v30  ;;  %v3623_v52 = vsel %vm3621_vm6, %v1130_v0, %v1121_v46  ;;  %v1132_v63 = vsel %vm1125_vm10, %v1128_v28, %v1131_v17  ;;  %vm885_vm1 = vc.u32 %v877_v29, %v881_v53 }
 0x14b   : > { %v3624_v19 = vsel %vm3617_vm9, %v3620_v43, %v3623_v52  ;;  %vm5468_vm2 = vcmp.lt.s32.totalorder %v5467_v59, 0  ;;  %v1133_v26 = vsel %vm1122_vm4, nan, %v1132_v63  ;;  %v886_v39 = vsel %vm885_vm1, 1, %v8669_v62 }
 0x14c   : > { %v3625_v38 = vsel %vm1122_vm4, nan, %v3624_v19  ;;  %v468_v22 = vsel %vm5468_vm2, 0, %v5467_v59  ;;  %2844 = vst.msk [vmem:[%s6358_s22 + $0x20] sm:$0xff] %vm2839_vm14, %v1133_v26  ;;  %v883_v24 = vshll.u32 %v879_v8, 16  ;;  %v887_v10 = vadd.s32 %v881_v53, %v877_v29  ;;  %v8699_v53 = vld [vmem:[#allocation6_spill] sm:$0xff]  ;;  %v8705_v29 = vld [vmem:[#allocation7_spill] sm:$0xff] }
 0x14d   : > { %5344 = vrot.lane.b32.xlu1 %v3625_v38, %s5606_s23  ;;  %v469_v58 = vsub.s32 32, %v468_v22  ;;  %v473_v45 = vsub.s32 4294967266, %v468_v22  ;;  %v484_v49 = vsel %vm361_vm8, %v483_v54, %v6425_v32  ;;  %v888_v60 = vadd.s32 %v886_v39, %v880_v61 }
 0x14e   : > { %v901_v21 = vmul.u32 %v897_v25, %v874_v42  ;;  %v903_v44 = vshll.u32 %v6476_v23, 16  ;;  %v470_v50 = vshll.u32 %v6449_v35, %v468_v22  ;;  %vm889_vm13 = vc.u32 %v887_v10, %v883_v24  ;;  %v8700_v25 = vld [vmem:[#allocation44_spill] sm:$0xff] }
 0x14f   : > { %v471_v51 = vshrl.u32 %v453_v31, %v469_v58  ;;  %v474_v27 = vadd.s32 127, %v473_v45  ;;  %v882_v48 = vshrl.u32 %v6456_v36, 16  ;;  %v890_v34 = vsel %vm889_vm13, 1, %v8669_v62 }
 0x150   : > { %v902_v46 = vmul.u32 %v898_v1, %v874_v42  ;;  %vm907_vm15 = vc.u32 %v899_v18, %v903_v44  ;;  %v892_v14 = vadd.s32 %v890_v34, %v888_v60  ;;  %v6508_v30 = vadd.f32 %v8700_v25, %v8699_v53 }
 0x151   : > { %v472_v0 = vor.u32 %v471_v51, %v470_v50  ;;  %v475_v7 = vshll.u32 %v474_v27, 23  ;;  %v908_v32 = vsel %vm907_vm15, 1, %v8669_v62  ;;  %v905_v54 = vshll.u32 %v901_v21, 16  ;;  %v8708_v27 = vld [vmem:[#allocation30_spill] sm:$0xff] }
 0x152   : > { %8701 = vst [vmem:[#allocation6_spill] sm:$0xff] %v6508_v30  ;;  %v909_v35 = vadd.s32 %v903_v44, %v899_v18  ;;  %v910_v31 = vadd.s32 %v908_v32, %v902_v46  ;;  %v8702_v59 = vand.u32 2147483647, %v5695_v3  ;;  %v893_v42 = vadd.s32 %v892_v14, %v882_v48  ;;  %v8709_v48 = vld [vmem:[#allocation48_spill] sm:$0xff] }
 0x153   : > { %v476_v1 = vor.u32 4788187, %v475_v7  ;;  %v8620_v61 = vand.u32 2147483647, %v8705_v29  ;;  %v6519_v28 = vor.u32 %v6267_v56, %v6239_v37  ;;  %v863_v18 = vsel %vm857_vm0, %v860_v33, %v862_v55  ;;  %v8706_v37 = vld [vmem:[#allocation26_spill] sm:$0xff]  ;;  %v8707_v33 = vld [vmem:[#allocation23_spill] sm:$0xff] }
 0x154   : > { %vm6512_vm6 = vcmp.le.f32.partialorder %v8702_v59, 0.7853982  ;;  %vm911_vm10 = vc.u32 %v909_v35, %v905_v54  ;;  %v479_v52 = vcvt.s32.f32 %v472_v0  ;;  %v884_v63 = vshrl.u32 %v879_v8, 16  ;;  %v8710_v0 = vld [vmem:[#allocation39_spill] sm:$0xff] }
 0x155   : > { %v486_v17 = vsel %vm6512_vm6, 0, %v484_v49  ;;  %v477_v43 = vand.u32 2147483647, %v476_v1  ;;  %v912_v19 = vsel %vm911_vm10, 1, %v8669_v62  ;;  %v904_v26 = vshrl.u32 %v6476_v23, 16  ;;  %v8711_v7 = vld [vmem:[#allocation35_spill] sm:$0xff] }
 0x156   : > { %v914_v38 = vadd.s32 %v912_v19, %v910_v31  ;;  %v676_v22 = vand.u32 8388607, %v8620_v61  ;;  %v687_v56 = vshrl.u32 %v8680_v41, %v8706_v37  ;;  %v6531_v58 = vadd.s32 %v893_v42, %v884_v63 }
 0x157   : > { %v480_v39 = vmul.f32 %v479_v52, %v477_v43  ;;  %v906_v5 = vshrl.u32 %v901_v21, 16  ;;  %v686_v55 = vshll.u32 %v8679_v4, %v8707_v33  ;;  %v689_v24 = vshll.u32 %v8680_v41, %v8707_v33 }
 0x158   : > { %v915_v45 = vadd.s32 %v914_v38, %v904_v26  ;;  %v677_v8 = vor.u32 8388608, %v676_v22  ;;  %v690_v23 = vshrl.u32 %v8681_v12, %v8706_v37  ;;  %v6539_v49 = vadd.s32 %v909_v35, %v905_v54 }
 0x159   : > { %v481_v10 = vxor.u32 2147483648, %v480_v39  ;;  %v692_v60 = vshll.u32 %v8681_v12, %v8707_v33  ;;  %v693_v21 = vshrl.u32 %v8655_v57, %v8706_v37  ;;  %v6545_v50 = vor.u32 %v687_v56, %v686_v55 }
 0x15a   : > { %v916_v44 = vadd.s32 %v915_v45, %v906_v5  ;;  %v6547_v51 = vor.u32 %v690_v23, %v689_v24  ;;  %vm703_vm0 = vcmp.lt.s32.totalorder %v8708_v27, 3  ;;  %vm1479_vm9 = vcmp.lt.s32.totalorder %v8709_v48, 4 }
 0x15b   : > { %v482_v34 = vsel %vm361_vm8, %v481_v10, %v480_v39  ;;  %vm919_vm4 = vc.u32 %v6531_v58, %v6539_v49  ;;  %v694_v46 = vor.u32 %v693_v21, %v692_v60  ;;  %v715_v14 = vsel %vm703_vm0, %v8711_v7, %v8710_v0 }
 0x15c   : > { %v6562_v32 = vsel %vm6512_vm6, %v5695_v3, %v482_v34  ;;  %v920_v53 = vadd.s32 1, %v916_v44  ;;  %vm701_vm5 = vcmp.lt.s32.totalorder %v8708_v27, 1  ;;  %v6565_v25 = vshll.u32 %v677_v8, 8 }
 0x15d   : > { %v487_v54 = vmul.f32 %v6562_v32, %v6562_v32  ;;  %v917_v35 = vmul.u32 %v6423_v13, %v863_v18  ;;  %vm702_vm7 = vcmp.lt.s32.totalorder %v8708_v27, 2  ;;  %v713_v31 = vsel %vm701_vm5, %v6547_v51, %v694_v46  ;;  %v8712_v13 = vld [vmem:[#allocation37_spill] sm:$0xff] }
 0x15e   : > { %v503_v59 = vadd.s32 3, %v486_v17  ;;  %v921_v36 = vsel %vm919_vm4, %v920_v53, %v916_v44  ;;  %v709_v1 = vsel %vm701_vm5, %v6545_v50, %v6547_v51  ;;  %v716_v42 = vsel %vm702_vm7, %v713_v31, %v715_v14 }
 0x15f   : > { %v488_v43 = vmul.f32 -0.001358992, %v487_v54  ;;  %v495_v52 = vmul.f32 -0.00019511016, %v487_v54  ;;  %v922_v63 = vadd.s32 %v921_v36, %v917_v35  ;;  %v711_v18 = vsel %vm703_vm0, %v694_v46, %v8712_v13 }
 0x160   : > { %v6584_v19 = vand.u32 65535, %v6565_v25  ;;  %v6587_v26 = vshrl.u32 %v6565_v25, 16  ;;  %v720_v38 = vand.u32 65535, %v716_v42  ;;  %v721_v22 = vshrl.u32 %v716_v42, 16 }
 0x161   : > { %v1630_v56 = vor.u32 %v6271_v6, %v6256_v16  ;;  %v489_v39 = vadd.f32 0.041655596, %v488_v43  ;;  %v496_v5 = vadd.f32 0.008332121, %v495_v52  ;;  %v923_v33 = vadd.s32 536870912, %v922_v63 }
 0x162   : > { %v6592_v55 = vsub.s32 32, %v6435_v15  ;;  %v3000_v45 = vand.u32 3, %v486_v17  ;;  %v6595_v8 = vmul.u32 %v721_v22, %v6584_v19  ;;  %v6598_v24 = vmul.u32 %v720_v38, %v6587_v26 }
 0x163   : > { %v490_v23 = vmul.f32 %v489_v39, %v487_v54  ;;  %v497_v10 = vmul.f32 %v496_v5, %v487_v54  ;;  %v6600_v60 = vshrl.u32 %v923_v33, 30  ;;  %v6604_v21 = vsel %vm702_vm7, %v709_v1, %v711_v18 }
 0x164   : > { %v6609_v44 = vsel %vm1479_vm9, %v6430_v9, 920167782  ;;  %v504_v17 = vand.u32 3, %v503_v59  ;;  %v722_v34 = vmul.u32 %v720_v38, %v6584_v19  ;;  %v726_v0 = vshll.u32 %v6595_v8, 16 }
 0x165   : > { %v6615_v7 = vshll.u32 %v8655_v57, %v6435_v15  ;;  %v491_v14 = vadd.f32 -0.4999988, %v490_v23  ;;  %v498_v53 = vadd.f32 -0.16666654, %v497_v10  ;;  %v925_v35 = vshll.u32 %v6600_v60, 30 }
 0x166   : > { %vm3002_vm11 = vcmp.eq.s32.totalorder %v3000_v45, 0  ;;  %v728_v31 = vshll.u32 %v6598_v24, 16  ;;  %vm730_vm8 = vc.u32 %v722_v34, %v726_v0  ;;  %v732_v36 = vadd.s32 %v726_v0, %v722_v34 }
 0x167   : > { %v743_v1 = vshrl.u32 %v6604_v21, 16  ;;  %v492_v59 = vmul.f32 %v491_v14, %v487_v54  ;;  %v499_v42 = vmul.f32 %v498_v53, %v487_v54  ;;  %vm3001_vm2 = vcmp.lt.s32.totalorder %v3000_v45, 2 }
 0x168   : > { %vm3005_vm1 = vcmp.eq.s32.totalorder %v3000_v45, 2  ;;  %v926_v43 = vsub.s32 %v922_v63, %v925_v35  ;;  %vm502_vm13 = vweird.f32 %v5695_v3  ;;  %vm505_vm15 = vcmp.lt.s32.totalorder %v504_v17, 2 }
 0x169   : > { %v725_v52 = vmul.u32 %v721_v22, %v6587_v26  ;;  %v731_v13 = vsel %vm730_vm8, 1, %v8669_v62  ;;  %vm6623_vm6 = vc.u32 %v732_v36, %v728_v31  ;;  %v493_v38 = vadd.f32 1.0, %v492_v59 }
 0x16a   : > { %v500_v39 = vadd.f32 1.0, %v499_v42  ;;  %vm927_vm10 = vcmp.lt.s32.totalorder %v926_v43, 0  ;;  %v928_v5 = vsub.s32 0, %v926_v43  ;;  %v685_v54 = vshrl.u32 %v8679_v4, %v8706_v37 }
 0x16b   : > { %v706_v63 = vsel %vm704_vm3, %v694_v46, 2102212464  ;;  %v742_v33 = vand.u32 65535, %v6604_v21  ;;  %v6633_v22 = vmul.u32 %v743_v1, %v6584_v19  ;;  %v510_v10 = vxor.u32 2147483648, %v493_v38 }
 0x16c   : > { %v501_v23 = vmul.f32 %v500_v39, %v6562_v32  ;;  %v929_v34 = vsel %vm927_vm10, %v928_v5, %v926_v43  ;;  %v733_v0 = vadd.s32 %v731_v13, %v725_v52  ;;  %vm506_vm4 = vcmp.eq.s32.totalorder %v504_v17, 0 }
 0x16d   : > { %vm509_vm8 = vcmp.eq.s32.totalorder %v504_v17, 2  ;;  %v930_v14 = vclz %v929_v34  ;;  %v735_v37 = vsel %vm6623_vm6, 1, %v8669_v62  ;;  %v918_v46 = vadd.s32 %v6539_v49, %v6531_v58 }
 0x16e   : > { %v507_v53 = vxor.u32 2147483648, %v501_v23  ;;  %v705_v21 = vsel %vm701_vm5, %v685_v54, %v6545_v50  ;;  %v707_v32 = vsel %vm703_vm0, %v6547_v51, %v706_v63  ;;  %v3007_v35 = vsel %vm3005_vm1, %v510_v10, %v501_v23 }
 0x16f   : > { %v511_v31 = vsel %vm509_vm8, %v510_v10, %v501_v23  ;;  %v5476_v36 = vadd.s32 4294967294, %v930_v14  ;;  %v746_v59 = vmul.u32 %v742_v33, %v6587_v26  ;;  %v737_v13 = vadd.s32 %v735_v37, %v733_v0 }
 0x170   : > { %v3004_v42 = vsel %vm3002_vm11, %v493_v38, %v507_v53  ;;  %v508_v52 = vsel %vm506_vm4, %v493_v38, %v507_v53  ;;  %v748_v58 = vshll.u32 %v6633_v22, 16  ;;  %v727_v51 = vshrl.u32 %v6595_v8, 16 }
 0x171   : > { %v3008_v49 = vsel %vm3001_vm2, %v3004_v42, %v3007_v35  ;;  %v512_v50 = vsel %vm505_vm15, %v508_v52, %v511_v31  ;;  %vm5477_vm3 = vcmp.lt.s32.totalorder %v5476_v36, 0  ;;  %v744_v54 = vmul.u32 %v742_v33, %v6584_v19 }
 0x172   : > { %v3009_v18 = vsel %vm502_vm13, nan, %v3008_v49  ;;  %v513_v39 = vsel %vm502_vm13, nan, %v512_v50  ;;  %v933_v5 = vsel %vm5477_vm3, 0, %v5476_v36  ;;  %v948_v17 = vsub.s32 4, %v6600_v60  ;;  %v8718_v49 = vld [vmem:[#allocation8_spill] sm:$0xff] }
 0x173   : > { %5336 = vrot.lane.b32.xlu0 %v3009_v18, %s5606_s23  ;;  %2840 = vst.msk [vmem:[%s6358_s22] sm:$0xff] %vm2839_vm14, %v513_v39  ;;  %v934_v45 = vsub.s32 32, %v933_v5  ;;  %v938_v38 = vsub.s32 4294967266, %v933_v5  ;;  %v747_v63 = vmul.u32 %v743_v1, %v6587_v26  ;;  %v738_v8 = vadd.s32 %v737_v13, %v727_v51 }
 0x174   : > { %v750_v23 = vshll.u32 %v746_v59, 16  ;;  %vm752_vm0 = vc.u32 %v744_v54, %v748_v58  ;;  %v754_v10 = vadd.s32 %v748_v58, %v744_v54  ;;  %v935_v34 = vshll.u32 %v926_v43, %v933_v5  ;;  %v8715_v43 = vld [vmem:[#allocation2_spill] sm:$0xff] }
 0x175   : > { %v936_v3 = vshrl.u32 %v918_v46, %v934_v45  ;;  %v939_v0 = vadd.s32 127, %v938_v38  ;;  %v753_v14 = vsel %vm752_vm0, 1, %v8669_v62  ;;  %v6670_v19 = vsel %vm1479_vm9, %v1475_v20, 1326507024  ;;  %v8716_v20 = vld [vmem:[#allocation50_spill] sm:$0xff] }
 0x176   : > { %v729_v33 = vshrl.u32 %v6598_v24, 16  ;;  %v755_v37 = vadd.s32 %v753_v14, %v747_v63  ;;  %vm756_vm5 = vc.u32 %v754_v10, %v750_v23  ;;  %v8619_v46 = vand.u32 2147483647, %v8715_v43 }
 0x177   : > { %v937_v26 = vor.u32 %v936_v3, %v935_v34  ;;  %v940_v1 = vshll.u32 %v939_v0, 23  ;;  %v757_v53 = vsel %vm756_vm5, 1, %v8669_v62  ;;  %vm826_vm11 = vcmp.lt.s32.totalorder %v5740_v47, 0  ;;  %v8720_v34 = vld [vmem:[#allocation21_spill] sm:$0xff]  ;;  %v8721_v3 = vld [vmem:[#allocation14_spill] sm:$0xff] }
 0x178   : > { %v708_v35 = vsel %vm702_vm7, %v705_v21, %v707_v32  ;;  %v749_v11 = vshrl.u32 %v6633_v22, 16  ;;  %v759_v2 = vadd.s32 %v757_v53, %v755_v37  ;;  %vm1634_vm2 = vcmp.lt.s32.totalorder %v8716_v20, 4  ;;  %v8717_v22 = vld [vmem:[#allocation10_spill] sm:$0xff] }
 0x179   : > { %v941_v31 = vor.u32 4788187, %v940_v1  ;;  %v949_v24 = vsel %vm826_vm11, %v948_v17, %v6600_v60  ;;  %v6683_v36 = vadd.s32 %v738_v8, %v729_v33  ;;  %v1296_v42 = vand.u32 8388607, %v8619_v46  ;;  %v8719_v8 = vld [vmem:[#allocation12_spill] sm:$0xff]  ;;  %v8725_v46 = vld [vmem:[#allocation53_spill] sm:$0xff] }
 0x17a   : > { %v944_v52 = vcvt.s32.f32 %v937_v26  ;;  %v751_v13 = vshrl.u32 %v746_v59, 16  ;;  %v6687_v58 = vadd.s32 %v754_v10, %v750_v23  ;;  %v760_v27 = vadd.s32 %v759_v2, %v749_v11 }
 0x17b   : > { %v942_v21 = vand.u32 2147483647, %v941_v31  ;;  %v1307_v32 = vshrl.u32 %v8680_v41, %v8717_v22  ;;  %v1309_v50 = vshll.u32 %v8680_v41, %v8718_v49  ;;  %v1310_v60 = vshrl.u32 %v8681_v12, %v8717_v22 }
 0x17c   : > { %v761_v51 = vadd.s32 %v760_v27, %v751_v13  ;;  %v1297_v18 = vor.u32 8388608, %v1296_v42  ;;  %v1312_v39 = vshll.u32 %v8681_v12, %v8718_v49  ;;  %v1313_v59 = vshrl.u32 %v8655_v57, %v8717_v22  ;;  %v8723_v27 = vld [vmem:[#allocation19_spill] sm:$0xff] }
 0x17d   : > { %v945_v5 = vmul.f32 %v944_v52, %v942_v21  ;;  %vm764_vm7 = vc.u32 %v6683_v36, %v6687_v58  ;;  %v1306_v54 = vshll.u32 %v8679_v4, %v8718_v49  ;;  %v6703_v45 = vor.u32 %v1310_v60, %v1309_v50 }
 0x17e   : > { %v762_v38 = vmul.u32 %v6565_v25, %v708_v35  ;;  %v765_v17 = vadd.s32 1, %v761_v51  ;;  %v6706_v63 = vor.u32 %v1313_v59, %v1312_v39  ;;  %vm1323_vm1 = vcmp.lt.s32.totalorder %v8719_v8, 3 }
 0x17f   : > { %v946_v23 = vxor.u32 2147483648, %v945_v5  ;;  %v6709_v10 = vor.u32 %v1307_v32, %v1306_v54  ;;  %vm1321_vm13 = vcmp.lt.s32.totalorder %v8719_v8, 1  ;;  %v1335_v0 = vsel %vm1323_vm1, %v8721_v3, %v8720_v34 }
 0x180   : > { %v8722_v14 = vmov 920167782   ;;  %v766_v25 = vsel %vm764_vm7, %v765_v17, %v761_v51  ;;  %v1333_v37 = vsel %vm1321_vm13, %v6703_v45, %v6706_v63  ;;  %v6724_v26 = vshll.u32 %v1297_v18, 8 }
 0x181   : > { %v6718_v33 = vshll.u32 %v8722_v14, %v6435_v15  ;;  %vm825_vm15 = vcmp.le.f32.partialorder %v824_v40, 0.7853982  ;;  %v947_v1 = vsel %vm826_vm11, %v946_v23, %v945_v5  ;;  %v767_v53 = vadd.s32 %v766_v25, %v762_v38 }
 0x182   : > { %vm1322_vm6 = vcmp.lt.s32.totalorder %v8719_v8, 2  ;;  %v6734_v35 = vsel %vm1634_vm2, %v6519_v28, 920167782  ;;  %v950_v11 = vsel %vm825_vm15, %v5740_v47, %v947_v1  ;;  %v951_v2 = vsel %vm825_vm15, 0, %v949_v24 }
 0x183   : > { %v1336_v31 = vsel %vm1322_vm6, %v1333_v37, %v1335_v0  ;;  %v952_v42 = vmul.f32 %v950_v11, %v950_v11  ;;  %v768_v52 = vadd.s32 536870912, %v767_v53  ;;  %v1329_v40 = vsel %vm1321_vm13, %v6709_v10, %v6703_v45 }
 0x184   : > { %v1340_v13 = vand.u32 65535, %v1336_v31  ;;  %v1331_v21 = vsel %vm1323_vm1, %v6706_v63, %v8723_v27  ;;  %v1338_v32 = vand.u32 65535, %v6724_v26  ;;  %v6749_v24 = vshrl.u32 %v6724_v26, 16 }
 0x185   : > { %v1341_v49 = vshrl.u32 %v1336_v31, 16  ;;  %v953_v50 = vmul.f32 -0.001358992, %v952_v42  ;;  %v960_v60 = vmul.f32 -0.00019511016, %v952_v42  ;;  %v968_v51 = vadd.s32 3, %v951_v2 }
 0x186   : > { %v6751_v18 = vshrl.u32 %v768_v52, 30  ;;  %v6758_v39 = vsel %vm1634_vm2, %v1630_v56, 1326507024  ;;  %v6762_v59 = vshrl.u32 %v8722_v14, %v6592_v55  ;;  %v6767_v54 = vmul.u32 %v1340_v13, %v6749_v24 }
 0x187   : > { %v6764_v5 = vmul.u32 %v1341_v49, %v1338_v32  ;;  %v954_v38 = vadd.f32 0.041655596, %v953_v50  ;;  %v961_v17 = vadd.f32 0.008332121, %v960_v60  ;;  %v1332_v16 = vsel %vm1322_vm6, %v1329_v40, %v1331_v21 }
 0x188   : > { %v770_v23 = vshll.u32 %v6751_v18, 30  ;;  %v8724_v6 = vmov 1326507024   ;;  %v3462_v34 = vand.u32 3, %v951_v2  ;;  %v1342_v3 = vmul.u32 %v1340_v13, %v1338_v32 }
 0x189   : > { %v6774_v56 = vshrl.u32 %v8724_v6, %v6592_v55  ;;  %v1346_v0 = vshll.u32 %v6764_v5, 16  ;;  %v955_v25 = vmul.f32 %v954_v38, %v952_v42  ;;  %v962_v37 = vmul.f32 %v961_v17, %v952_v42 }
 0x18a   : > { %v969_v1 = vand.u32 3, %v968_v51  ;;  %v6777_v31 = vsub.s32 %v767_v53, %v770_v23  ;;  %v1348_v52 = vshll.u32 %v6767_v54, 16  ;;  %v1363_v50 = vshrl.u32 %v1332_v16, 16 }
 0x18b   : > { %vm1350_vm10 = vc.u32 %v1342_v3, %v1346_v0  ;;  %v1352_v27 = vadd.s32 %v1346_v0, %v1342_v3  ;;  %v956_v60 = vadd.f32 -0.4999988, %v955_v25  ;;  %v963_v40 = vadd.f32 -0.16666654, %v962_v37 }
 0x18c   : > { %vm772_vm4 = vcmp.lt.s32.totalorder %v6777_v31, 0  ;;  %v773_v21 = vsub.s32 0, %v6777_v31  ;;  %vm3464_vm8 = vcmp.eq.s32.totalorder %v3462_v34, 0  ;;  %v1345_v2 = vmul.u32 %v1341_v49, %v6749_v24 }
 0x18d   : > { %v1351_v13 = vsel %vm1350_vm10, 1, %v8669_v62  ;;  %vm1354_vm3 = vc.u32 %v1352_v27, %v1348_v52  ;;  %v957_v51 = vmul.f32 %v956_v60, %v952_v42  ;;  %v964_v53 = vmul.f32 %v963_v40, %v952_v42 }
 0x18e   : > { %vm3463_vm0 = vcmp.lt.s32.totalorder %v3462_v34, 2  ;;  %vm3467_vm5 = vcmp.eq.s32.totalorder %v3462_v34, 2  ;;  %v774_v38 = vsel %vm772_vm4, %v773_v21, %v6777_v31  ;;  %vm967_vm11 = vweird.f32 %v5740_v47 }
 0x18f   : > { %vm970_vm7 = vcmp.lt.s32.totalorder %v969_v1, 2  ;;  %v775_v17 = vclz %v774_v38  ;;  %v1353_v23 = vadd.s32 %v1351_v13, %v1345_v2  ;;  %v1362_v3 = vand.u32 65535, %v1332_v16 }
 0x190   : > { %v958_v0 = vadd.f32 1.0, %v957_v51  ;;  %v965_v25 = vadd.f32 1.0, %v964_v53  ;;  %v1355_v37 = vsel %vm1354_vm3, 1, %v8669_v62  ;;  %v6787_v49 = vmul.u32 %v1363_v50, %v1338_v32 }
 0x191   : > { %vm971_vm15 = vcmp.eq.s32.totalorder %v969_v1, 0  ;;  %vm974_vm10 = vcmp.eq.s32.totalorder %v969_v1, 2  ;;  %v763_v42 = vadd.s32 %v6687_v58, %v6683_v36  ;;  %v5473_v52 = vadd.s32 4294967294, %v775_v17 }
 0x192   : > { %v966_v27 = vmul.f32 %v965_v25, %v950_v11  ;;  %v975_v60 = vxor.u32 2147483648, %v958_v0  ;;  %v1305_v40 = vshrl.u32 %v8679_v4, %v8717_v22  ;;  %v1326_v16 = vsel %vm1324_vm12, %v6706_v63, 2102212464 }
 0x193   : > { %vm5474_vm4 = vcmp.lt.s32.totalorder %v5473_v52, 0  ;;  %v1347_v21 = vshrl.u32 %v6764_v5, 16  ;;  %v1357_v2 = vadd.s32 %v1355_v37, %v1353_v23  ;;  %v1364_v13 = vmul.u32 %v1362_v3, %v1338_v32 }
 0x194   : > { %v972_v51 = vxor.u32 2147483648, %v966_v27  ;;  %v778_v53 = vsel %vm5474_vm4, 0, %v5473_v52  ;;  %v1366_v38 = vmul.u32 %v1362_v3, %v6749_v24  ;;  %v1368_v36 = vshll.u32 %v6787_v49, 16 }
 0x195   : > { %v976_v58 = vsel %vm974_vm10, %v975_v60, %v966_v27  ;;  %vm671_vm3 = vcmp.lt.s32.totalorder %v8705_v29, 0  ;;  %v779_v11 = vsub.s32 32, %v778_v53  ;;  %v783_v22 = vsub.s32 4294967266, %v778_v53 }
 0x196   : > { %v1367_v17 = vmul.u32 %v1363_v50, %v6749_v24  ;;  %v973_v63 = vsel %vm971_vm15, %v958_v0, %v972_v51  ;;  %v3466_v5 = vsel %vm3464_vm8, %v958_v0, %v972_v51  ;;  %v3469_v32 = vsel %vm3467_vm5, %v975_v60, %v966_v27  ;;  %v8726_v51 = vld [vmem:[#allocation17_spill] sm:$0xff] }
 0x197   : > { %v780_v23 = vshll.u32 %v6777_v31, %v778_v53  ;;  %v977_v3 = vsel %vm970_vm7, %v973_v63, %v976_v58  ;;  %v3470_v25 = vsel %vm3463_vm0, %v3466_v5, %v3469_v32  ;;  %v781_v37 = vshrl.u32 %v763_v42, %v779_v11  ;;  %v320_v58 = vpop.permute.xlu1 %319 }
 0x198   : > { %v784_v52 = vadd.s32 127, %v783_v22  ;;  %vm2075_vm12 = vcmp.gt.s32.totalorder %v8725_v46, 0  ;;  %v978_v61 = vsel %vm967_vm11, nan, %v977_v3  ;;  %v3471_v24 = vsel %vm967_vm11, nan, %v3470_v25  ;;  %v8730_v3 = vld [vmem:[#allocation42_spill] sm:$0xff] }
 0x199   : > { %v1370_v50 = vshll.u32 %v1366_v38, 16  ;;  %vm1372_vm8 = vc.u32 %v1364_v13, %v1368_v36  ;;  %2843 = vst.msk [vmem:[%s6358_s22 + $0x18] sm:$0xff] %vm2839_vm14, %v978_v61  ;;  %5342 = vrot.lane.b32.xlu0 %v3471_v24, %s5606_s23  ;;  %v782_v1 = vor.u32 %v781_v37, %v780_v23  ;;  %v1374_v0 = vadd.s32 %v1368_v36, %v1364_v13  ;;  %v8731_v37 = vld [vmem:[#allocation47_spill] sm:$0xff] }
 0x19a   : > { %v785_v31 = vshll.u32 %v784_v52, 23  ;;  %v1373_v34 = vsel %vm1372_vm8, 1, %v8669_v62  ;;  %v793_v42 = vsub.s32 4, %v6751_v18  ;;  %v1358_v27 = vadd.s32 %v1357_v2, %v1347_v21 }
 0x19b   : > { %v1375_v60 = vadd.s32 %v1373_v34, %v1367_v17  ;;  %v8621_v53 = vand.u32 2147483647, %v8726_v51  ;;  %v8727_v47 = vand.u32 2147483647, %v8705_v29  ;;  %v1325_v11 = vsel %vm1321_vm13, %v1305_v40, %v6709_v10 }
 0x19c   : > { %v786_v61 = vor.u32 4788187, %v785_v31  ;;  %vm1376_vm5 = vc.u32 %v1374_v0, %v1370_v50  ;;  %v1327_v13 = vsel %vm1323_vm1, %v6703_v45, %v1326_v16  ;;  %v1349_v21 = vshrl.u32 %v6767_v54, 16 }
 0x19d   : > { %vm6820_vm0 = vcmp.le.f32.partialorder %v8727_v47, 0.7853982  ;;  %v1377_v2 = vsel %vm1376_vm5, 1, %v8669_v62  ;;  %v1141_v36 = vand.u32 8388607, %v8621_v53  ;;  %v789_v17 = vcvt.s32.f32 %v782_v1 }
 0x19e   : > { %v787_v22 = vand.u32 2147483647, %v786_v61  ;;  %v1369_v63 = vshrl.u32 %v6787_v49, 16  ;;  %v1379_v5 = vadd.s32 %v1377_v2, %v1375_v60  ;;  %v794_v10 = vsel %vm671_vm3, %v793_v42, %v6751_v18 }
 0x19f   : > { %v6838_v40 = vadd.s32 %v1358_v27, %v1349_v21  ;;  %v1371_v32 = vshrl.u32 %v1366_v38, 16  ;;  %v6840_v45 = vadd.s32 %v1374_v0, %v1370_v50  ;;  %v1142_v23 = vor.u32 8388608, %v1141_v36 }
 0x1a0   : > { %v790_v54 = vmul.f32 %v789_v17, %v787_v22  ;;  %v1380_v16 = vadd.s32 %v1379_v5, %v1369_v63  ;;  %v1154_v25 = vshll.u32 %v8680_v41, %v8730_v3  ;;  %v1152_v52 = vshrl.u32 %v8680_v41, %v8731_v37  ;;  %v8732_v22 = vld [vmem:[#allocation46_spill] sm:$0xff] }
 0x1a1   : > { %v1155_v49 = vshrl.u32 %v8681_v12, %v8731_v37  ;;  %v1157_v18 = vshll.u32 %v8681_v12, %v8730_v3  ;;  %v1158_v38 = vshrl.u32 %v8655_v57, %v8731_v37  ;;  %v796_v50 = vsel %vm6820_vm0, 0, %v794_v10  ;;  %v8733_v10 = vld [vmem:[#allocation56_spill] sm:$0xff] }
 0x1a2   : > { %v791_v24 = vxor.u32 2147483648, %v790_v54  ;;  %v1328_v1 = vsel %vm1322_vm6, %v1325_v11, %v1327_v13  ;;  %v1381_v31 = vadd.s32 %v1380_v16, %v1371_v32  ;;  %vm1384_vm1 = vc.u32 %v6838_v40, %v6840_v45  ;;  %v8734_v32 = vld [vmem:[#allocation51_spill] sm:$0xff] }
 0x1a3   : > { %v1151_v34 = vshll.u32 %v8679_v4, %v8730_v3  ;;  %v6860_v0 = vor.u32 %v1155_v49, %v1154_v25  ;;  %v6862_v42 = vor.u32 %v1158_v38, %v1157_v18  ;;  %v6867_v27 = vsel %vm2075_vm12, %v8725_v46, 0  ;;  %v8735_v25 = vld [vmem:[#allocation55_spill] sm:$0xff] }
 0x1a4   : > { %v792_v8 = vsel %vm671_vm3, %v791_v24, %v790_v54  ;;  %v1385_v60 = vadd.s32 1, %v1381_v31  ;;  %v6871_v47 = vshll.u32 %v1142_v23, 8  ;;  %v813_v11 = vadd.s32 3, %v796_v50 }
 0x1a5   : > { %v6876_v61 = vsel %vm6820_vm0, %v8705_v29, %v792_v8  ;;  %v1382_v13 = vmul.u32 %v6724_v26, %v1328_v1  ;;  %v6879_v21 = vor.u32 %v1152_v52, %v1151_v34  ;;  %v6883_v2 = vand.u32 3, %v796_v50 }
 0x1a6   : > { %v797_v46 = vmul.f32 %v6876_v61, %v6876_v61  ;;  %v1386_v36 = vsel %vm1384_vm1, %v1385_v60, %v1381_v31  ;;  %vm1166_vm13 = vcmp.lt.s32.totalorder %v8732_v22, 1  ;;  %vm1167_vm6 = vcmp.lt.s32.totalorder %v8732_v22, 2  ;;  %v5589_v31 = vld [vmem:[%s8520_s1 + $0x1] ss:$0 sm:$0xff] }
 0x1a7   : > { %v1387_v17 = vadd.s32 %v1386_v36, %v1382_v13  ;;  %vm1168_vm11 = vcmp.lt.s32.totalorder %v8732_v22, 3  ;;  %v1178_v26 = vsel %vm1166_vm13, %v6860_v0, %v6862_v42  ;;  %v6897_v16 = vand.u32 65535, %v6871_v47 }
 0x1a8   : > { %v798_v63 = vmul.f32 -0.001358992, %v797_v46  ;;  %v805_v5 = vmul.f32 -0.00019511016, %v797_v46  ;;  %v1180_v54 = vsel %vm1168_vm11, %v8734_v32, %v8733_v10  ;;  %v1174_v3 = vsel %vm1166_vm13, %v6879_v21, %v6860_v0 }
 0x1a9   : > { %v1388_v23 = vadd.s32 536870912, %v1387_v17  ;;  %v1176_v52 = vsel %vm1168_vm11, %v6862_v42, %v8735_v25  ;;  %v1181_v49 = vsel %vm1167_vm6, %v1178_v26, %v1180_v54  ;;  %v6913_v34 = vmul.f32 %v5589_v31, %v320_v58 }
 0x1aa   : > { %v799_v18 = vadd.f32 0.041655596, %v798_v63  ;;  %v806_v38 = vadd.f32 0.008332121, %v805_v5  ;;  %v1185_v24 = vand.u32 65535, %v1181_v49  ;;  %v1186_v50 = vshrl.u32 %v1181_v49, 16 }
 0x1ab   : > { %v6915_v8 = vand.u32 3, %v813_v11  ;;  %v6917_v60 = vshrl.u32 %v1388_v23, 30  ;;  %v6921_v26 = vsel %vm1167_vm6, %v1174_v3, %v1176_v52  ;;  %v6928_v5 = vor.u32 %v6762_v59, %v6615_v7 }
 0x1ac   : > { %v800_v13 = vmul.f32 %v799_v18, %v797_v46  ;;  %v807_v36 = vmul.f32 %v806_v38, %v797_v46  ;;  %v6924_v63 = vmul.u32 %v1186_v50, %v6897_v16  ;;  %v6933_v11 = vshrl.u32 %v6867_v27, 5 }
 0x1ad   : > { %v1390_v10 = vshll.u32 %v6917_v60, 30  ;;  %vm3313_vm7 = vcmp.eq.s32.totalorder %v6883_v2, 2  ;;  %v1187_v23 = vmul.u32 %v1185_v24, %v6897_v16  ;;  %vm816_vm15 = vcmp.eq.s32.totalorder %v6915_v8, 0 }
 0x1ae   : > { %8736 = vst [vmem:[#allocation44_spill] sm:$0xff] %v6933_v11  ;;  %v801_v32 = vadd.f32 -0.4999988, %v800_v13  ;;  %v808_v54 = vadd.f32 -0.16666654, %v807_v36  ;;  %v1191_v3 = vshll.u32 %v6924_v63, 16  ;;  %v1150_v18 = vshrl.u32 %v8679_v4, %v8731_v37 }
 0x1af   : > { %vm819_vm10 = vcmp.eq.s32.totalorder %v6915_v8, 2  ;;  %vm3310_vm4 = vcmp.eq.s32.totalorder %v6883_v2, 0  ;;  %v6942_v7 = vsub.s32 %v1387_v17, %v1390_v10  ;;  %v1184_v59 = vshrl.u32 %v6871_v47, 16 }
 0x1b0   : > { %v1208_v25 = vshrl.u32 %v6921_v26, 16  ;;  %v802_v52 = vmul.f32 %v801_v32, %v797_v46  ;;  %v809_v49 = vmul.f32 %v808_v54, %v797_v46  ;;  %vm815_vm3 = vcmp.lt.s32.totalorder %v6915_v8, 2  ;;  %v8738_v8 = vld [vmem:[#allocation27_spill] sm:$0xff] }
 0x1b1   : > { %vm3309_vm12 = vcmp.lt.s32.totalorder %v6883_v2, 2  ;;  %vm1195_vm8 = vc.u32 %v1187_v23, %v1191_v3  ;;  %vm812_vm0 = vweird.f32 %v8705_v29  ;;  %vm1392_vm5 = vcmp.lt.s32.totalorder %v6942_v7, 0 }
 0x1b2   : > { %v1393_v17 = vsub.s32 0, %v6942_v7  ;;  %vm8737_vm1 = vcmp.lt.s32.totalorder %v8732_v22, 4  ;;  %v1189_v31 = vmul.u32 %v1185_v24, %v1184_v59  ;;  %v803_v46 = vadd.f32 1.0, %v802_v52 }
 0x1b3   : > { %v1171_v38 = vsel %vm8737_vm1, %v6862_v42, 2102212464  ;;  %v810_v13 = vadd.f32 1.0, %v809_v49  ;;  %v1196_v36 = vsel %vm1195_vm8, 1, %v8669_v62  ;;  %v1207_v10 = vand.u32 65535, %v6921_v26 }
 0x1b4   : > { %v1394_v37 = vsel %vm1392_vm5, %v1393_v17, %v6942_v7  ;;  %v1190_v32 = vmul.u32 %v1186_v50, %v1184_v59  ;;  %v1197_v54 = vadd.s32 %v1191_v3, %v1187_v23  ;;  %v1210_v53 = vmul.u32 %v1208_v25, %v6897_v16 }
 0x1b5   : > { %v811_v58 = vmul.f32 %v810_v13, %v6876_v61  ;;  %v820_v1 = vxor.u32 2147483648, %v803_v46  ;;  %v1383_v11 = vadd.s32 %v6840_v45, %v6838_v40  ;;  %v1395_v42 = vclz %v1394_v37 }
 0x1b6   : > { %v1170_v24 = vsel %vm1166_vm13, %v1150_v18, %v6879_v21  ;;  %v1172_v26 = vsel %vm1168_vm11, %v6860_v0, %v1171_v38  ;;  %v1193_v52 = vshll.u32 %v1189_v31, 16  ;;  %v1198_v50 = vadd.s32 %v1196_v36, %v1190_v32 }
 0x1b7   : > { %v817_v23 = vxor.u32 2147483648, %v811_v58  ;;  %v5485_v3 = vadd.s32 4294967294, %v1395_v42  ;;  %v1192_v49 = vshrl.u32 %v6924_v63, 16  ;;  %v1211_v61 = vmul.u32 %v1207_v10, %v1184_v59 }
 0x1b8   : > { %v3315_v17 = vsel %vm3313_vm7, %v820_v1, %v811_v58  ;;  %v821_v40 = vsel %vm819_vm10, %v820_v1, %v811_v58  ;;  %vm1199_vm8 = vc.u32 %v1197_v54, %v1193_v52  ;;  %v1213_v45 = vshll.u32 %v1210_v53, 16 }
 0x1b9   : > { %v3312_v21 = vsel %vm3310_vm4, %v803_v46, %v817_v23  ;;  %v818_v0 = vsel %vm816_vm15, %v803_v46, %v817_v23  ;;  %vm5486_vm13 = vcmp.lt.s32.totalorder %v5485_v3, 0  ;;  %v1200_v18 = vsel %vm1199_vm8, 1, %v8669_v62 }
 0x1ba   : > { %v3316_v63 = vsel %vm3309_vm12, %v3312_v21, %v3315_v17  ;;  %v822_v38 = vsel %vm815_vm3, %v818_v0, %v821_v40  ;;  %v1398_v13 = vsel %vm5486_vm13, 0, %v5485_v3  ;;  %v1202_v1 = vadd.s32 %v1200_v18, %v1198_v50 }
 0x1bb   : > { %v3317_v58 = vsel %vm812_vm0, nan, %v3316_v63  ;;  %v823_v36 = vsel %vm812_vm0, nan, %v822_v38  ;;  %v1399_v37 = vsub.s32 32, %v1398_v13  ;;  %v1209_v46 = vmul.u32 %v1207_v10, %v6897_v16  ;;  %v8742_v38 = vld [vmem:[#allocation54_spill] sm:$0xff] }
 0x1bc   : > { %5340 = vrot.lane.b32.xlu2 %v3317_v58, %s5606_s23  ;;  %2842 = vst.msk [vmem:[%s6358_s22 + $0x10] sm:$0xff] %vm2839_vm14, %v823_v36  ;;  %v1403_v2 = vsub.s32 4294967266, %v1398_v13  ;;  %v1203_v32 = vadd.s32 %v1202_v1, %v1192_v49  ;;  %v1212_v54 = vmul.u32 %v1208_v25, %v1184_v59  ;;  %v8624_v42 = vand.u32 2147483647, %v8738_v8  ;;  %v8743_v58 = vld [vmem:[#allocation49_spill] sm:$0xff] }
 0x1bd   : > { %v1401_v52 = vshrl.u32 %v1383_v11, %v1399_v37  ;;  %v1215_v50 = vshll.u32 %v1211_v61, 16  ;;  %vm1217_vm11 = vc.u32 %v1209_v46, %v1213_v45  ;;  %v1219_v23 = vadd.s32 %v1213_v45, %v1209_v46 }
 0x1be   : > { %vm1291_vm7 = vcmp.lt.s32.totalorder %v8715_v43, 0  ;;  %v1400_v29 = vshll.u32 %v6942_v7, %v1398_v13  ;;  %v1404_v3 = vadd.s32 127, %v1403_v2  ;;  %v1173_v16 = vsel %vm1167_vm6, %v1170_v24, %v1172_v26 }
 0x1bf   : > { %v1218_v10 = vsel %vm1217_vm11, 1, %v8669_v62  ;;  %v1413_v17 = vsub.s32 4, %v6917_v60  ;;  %v1194_v49 = vshrl.u32 %v1189_v31, 16  ;;  %vm1221_vm15 = vc.u32 %v1219_v23, %v1215_v50 }
 0x1c0   : > { %v1220_v59 = vadd.s32 %v1218_v10, %v1212_v54  ;;  %v1402_v25 = vor.u32 %v1401_v52, %v1400_v29  ;;  %v1405_v11 = vshll.u32 %v1404_v3, 23  ;;  %v1222_v40 = vsel %vm1221_vm15, 1, %v8669_v62 }
 0x1c1   : > { %v1451_v45 = vand.u32 8388607, %v8624_v42  ;;  %v8739_v7 = vand.u32 2147483647, %v8715_v43  ;;  %v7007_v22 = vadd.s32 %v1203_v32, %v1194_v49  ;;  %v1214_v24 = vshrl.u32 %v1210_v53, 16 }
 0x1c2   : > { %v1216_v26 = vshrl.u32 %v1211_v61, 16  ;;  %v1224_v31 = vadd.s32 %v1222_v40, %v1220_v59  ;;  %v1406_v0 = vor.u32 4788187, %v1405_v11  ;;  %v7009_v18 = vadd.s32 %v1219_v23, %v1215_v50  ;;  %v8744_v23 = vld [vmem:[#allocation58_spill] sm:$0xff] }
 0x1c3   : > { %vm7003_vm10 = vcmp.le.f32.partialorder %v8739_v7, 0.7853982  ;;  %v1452_v63 = vor.u32 8388608, %v1451_v45  ;;  %v1462_v13 = vshrl.u32 %v8680_v41, %v8742_v38  ;;  %v1461_v36 = vshll.u32 %v8679_v4, %v8743_v58 }
 0x1c4   : > { %v1225_v1 = vadd.s32 %v1224_v31, %v1214_v24  ;;  %v1464_v37 = vshll.u32 %v8680_v41, %v8743_v58  ;;  %v1465_v46 = vshrl.u32 %v8681_v12, %v8742_v38  ;;  %v1407_v53 = vand.u32 2147483647, %v1406_v0 }
 0x1c5   : > { %v1409_v61 = vcvt.s32.f32 %v1402_v25  ;;  %v1467_v2 = vshll.u32 %v8681_v12, %v8743_v58  ;;  %v1468_v32 = vshrl.u32 %v8655_v57, %v8742_v38  ;;  %v7023_v52 = vor.u32 %v1462_v13, %v1461_v36 }
 0x1c6   : > { %v1226_v54 = vadd.s32 %v1225_v1, %v1216_v26  ;;  %v7025_v50 = vor.u32 %v1465_v46, %v1464_v37  ;;  %vm1478_vm6 = vcmp.lt.s32.totalorder %v8709_v48, 3  ;;  %vm1944_vm4 = vcmp.lt.s32.totalorder %v8744_v23, 4 }
 0x1c7   : > { %v1410_v29 = vmul.f32 %v1409_v61, %v1407_v53  ;;  %vm1229_vm3 = vc.u32 %v7007_v22, %v7009_v18  ;;  %v7031_v3 = vor.u32 %v1468_v32, %v1467_v2  ;;  %v1490_v10 = vsel %vm1478_vm6, %v6430_v9, %v6670_v19 }
 0x1c8   : > { %v1414_v49 = vsel %vm1291_vm7, %v1413_v17, %v6917_v60  ;;  %v1230_v59 = vadd.s32 1, %v1226_v54  ;;  %vm1476_vm12 = vcmp.lt.s32.totalorder %v8709_v48, 1  ;;  %v7041_v25 = vshll.u32 %v1452_v63, 8 }
 0x1c9   : > { %v1411_v11 = vxor.u32 2147483648, %v1410_v29  ;;  %v1227_v40 = vmul.u32 %v6871_v47, %v1173_v16  ;;  %vm1477_vm0 = vcmp.lt.s32.totalorder %v8709_v48, 2  ;;  %v1488_v45 = vsel %vm1476_vm12, %v7025_v50, %v7031_v3 }
 0x1ca   : > { %v1231_v9 = vsel %vm1229_vm3, %v1230_v59, %v1226_v54  ;;  %v1484_v19 = vsel %vm1476_vm12, %v7023_v52, %v7025_v50  ;;  %v1486_v60 = vsel %vm1478_vm6, %v7031_v3, %v6609_v44  ;;  %v1491_v47 = vsel %vm1477_vm0, %v1488_v45, %v1490_v10 }
 0x1cb   : > { %v1412_v16 = vsel %vm1291_vm7, %v1411_v11, %v1410_v29  ;;  %v1416_v17 = vsel %vm7003_vm10, 0, %v1414_v49  ;;  %v1232_v7 = vadd.s32 %v1231_v9, %v1227_v40  ;;  %v7064_v24 = vand.u32 65535, %v7041_v25 }
 0x1cc   : > { %v7069_v26 = vsel %vm7003_vm10, %v8715_v43, %v1412_v16  ;;  %v7072_v44 = vshrl.u32 %v7041_v25, 16  ;;  %v1495_v31 = vand.u32 65535, %v1491_v47  ;;  %v1496_v0 = vshrl.u32 %v1491_v47, 16 }
 0x1cd   : > { %v7075_v63 = vand.u32 31, %v6867_v27  ;;  %v1417_v13 = vmul.f32 %v7069_v26, %v7069_v26  ;;  %v1233_v1 = vadd.s32 536870912, %v1232_v7  ;;  %v7081_v58 = vsel %vm1477_vm0, %v1484_v19, %v1486_v60  ;;  %v8747_v27 = vld [vmem:[#allocation4_spill] sm:$0xff] }
 0x1ce   : > { %v8746_v21 = vand.u32 2139095040, %v6508_v30  ;;  %v1433_v37 = vadd.s32 3, %v1416_v17  ;;  %v1498_v46 = vmul.u32 %v1496_v0, %v7064_v24  ;;  %v7089_v53 = vmul.u32 %v1495_v31, %v7072_v44 }
 0x1cf   : > { %8745 = vst [vmem:[#allocation7_spill] sm:$0xff] %v7075_v63  ;;  %v7093_v61 = vadd.f32 %v6913_v34, %v8747_v27  ;;  %v1418_v2 = vmul.f32 -0.001358992, %v1417_v13  ;;  %v1425_v32 = vmul.f32 -0.00019511016, %v1417_v13  ;;  %v7095_v54 = vshrl.u32 %v1233_v1, 30 }
 0x1d0   : > { %v7085_v36 = vshrl.u32 %v8746_v21, 23  ;;  %v7100_v29 = vsel %vm1944_vm4, %v6928_v5, 920167782  ;;  %v1497_v10 = vmul.u32 %v1495_v31, %v7064_v24  ;;  %v1501_v49 = vshll.u32 %v1498_v46, 16 }
 0x1d1   : > { %v1518_v59 = vshrl.u32 %v7081_v58, 16  ;;  %v1419_v11 = vadd.f32 0.041655596, %v1418_v2  ;;  %v1426_v40 = vadd.f32 0.008332121, %v1425_v32  ;;  %v7104_v45 = vand.u32 3, %v1416_v17 }
 0x1d2   : > { %v1235_v34 = vshll.u32 %v7095_v54, 30  ;;  %v7107_v9 = vand.u32 3, %v1433_v37  ;;  %v1503_v19 = vshll.u32 %v7089_v53, 16  ;;  %vm1505_vm5 = vc.u32 %v1497_v10, %v1501_v49 }
 0x1d3   : > { %v1507_v60 = vadd.s32 %v1501_v49, %v1497_v10  ;;  %v1420_v47 = vmul.f32 %v1419_v11, %v1417_v13  ;;  %v1427_v16 = vmul.f32 %v1426_v40, %v1417_v13  ;;  %v1517_v31 = vand.u32 65535, %v7081_v58 }
 0x1d4   : > { %v7110_v1 = vsub.s32 %v1232_v7, %v1235_v34  ;;  %v1500_v21 = vmul.u32 %v1496_v0, %v7072_v44  ;;  %v1506_v27 = vsel %vm1505_vm5, 1, %v8669_v62  ;;  %v7116_v17 = vmul.u32 %v1518_v59, %v7064_v24 }
 0x1d5   : > { %vm1509_vm1 = vc.u32 %v1507_v60, %v1503_v19  ;;  %v1421_v37 = vadd.f32 -0.4999988, %v1420_v47  ;;  %v1428_v2 = vadd.f32 -0.16666654, %v1427_v16  ;;  %vm1436_vm13 = vcmp.eq.s32.totalorder %v7107_v9, 0 }
 0x1d6   : > { %vm1237_vm8 = vcmp.lt.s32.totalorder %v7110_v1, 0  ;;  %v1238_v32 = vsub.s32 0, %v7110_v1  ;;  %vm3926_vm11 = vcmp.eq.s32.totalorder %v7104_v45, 0  ;;  %vm3929_vm7 = vcmp.eq.s32.totalorder %v7104_v45, 2 }
 0x1d7   : > { %v1508_v7 = vadd.s32 %v1506_v27, %v1500_v21  ;;  %v1510_v0 = vsel %vm1509_vm1, 1, %v8669_v62  ;;  %v1422_v58 = vmul.f32 %v1421_v37, %v1417_v13  ;;  %v1429_v10 = vmul.f32 %v1428_v2, %v1417_v13 }
 0x1d8   : > { %vm1435_vm15 = vcmp.lt.s32.totalorder %v7107_v9, 2  ;;  %vm1439_vm10 = vcmp.eq.s32.totalorder %v7107_v9, 2  ;;  %vm3925_vm3 = vcmp.lt.s32.totalorder %v7104_v45, 2  ;;  %v1239_v49 = vsel %vm1237_vm8, %v1238_v32, %v7110_v1 }
 0x1d9   : > { %vm1432_vm5 = vweird.f32 %v8715_v43  ;;  %v1240_v11 = vclz %v1239_v49  ;;  %v1460_v40 = vshrl.u32 %v8679_v4, %v8742_v38  ;;  %v1481_v34 = vsel %vm1479_vm9, %v7031_v3, 2102212464 }
 0x1da   : > { %v1523_v13 = vshll.u32 %v7116_v17, 16  ;;  %v1423_v19 = vadd.f32 1.0, %v1422_v58  ;;  %v1430_v60 = vadd.f32 1.0, %v1429_v10  ;;  %v1512_v47 = vadd.s32 %v1510_v0, %v1508_v7 }
 0x1db   : > { %v1521_v16 = vmul.u32 %v1517_v31, %v7072_v44  ;;  %v1228_v21 = vadd.s32 %v7009_v18, %v7007_v22  ;;  %v5482_v27 = vadd.s32 4294967294, %v1240_v11  ;;  %v1502_v37 = vshrl.u32 %v1498_v46, 16 }
 0x1dc   : > { %v1519_v2 = vmul.u32 %v1517_v31, %v7064_v24  ;;  %v1431_v38 = vmul.f32 %v1430_v60, %v7069_v26  ;;  %v1440_v32 = vxor.u32 2147483648, %v1423_v19  ;;  %v1480_v3 = vsel %vm1476_vm12, %v1460_v40, %v7023_v52 }
 0x1dd   : > { %v1482_v7 = vsel %vm1478_vm6, %v7025_v50, %v1481_v34  ;;  %vm5483_vm9 = vcmp.lt.s32.totalorder %v5482_v27, 0  ;;  %v1513_v0 = vadd.s32 %v1512_v47, %v1502_v37  ;;  %v1522_v58 = vmul.u32 %v1518_v59, %v7072_v44 }
 0x1de   : > { %vm1527_vm1 = vc.u32 %v1519_v2, %v1523_v13  ;;  %v1437_v22 = vxor.u32 2147483648, %v1431_v38  ;;  %v3931_v18 = vsel %vm3929_vm7, %v1440_v32, %v1431_v38  ;;  %v1243_v24 = vsel %vm5483_vm9, 0, %v5482_v27 }
 0x1df   : > { %v1525_v26 = vshll.u32 %v1521_v16, 16  ;;  %v1441_v46 = vsel %vm1439_vm10, %v1440_v32, %v1431_v38  ;;  %v1244_v31 = vsub.s32 32, %v1243_v24  ;;  %v1245_v52 = vshll.u32 %v7110_v1, %v1243_v24  ;;  %v8749_v38 = vld [vmem:[#allocation3_spill] sm:$0xff] }
 0x1e0   : > { %v1248_v10 = vsub.s32 4294967266, %v1243_v24  ;;  %v3928_v50 = vsel %vm3926_vm11, %v1423_v19, %v1437_v22  ;;  %v1438_v44 = vsel %vm1436_vm13, %v1423_v19, %v1437_v22  ;;  %v1528_v59 = vsel %vm1527_vm1, 1, %v8669_v62 }
 0x1e1   : > { %v1529_v49 = vadd.s32 %v1523_v13, %v1519_v2  ;;  %v3932_v11 = vsel %vm3925_vm3, %v3928_v50, %v3931_v18  ;;  %v1442_v40 = vsel %vm1435_vm15, %v1438_v44, %v1441_v46  ;;  %v1246_v34 = vshrl.u32 %v1228_v21, %v1244_v31  ;;  %v8750_v44 = vld [vmem:[#allocation9_spill] sm:$0xff] }
 0x1e2   : > { %v1249_v60 = vadd.s32 127, %v1248_v10  ;;  %v3933_v1 = vsel %vm1432_vm5, nan, %v3932_v11  ;;  %v1443_v47 = vsel %vm1432_vm5, nan, %v1442_v40  ;;  %v1530_v27 = vadd.s32 %v1528_v59, %v1522_v58  ;;  %v8751_v59 = vld [vmem:[#allocation13_spill] sm:$0xff] }
 0x1e3   : > { %vm1531_vm6 = vc.u32 %v1529_v49, %v1525_v26  ;;  %5348 = vrot.lane.b32.xlu0 %v3933_v1, %s5606_s23  ;;  %2846 = vst.msk [vmem:[%s6358_s22 + $0x30] sm:$0xff] %vm2839_vm14, %v1443_v47  ;;  %v1247_v13 = vor.u32 %v1246_v34, %v1245_v52  ;;  %v1504_v19 = vshrl.u32 %v7089_v53, 16  ;;  %v8748_v21 = vor.u32 %v6774_v56, %v6718_v33 }
 0x1e4   : > { %v1250_v45 = vshll.u32 %v1249_v60, 23  ;;  %v1532_v9 = vsel %vm1531_vm6, 1, %v8669_v62  ;;  %v1524_v43 = vshrl.u32 %v7116_v17, 16  ;;  %v8623_v32 = vand.u32 2147483647, %v8749_v38 }
 0x1e5   : > { %v7175_v37 = vsel %vm1944_vm4, %v8748_v21, 1326507024  ;;  %v1534_v2 = vadd.s32 %v1532_v9, %v1530_v27  ;;  %v7180_v58 = vsub.s32 32, %v7075_v63  ;;  %vm1136_vm12 = vcmp.lt.s32.totalorder %v8726_v51, 0  ;;  %v8755_v27 = vld [vmem:[#allocation16_spill] sm:$0xff]  ;;  %v8757_v9 = vld [vmem:[#allocation18_spill] sm:$0xff] }
 0x1e6   : > { %v1251_v53 = vor.u32 4788187, %v1250_v45  ;;  %v7183_v22 = vadd.s32 %v1513_v0, %v1504_v19  ;;  %v1483_v33 = vsel %vm1477_vm0, %v1480_v3, %v1482_v7  ;;  %v1526_v56 = vshrl.u32 %v1521_v16, 16  ;;  %v8756_v19 = vld [vmem:[#allocation24_spill] sm:$0xff] }
 0x1e7   : > { %v1535_v18 = vadd.s32 %v1534_v2, %v1524_v43  ;;  %v1761_v24 = vand.u32 8388607, %v8623_v32  ;;  %v1254_v46 = vcvt.s32.f32 %v1247_v13  ;;  %v1258_v31 = vsub.s32 4, %v7095_v54 }
 0x1e8   : > { %v1252_v17 = vand.u32 2147483647, %v1251_v53  ;;  %v7190_v52 = vadd.s32 %v1529_v49, %v1525_v26  ;;  %v1774_v0 = vshll.u32 %v8680_v41, %v8750_v44  ;;  %v1775_v48 = vshrl.u32 %v8681_v12, %v8751_v59 }
 0x1e9   : > { %v1536_v10 = vadd.s32 %v1535_v18, %v1526_v56  ;;  %v1762_v50 = vor.u32 8388608, %v1761_v24  ;;  %v1777_v16 = vshll.u32 %v8681_v12, %v8750_v44  ;;  %v1778_v7 = vshrl.u32 %v8655_v57, %v8751_v59 }
 0x1ea   : > { %v1255_v3 = vmul.f32 %v1254_v46, %v1252_v17  ;;  %vm1539_vm0 = vc.u32 %v7183_v22, %v7190_v52  ;;  %v8752_v26 = vand.u32 2147483647, %v8726_v51  ;;  %v1772_v40 = vshrl.u32 %v8680_v41, %v8751_v59 }
 0x1eb   : > { %v1540_v11 = vadd.s32 1, %v1536_v10  ;;  %v7210_v34 = vor.u32 %v1775_v48, %v1774_v0  ;;  %v1537_v1 = vmul.u32 %v7041_v25, %v1483_v33  ;;  %v7213_v47 = vor.u32 %v1778_v7, %v1777_v16 }
 0x1ec   : > { %vm7204_vm8 = vcmp.le.f32.partialorder %v8752_v26, 0.7853982  ;;  %v1256_v60 = vxor.u32 2147483648, %v1255_v3  ;;  %vm1788_vm13 = vcmp.lt.s32.totalorder %v8755_v27, 3  ;;  %v1771_v45 = vshll.u32 %v8679_v4, %v8750_v44 }
 0x1ed   : > { %v1541_v13 = vsel %vm1539_vm0, %v1540_v11, %v1536_v10  ;;  %v1800_v21 = vsel %vm1788_vm13, %v8757_v9, %v8756_v19  ;;  %v7222_v43 = vshll.u32 %v1762_v50, 8  ;;  %v1259_v25 = vsel %vm1136_vm12, %v1258_v31, %v7095_v54 }
 0x1ee   : > { %v1257_v2 = vsel %vm1136_vm12, %v1256_v60, %v1255_v3  ;;  %v1542_v53 = vadd.s32 %v1541_v13, %v1537_v1  ;;  %vm1786_vm11 = vcmp.lt.s32.totalorder %v8755_v27, 1  ;;  %v7233_v56 = vor.u32 %v1772_v40, %v1771_v45  ;;  %v8758_v13 = vld [vmem:[#allocation22_spill] sm:$0xff] }
 0x1ef   : > { %v1260_v33 = vsel %vm7204_vm8, %v8726_v51, %v1257_v2  ;;  %vm1787_vm7 = vcmp.lt.s32.totalorder %v8755_v27, 2  ;;  %v1798_v18 = vsel %vm1786_vm11, %v7210_v34, %v7213_v47  ;;  %v7242_v24 = vshll.u32 %v8655_v57, %v7075_v63 }
 0x1f0   : > { %v1262_v54 = vmul.f32 %v1260_v33, %v1260_v33  ;;  %v1543_v17 = vadd.s32 536870912, %v1542_v53  ;;  %v1801_v46 = vsel %vm1787_vm7, %v1798_v18, %v1800_v21  ;;  %v7247_v31 = vand.u32 65535, %v7222_v43 }
 0x1f1   : > { %v7250_v10 = vshrl.u32 %v7222_v43, 16  ;;  %v1805_v50 = vand.u32 65535, %v1801_v46  ;;  %v1806_v44 = vshrl.u32 %v1801_v46, 16  ;;  %v1261_v0 = vsel %vm7204_vm8, 0, %v1259_v25 }
 0x1f2   : > { %v1263_v48 = vmul.f32 -0.001358992, %v1262_v54  ;;  %v1270_v3 = vmul.f32 -0.00019511016, %v1262_v54  ;;  %v7254_v16 = vshrl.u32 %v1543_v17, 30  ;;  %v7258_v7 = vshll.u32 %v8722_v14, %v7075_v63 }
 0x1f3   : > { %v1794_v26 = vsel %vm1786_vm11, %v7233_v56, %v7210_v34  ;;  %v7265_v11 = vmul.u32 %v1806_v44, %v7247_v31  ;;  %v7268_v40 = vmul.u32 %v1805_v50, %v7250_v10  ;;  %v1796_v45 = vsel %vm1788_vm13, %v7213_v47, %v8758_v13 }
 0x1f4   : > { %v1264_v49 = vadd.f32 0.041655596, %v1263_v48  ;;  %v1271_v60 = vadd.f32 0.008332121, %v1270_v3  ;;  %v1545_v1 = vshll.u32 %v7254_v16, 30  ;;  %v7276_v19 = vadd.s32 4294967169, %v7085_v36 }
 0x1f5   : > { %v1278_v9 = vadd.s32 3, %v1261_v0  ;;  %v1807_v21 = vmul.u32 %v1805_v50, %v7247_v31  ;;  %v1811_v2 = vshll.u32 %v7265_v11, 16  ;;  %v3770_v17 = vand.u32 3, %v1261_v0 }
 0x1f6   : > { %v1265_v25 = vmul.f32 %v1264_v49, %v1262_v54  ;;  %v1272_v18 = vmul.f32 %v1271_v60, %v1262_v54  ;;  %v1546_v46 = vsub.s32 %v1542_v53, %v1545_v1  ;;  %v1797_v48 = vsel %vm1787_vm7, %v1794_v26, %v1796_v45 }
 0x1f7   : > { %v1813_v3 = vshll.u32 %v7268_v40, 16  ;;  %vm1815_vm15 = vc.u32 %v1807_v21, %v1811_v2  ;;  %v1817_v32 = vadd.s32 %v1811_v2, %v1807_v21  ;;  %v1279_v30 = vand.u32 3, %v1278_v9 }
 0x1f8   : > { %v1266_v13 = vadd.f32 -0.4999988, %v1265_v25  ;;  %v1273_v42 = vadd.f32 -0.16666654, %v1272_v18  ;;  %vm1547_vm10 = vcmp.lt.s32.totalorder %v1546_v46, 0  ;;  %v1548_v36 = vsub.s32 0, %v1546_v46 }
 0x1f9   : > { %v1810_v50 = vmul.u32 %v1806_v44, %v7250_v10  ;;  %v1816_v63 = vsel %vm1815_vm15, 1, %v8669_v62  ;;  %vm1819_vm3 = vc.u32 %v1817_v32, %v1813_v3  ;;  %vm3771_vm5 = vcmp.lt.s32.totalorder %v3770_v17, 2 }
 0x1fa   : > { %v1267_v49 = vmul.f32 %v1266_v13, %v1262_v54  ;;  %v1274_v0 = vmul.f32 %v1273_v42, %v1262_v54  ;;  %vm3772_vm9 = vcmp.eq.s32.totalorder %v3770_v17, 0  ;;  %v1549_v53 = vsel %vm1547_vm10, %v1548_v36, %v1546_v46 }
 0x1fb   : > { %vm1277_vm1 = vweird.f32 %v8726_v51  ;;  %vm3775_vm6 = vcmp.eq.s32.totalorder %v3770_v17, 2  ;;  %v1550_v26 = vclz %v1549_v53  ;;  %v1818_v60 = vadd.s32 %v1816_v63, %v1810_v50 }
 0x1fc   : > { %v1828_v1 = vshrl.u32 %v1797_v48, 16  ;;  %v1268_v45 = vadd.f32 1.0, %v1267_v49  ;;  %v1275_v21 = vadd.f32 1.0, %v1274_v0  ;;  %v1820_v9 = vsel %vm1819_vm3, 1, %v8669_v62 }
 0x1fd   : > { %v1827_v2 = vand.u32 65535, %v1797_v48  ;;  %vm1280_vm12 = vcmp.lt.s32.totalorder %v1279_v30, 2  ;;  %vm1281_vm0 = vcmp.eq.s32.totalorder %v1279_v30, 0  ;;  %vm1284_vm8 = vcmp.eq.s32.totalorder %v1279_v30, 2 }
 0x1fe   : > { %v5488_v32 = vadd.s32 4294967294, %v1550_v26  ;;  %v1276_v44 = vmul.f32 %v1275_v21, %v1260_v33  ;;  %v1285_v42 = vxor.u32 2147483648, %v1268_v45  ;;  %v1538_v54 = vadd.s32 %v7190_v52, %v7183_v22 }
 0x1ff   : > { %v1770_v25 = vshrl.u32 %v8679_v4, %v8751_v59  ;;  %v1812_v63 = vshrl.u32 %v7265_v11, 16  ;;  %v1822_v18 = vadd.s32 %v1820_v9, %v1818_v60  ;;  %v1830_v3 = vmul.u32 %v1828_v1, %v7247_v31 }
 0x200   : > { %vm5489_vm15 = vcmp.lt.s32.totalorder %v5488_v32, 0  ;;  %v1282_v13 = vxor.u32 2147483648, %v1276_v44  ;;  %v1829_v36 = vmul.u32 %v1827_v2, %v7247_v31  ;;  %v1831_v50 = vmul.u32 %v1827_v2, %v7250_v10 }
 0x201   : > { %v1553_v48 = vsel %vm5489_vm15, 0, %v5488_v32  ;;  %v1286_v33 = vsel %vm1284_vm8, %v1285_v42, %v1276_v44  ;;  %v3777_v49 = vsel %vm3775_vm6, %v1285_v42, %v1276_v44  ;;  %v1833_v53 = vshll.u32 %v1830_v3, 16 }
 0x202   : > { %v1554_v22 = vsub.s32 32, %v1553_v48  ;;  %v1558_v52 = vsub.s32 4294967266, %v1553_v48  ;;  %v1283_v59 = vsel %vm1281_vm0, %v1268_v45, %v1282_v13  ;;  %v3774_v0 = vsel %vm3772_vm9, %v1268_v45, %v1282_v13 }
 0x203   : > { %v1555_v11 = vshll.u32 %v1546_v46, %v1553_v48  ;;  %v1287_v26 = vsel %vm1280_vm12, %v1283_v59, %v1286_v33  ;;  %v3778_v60 = vsel %vm3771_vm5, %v3774_v0, %v3777_v49  ;;  %vm8759_vm10 = vcmp.lt.s32.totalorder %v8755_v27, 4 }
 0x204   : > { %v1556_v21 = vshrl.u32 %v1538_v54, %v1554_v22  ;;  %v1559_v31 = vadd.s32 127, %v1558_v52  ;;  %v1288_v9 = vsel %vm1277_vm1, nan, %v1287_v26  ;;  %v3779_v2 = vsel %vm1277_vm1, nan, %v3778_v60  ;;  %v8760_v54 = vld [vmem:[#allocation28_spill] sm:$0xff]  ;;  %v8765_v60 = vld [vmem:[#allocation57_spill] sm:$0xff] }
 0x205   : > { %v1791_v32 = vsel %vm8759_vm10, %v7213_v47, 2102212464  ;;  %v1832_v45 = vmul.u32 %v1828_v1, %v7250_v10  ;;  %2845 = vst.msk [vmem:[%s6358_s22 + $0x28] sm:$0xff] %vm2839_vm14, %v1288_v9  ;;  %5346 = vrot.lane.b32.xlu2 %v3779_v2, %s5606_s23  ;;  %v1823_v46 = vadd.s32 %v1822_v18, %v1812_v63  ;;  %vm1837_vm3 = vc.u32 %v1829_v36, %v1833_v53 }
 0x206   : > { %v1557_v30 = vor.u32 %v1556_v21, %v1555_v11  ;;  %v1560_v17 = vshll.u32 %v1559_v31, 23  ;;  %vm1446_vm5 = vcmp.lt.s32.totalorder %v8738_v8, 0  ;;  %v1835_v44 = vshll.u32 %v1831_v50, 16 }
 0x207   : > { %v1838_v51 = vsel %vm1837_vm3, 1, %v8669_v62  ;;  %v1839_v42 = vadd.s32 %v1833_v53, %v1829_v36  ;;  %v1599_v13 = vand.u32 2147483647, %v8760_v54  ;;  %v8761_v47 = vand.u32 2147483647, %v8738_v8  ;;  %v8764_v53 = vld [vmem:[#allocation52_spill] sm:$0xff] }
 0x208   : > { %v1561_v1 = vor.u32 4788187, %v1560_v17  ;;  %v1790_v63 = vsel %vm1786_vm11, %v1770_v25, %v7233_v56  ;;  %v1792_v18 = vsel %vm1788_vm13, %v7210_v34, %v1791_v32  ;;  %v1840_v48 = vadd.s32 %v1838_v51, %v1832_v45 }
 0x209   : > { %vm7316_vm9 = vcmp.le.f32.partialorder %v8761_v47, 0.7853982  ;;  %v1568_v36 = vsub.s32 4, %v7254_v16  ;;  %v1814_v33 = vshrl.u32 %v7268_v40, 16  ;;  %vm1841_vm1 = vc.u32 %v1839_v42, %v1835_v44 }
 0x20a   : > { %v1606_v49 = vand.u32 8388607, %v1599_v13  ;;  %v1562_v22 = vand.u32 2147483647, %v1561_v1  ;;  %v1564_v52 = vcvt.s32.f32 %v1557_v30  ;;  %v1834_v59 = vshrl.u32 %v1830_v3, 16 }
 0x20b   : > { %v1842_v0 = vsel %vm1841_vm1, 1, %v8669_v62  ;;  %v7331_v11 = vadd.s32 %v1823_v46, %v1814_v33  ;;  %v1836_v56 = vshrl.u32 %v1831_v50, 16  ;;  %v1616_v34 = vshll.u32 %v8679_v4, %v8764_v53 }
 0x20c   : > { %v1844_v25 = vadd.s32 %v1842_v0, %v1840_v48  ;;  %v1565_v26 = vmul.f32 %v1564_v52, %v1562_v22  ;;  %v1617_v40 = vshrl.u32 %v8680_v41, %v8765_v60  ;;  %v1619_v21 = vshll.u32 %v8680_v41, %v8764_v53 }
 0x20d   : > { %v1620_v31 = vshrl.u32 %v8681_v12, %v8765_v60  ;;  %v1607_v9 = vor.u32 8388608, %v1606_v49  ;;  %v1622_v2 = vshll.u32 %v8681_v12, %v8764_v53  ;;  %v1623_v50 = vshrl.u32 %v8655_v57, %v8765_v60 }
 0x20e   : > { %v1845_v3 = vadd.s32 %v1844_v25, %v1834_v59  ;;  %v1566_v32 = vxor.u32 2147483648, %v1565_v26  ;;  %v1793_v45 = vsel %vm1787_vm7, %v1790_v63, %v1792_v18  ;;  %v7347_v30 = vadd.s32 %v1839_v42, %v1835_v44 }
 0x20f   : > { %v7349_v17 = vor.u32 %v1620_v31, %v1619_v21  ;;  %v7351_v51 = vor.u32 %v1617_v40, %v1616_v34  ;;  %v7353_v47 = vor.u32 %v1623_v50, %v1622_v2  ;;  %vm1633_vm13 = vcmp.lt.s32.totalorder %v8716_v20, 3 }
 0x210   : > { %v1846_v46 = vadd.s32 %v1845_v3, %v1836_v56  ;;  %v1567_v1 = vsel %vm1446_vm5, %v1566_v32, %v1565_v26  ;;  %v1569_v48 = vsel %vm1446_vm5, %v1568_v36, %v7254_v16  ;;  %vm1849_vm11 = vc.u32 %v7331_v11, %v7347_v30 }
 0x211   : > { %v1645_v27 = vsel %vm1633_vm13, %v6519_v28, %v6758_v39  ;;  %v7370_v44 = vsel %vm7316_vm9, %v8738_v8, %v1567_v1  ;;  %vm1631_vm7 = vcmp.lt.s32.totalorder %v8716_v20, 1  ;;  %v7373_v63 = vshll.u32 %v1607_v9, 8 }
 0x212   : > { %v1850_v42 = vadd.s32 1, %v1846_v46  ;;  %v1572_v16 = vmul.f32 %v7370_v44, %v7370_v44  ;;  %v1847_v18 = vmul.u32 %v7222_v43, %v1793_v45  ;;  %vm1632_vm6 = vcmp.lt.s32.totalorder %v8716_v20, 2 }
 0x213   : > { %v1643_v28 = vsel %vm1631_vm7, %v7349_v17, %v7353_v47  ;;  %v1571_v39 = vsel %vm7316_vm9, 0, %v1569_v48  ;;  %v1639_v33 = vsel %vm1631_vm7, %v7351_v51, %v7349_v17  ;;  %v1641_v59 = vsel %vm1633_vm13, %v7353_v47, %v6734_v35 }
 0x214   : > { %v1851_v36 = vsel %vm1849_vm11, %v1850_v42, %v1846_v46  ;;  %v1646_v49 = vsel %vm1632_vm6, %v1643_v28, %v1645_v27  ;;  %v1573_v43 = vmul.f32 -0.001358992, %v1572_v16  ;;  %v1580_v22 = vmul.f32 -0.00019511016, %v1572_v16 }
 0x215   : > { %v1852_v52 = vadd.s32 %v1851_v36, %v1847_v18  ;;  %v1648_v10 = vand.u32 65535, %v7373_v63  ;;  %v7397_v0 = vshrl.u32 %v7373_v63, 16  ;;  %v1650_v56 = vand.u32 65535, %v1646_v49 }
 0x216   : > { %v1651_v25 = vshrl.u32 %v1646_v49, 16  ;;  %v1574_v53 = vadd.f32 0.041655596, %v1573_v43  ;;  %v1581_v34 = vadd.f32 0.008332121, %v1580_v22  ;;  %v1588_v26 = vadd.s32 3, %v1571_v39 }
 0x217   : > { %v1853_v40 = vadd.s32 536870912, %v1852_v52  ;;  %v2532_v21 = vand.u32 2139095040, %v7093_v61  ;;  %v4078_v31 = vand.u32 3, %v1571_v39  ;;  %v7403_v9 = vmul.u32 %v1650_v56, %v7397_v0 }
 0x218   : > { %v7400_v3 = vmul.u32 %v1651_v25, %v1648_v10  ;;  %v1575_v35 = vmul.f32 %v1574_v53, %v1572_v16  ;;  %v1582_v2 = vmul.f32 %v1581_v34, %v1572_v16  ;;  %v7409_v32 = vsel %vm1632_vm6, %v1639_v33, %v1641_v59 }
 0x219   : > { %v7405_v50 = vshrl.u32 %v1853_v40, 30  ;;  %v7413_v45 = vshrl.u32 %v8722_v14, %v7180_v58  ;;  %v7417_v46 = vshrl.u32 %v8724_v6, %v7180_v58  ;;  %v1652_v1 = vmul.u32 %v1650_v56, %v1648_v10 }
 0x21a   : > { %v1656_v48 = vshll.u32 %v7400_v3, 16  ;;  %v1576_v27 = vadd.f32 -0.4999988, %v1575_v35  ;;  %v1583_v42 = vadd.f32 -0.16666654, %v1582_v2  ;;  %v1589_v18 = vand.u32 3, %v1588_v26 }
 0x21b   : > { %v1855_v28 = vshll.u32 %v7405_v50, 30  ;;  %vm4080_vm12 = vcmp.eq.s32.totalorder %v4078_v31, 0  ;;  %v1658_v39 = vshll.u32 %v7403_v9, 16  ;;  %v1673_v33 = vshrl.u32 %v7409_v32, 16 }
 0x21c   : > { %vm1660_vm0 = vc.u32 %v1652_v1, %v1656_v48  ;;  %v1662_v36 = vadd.s32 %v1656_v48, %v1652_v1  ;;  %v1577_v49 = vmul.f32 %v1576_v27, %v1572_v16  ;;  %v1584_v43 = vmul.f32 %v1583_v42, %v1572_v16 }
 0x21d   : > { %vm4079_vm8 = vcmp.lt.s32.totalorder %v4078_v31, 2  ;;  %vm4083_vm15 = vcmp.eq.s32.totalorder %v4078_v31, 2  ;;  %v7423_v22 = vsub.s32 %v1852_v52, %v1855_v28  ;;  %vm1587_vm10 = vweird.f32 %v8738_v8 }
 0x21e   : > { %v1655_v59 = vmul.u32 %v1651_v25, %v7397_v0  ;;  %v1661_v56 = vsel %vm1660_vm0, 1, %v8669_v62  ;;  %vm7428_vm3 = vc.u32 %v1662_v36, %v1658_v39  ;;  %v1672_v34 = vand.u32 65535, %v7409_v32 }
 0x21f   : > { %v1578_v26 = vadd.f32 1.0, %v1577_v49  ;;  %v1585_v40 = vadd.f32 1.0, %v1584_v43  ;;  %vm1857_vm5 = vcmp.lt.s32.totalorder %v7423_v22, 0  ;;  %v1858_v16 = vsub.s32 0, %v7423_v22 }
 0x220   : > { %vm1590_vm9 = vcmp.lt.s32.totalorder %v1589_v18, 2  ;;  %vm1591_vm1 = vcmp.eq.s32.totalorder %v1589_v18, 0  ;;  %v1615_v52 = vshrl.u32 %v8679_v4, %v8765_v60  ;;  %v1675_v25 = vmul.u32 %v1673_v33, %v1648_v10 }
 0x221   : > { %v1586_v35 = vmul.f32 %v1585_v40, %v7370_v44  ;;  %v1595_v2 = vxor.u32 2147483648, %v1578_v26  ;;  %v1859_v1 = vsel %vm1857_vm5, %v1858_v16, %v7423_v22  ;;  %v1663_v48 = vadd.s32 %v1661_v56, %v1655_v59 }
 0x222   : > { %vm1594_vm11 = vcmp.eq.s32.totalorder %v1589_v18, 2  ;;  %v1848_v32 = vadd.s32 %v7347_v30, %v7331_v11  ;;  %v1860_v27 = vclz %v1859_v1  ;;  %v1665_v42 = vsel %vm7428_vm3, 1, %v8669_v62 }
 0x223   : > { %v1592_v28 = vxor.u32 2147483648, %v1586_v35  ;;  %vm1756_vm0 = vcmp.lt.s32.totalorder %v8749_v38, 0  ;;  %v1635_v60 = vsel %vm1631_vm7, %v1615_v52, %v7351_v51  ;;  %v1636_v44 = vsel %vm1634_vm2, %v7353_v47, 2102212464 }
 0x224   : > { %v1674_v39 = vmul.u32 %v1672_v34, %v1648_v10  ;;  %v4085_v36 = vsel %vm4083_vm15, %v1595_v2, %v1586_v35  ;;  %v5494_v11 = vadd.s32 4294967294, %v1860_v27  ;;  %v1676_v30 = vmul.u32 %v1672_v34, %v7397_v0 }
 0x225   : > { %v1678_v49 = vshll.u32 %v1675_v25, 16  ;;  %v4082_v43 = vsel %vm4080_vm12, %v1578_v26, %v1592_v28  ;;  %v1593_v59 = vsel %vm1591_vm1, %v1578_v26, %v1592_v28  ;;  %v1596_v56 = vsel %vm1594_vm11, %v1595_v2, %v1586_v35 }
 0x226   : > { %v1667_v53 = vadd.s32 %v1665_v42, %v1663_v48  ;;  %v4086_v51 = vsel %vm4079_vm8, %v4082_v43, %v4085_v36  ;;  %v1597_v40 = vsel %vm1590_vm9, %v1593_v59, %v1596_v56  ;;  %vm5495_vm7 = vcmp.lt.s32.totalorder %v5494_v11, 0  ;;  %v8771_v36 = vld [vmem:[#allocation31_spill] sm:$0xff] }
 0x227   : > { %v1657_v47 = vshrl.u32 %v7400_v3, 16  ;;  %v4087_v10 = vsel %vm1587_vm10, nan, %v4086_v51  ;;  %v1598_v34 = vsel %vm1587_vm10, nan, %v1597_v40  ;;  %v1863_v16 = vsel %vm5495_vm7, 0, %v5494_v11 }
 0x228   : > { %v1878_v52 = vsub.s32 4, %v7405_v50  ;;  %5350 = vrot.lane.b32.xlu1 %v4087_v10, %s5606_s23  ;;  %2847 = vst.msk [vmem:[%s6358_s22 + $0x38] sm:$0xff] %vm2839_vm14, %v1598_v34  ;;  %v1864_v31 = vsub.s32 32, %v1863_v16  ;;  %v1868_v26 = vsub.s32 4294967266, %v1863_v16  ;;  %v1677_v18 = vmul.u32 %v1673_v33, %v7397_v0 }
 0x229   : > { %v1680_v35 = vshll.u32 %v1676_v30, 16  ;;  %v1865_v3 = vshll.u32 %v7423_v22, %v1863_v16  ;;  %v1668_v2 = vadd.s32 %v1667_v53, %v1657_v47  ;;  %vm1682_vm2 = vc.u32 %v1674_v39, %v1678_v49 }
 0x22a   : > { %v1684_v1 = vadd.s32 %v1678_v49, %v1674_v39  ;;  %v8768_v8 = vand.u32 2147483647, %v8749_v38  ;;  %v1866_v27 = vshrl.u32 %v1848_v32, %v1864_v31  ;;  %v1869_v42 = vadd.s32 127, %v1868_v26 }
 0x22b   : > { %v1683_v28 = vsel %vm1682_vm2, 1, %v8669_v62  ;;  %v1909_v11 = vand.u32 2147483647, %v8771_v36  ;;  %v1637_v0 = vsel %vm1633_vm13, %v7349_v17, %v1636_v44  ;;  %v1659_v33 = vshrl.u32 %v7403_v9, 16 }
 0x22c   : > { %vm7470_vm12 = vcmp.le.f32.partialorder %v8768_v8, 0.7853982  ;;  %v1685_v22 = vadd.s32 %v1683_v28, %v1677_v18  ;;  %vm1686_vm8 = vc.u32 %v1684_v1, %v1680_v35  ;;  %v1867_v39 = vor.u32 %v1866_v27, %v1865_v3 }
 0x22d   : > { %v1870_v49 = vshll.u32 %v1869_v42, 23  ;;  %v1879_v43 = vsel %vm1756_vm0, %v1878_v52, %v7405_v50  ;;  %v1687_v32 = vsel %vm1686_vm8, 1, %v8669_v62  ;;  %v7484_v59 = vadd.s32 %v1668_v2, %v1659_v33 }
 0x22e   : > { %v1679_v56 = vshrl.u32 %v1675_v25, 16  ;;  %v1689_v53 = vadd.s32 %v1687_v32, %v1685_v22  ;;  %v1916_v51 = vand.u32 8388607, %v1909_v11  ;;  %v1874_v44 = vcvt.s32.f32 %v1867_v39 }
 0x22f   : > { %v1871_v17 = vor.u32 4788187, %v1870_v49  ;;  %v1681_v9 = vshrl.u32 %v1676_v30, 16  ;;  %v7488_v40 = vadd.s32 %v1684_v1, %v1680_v35  ;;  %v1927_v34 = vshrl.u32 %v8680_v41, %v6592_v55 }
 0x230   : > { %v1690_v47 = vadd.s32 %v1689_v53, %v1679_v56  ;;  %v1917_v10 = vor.u32 8388608, %v1916_v51  ;;  %v1929_v50 = vshll.u32 %v8680_v41, %v6435_v15  ;;  %v1930_v25 = vshrl.u32 %v8681_v12, %v6592_v55 }
 0x231   : > { %v1872_v16 = vand.u32 2147483647, %v1871_v17  ;;  %v1932_v52 = vshll.u32 %v8681_v12, %v6435_v15  ;;  %v1933_v30 = vshrl.u32 %v8655_v57, %v6592_v55  ;;  %v1638_v31 = vsel %vm1632_vm6, %v1635_v60, %v1637_v0 }
 0x232   : > { %v1691_v26 = vadd.s32 %v1690_v47, %v1681_v9  ;;  %vm1694_vm13 = vc.u32 %v7484_v59, %v7488_v40  ;;  %v1926_v18 = vshll.u32 %v8679_v4, %v6435_v15  ;;  %v7506_v3 = vor.u32 %v1930_v25, %v1929_v50 }
 0x233   : > { %v1875_v35 = vmul.f32 %v1874_v44, %v1872_v16  ;;  %v1934_v2 = vor.u32 %v1933_v30, %v1932_v52  ;;  %vm1943_vm15 = vcmp.lt.s32.totalorder %v8744_v23, 3  ;;  %v1881_v1 = vsel %vm7470_vm12, 0, %v1879_v43 }
 0x234   : > { %v1695_v8 = vadd.s32 1, %v1691_v26  ;;  %v7511_v27 = vor.u32 %v1927_v34, %v1926_v18  ;;  %v1955_v20 = vsel %vm1943_vm15, %v6928_v5, %v7175_v37  ;;  %v1692_v15 = vmul.u32 %v7373_v63, %v1638_v31 }
 0x235   : > { %v1876_v60 = vxor.u32 2147483648, %v1875_v35  ;;  %vm1941_vm6 = vcmp.lt.s32.totalorder %v8744_v23, 1  ;;  %v7519_v42 = vshll.u32 %v1917_v10, 8  ;;  %v2384_v28 = vadd.s32 1, %v7276_v19 }
 0x236   : > { %v1696_v0 = vsel %vm1694_vm13, %v1695_v8, %v1691_v26  ;;  %vm1942_vm10 = vcmp.lt.s32.totalorder %v8744_v23, 2  ;;  %v1953_v33 = vsel %vm1941_vm6, %v7506_v3, %v1934_v2  ;;  %v1898_v5 = vadd.s32 3, %v1881_v1 }
 0x237   : > { %v1877_v22 = vsel %vm1756_vm0, %v1876_v60, %v1875_v35  ;;  %v1697_v37 = vadd.s32 %v1696_v0, %v1692_v15  ;;  %v1956_v63 = vsel %vm1942_vm10, %v1953_v33, %v1955_v20  ;;  %v1949_v19 = vsel %vm1941_vm6, %v7511_v27, %v7506_v3 }
 0x238   : > { %v7533_v39 = vsel %vm7470_vm12, %v8749_v38, %v1877_v22  ;;  %v1951_v49 = vsel %vm1943_vm15, %v1934_v2, %v7100_v29  ;;  %v1960_v43 = vand.u32 65535, %v1956_v63  ;;  %v1958_v53 = vand.u32 65535, %v7519_v42 }
 0x239   : > { %v1882_v32 = vmul.f32 %v7533_v39, %v7533_v39  ;;  %v1698_v56 = vadd.s32 536870912, %v1697_v37  ;;  %v1961_v51 = vshrl.u32 %v1956_v63, 16  ;;  %v7547_v48 = vor.u32 %v7413_v45, %v7242_v24 }
 0x23a   : > { %vm2385_vm3 = vcmp.gt.s32.totalorder %v2384_v28, 0  ;;  %v2533_v17 = vshrl.u32 %v2532_v21, 23  ;;  %v7552_v44 = vshrl.u32 %v7519_v42, 16  ;;  %v2095_v34 = vor.u32 %v7417_v46, %v7258_v7 }
 0x23b   : > { %v1883_v29 = vmul.f32 -0.001358992, %v1882_v32  ;;  %v1890_v9 = vmul.f32 -0.00019511016, %v1882_v32  ;;  %v7554_v47 = vshrl.u32 %v1698_v56, 30  ;;  %v7556_v10 = vmul.u32 %v1961_v51, %v1958_v53 }
 0x23c   : > { %v7560_v50 = vand.u32 3, %v1881_v1  ;;  %v1952_v24 = vsel %vm1942_vm10, %v1949_v19, %v1951_v49  ;;  %v7565_v45 = vmul.u32 %v1960_v43, %v7552_v44  ;;  %v7567_v25 = vand.u32 3, %v1898_v5 }
 0x23d   : > { %v1884_v21 = vadd.f32 0.041655596, %v1883_v29  ;;  %v1891_v16 = vadd.f32 0.008332121, %v1890_v9  ;;  %v1700_v52 = vshll.u32 %v7554_v47, 30  ;;  %v7570_v30 = vsel %vm2385_vm3, %v2384_v28, 0 }
 0x23e   : > { %v7572_v31 = vadd.s32 4294967169, %v2533_v17  ;;  %v1962_v26 = vmul.u32 %v1960_v43, %v1958_v53  ;;  %v1966_v18 = vshll.u32 %v7556_v10, 16  ;;  %v1983_v20 = vshrl.u32 %v1952_v24, 16 }
 0x23f   : > { %v1885_v35 = vmul.f32 %v1884_v21, %v1882_v32  ;;  %v1892_v1 = vmul.f32 %v1891_v16, %v1882_v32  ;;  %v7575_v8 = vsub.s32 %v1697_v37, %v1700_v52  ;;  %vm4391_vm5 = vcmp.eq.s32.totalorder %v7560_v50, 2 }
 0x240   : > { %v1968_v60 = vshll.u32 %v7565_v45, 16  ;;  %vm1970_vm9 = vc.u32 %v1962_v26, %v1966_v18  ;;  %v1972_v15 = vadd.s32 %v1966_v18, %v1962_v26  ;;  %v1982_v0 = vand.u32 65535, %v1952_v24 }
 0x241   : > { %v1886_v33 = vadd.f32 -0.4999988, %v1885_v35  ;;  %v1893_v28 = vadd.f32 -0.16666654, %v1892_v1  ;;  %vm1904_vm1 = vcmp.eq.s32.totalorder %v7567_v25, 2  ;;  %vm1702_vm11 = vcmp.lt.s32.totalorder %v7575_v8, 0 }
 0x242   : > { %v1703_v22 = vsub.s32 0, %v7575_v8  ;;  %vm1901_vm0 = vcmp.eq.s32.totalorder %v7567_v25, 0  ;;  %vm4388_vm7 = vcmp.eq.s32.totalorder %v7560_v50, 0  ;;  %v1946_v5 = vsel %vm1944_vm4, %v1934_v2, 2102212464 }
 0x243   : > { %v1965_v37 = vmul.u32 %v1961_v51, %v7552_v44  ;;  %v1971_v63 = vsel %vm1970_vm9, 1, %v8669_v62  ;;  %vm1974_vm2 = vc.u32 %v1972_v15, %v1968_v60  ;;  %v1887_v19 = vmul.f32 %v1886_v33, %v1882_v32 }
 0x244   : > { %v1894_v49 = vmul.f32 %v1893_v28, %v1882_v32  ;;  %vm1900_vm12 = vcmp.lt.s32.totalorder %v7567_v25, 2  ;;  %vm4387_vm8 = vcmp.lt.s32.totalorder %v7560_v50, 2  ;;  %v1704_v43 = vsel %vm1702_vm11, %v1703_v22, %v7575_v8 }
 0x245   : > { %v7591_v56 = vmul.u32 %v1983_v20, %v1958_v53  ;;  %vm1897_vm13 = vweird.f32 %v8749_v38  ;;  %v1693_v2 = vadd.s32 %v7488_v40, %v7484_v59  ;;  %v1705_v17 = vclz %v1704_v43 }
 0x246   : > { %v1925_v51 = vshrl.u32 %v8679_v4, %v6592_v55  ;;  %v1973_v29 = vadd.s32 %v1971_v63, %v1965_v37  ;;  %v1888_v9 = vadd.f32 1.0, %v1887_v19  ;;  %v1895_v32 = vadd.f32 1.0, %v1894_v49 }
 0x247   : > { %v1975_v24 = vsel %vm1974_vm2, 1, %v8669_v62  ;;  %v1986_v21 = vmul.u32 %v1982_v0, %v7552_v44  ;;  %v5491_v16 = vadd.s32 4294967294, %v1705_v17  ;;  %v1947_v59 = vsel %vm1943_vm15, %v7506_v3, %v1946_v5 }
 0x248   : > { %v1945_v52 = vsel %vm1941_vm6, %v1925_v51, %v7511_v27  ;;  %v1984_v40 = vmul.u32 %v1982_v0, %v1958_v53  ;;  %v1896_v26 = vmul.f32 %v1895_v32, %v7533_v39  ;;  %v1905_v55 = vxor.u32 2147483648, %v1888_v9 }
 0x249   : > { %v1723_v18 = vsub.s32 4, %v7554_v47  ;;  %v1988_v35 = vshll.u32 %v7591_v56, 16  ;;  %vm5492_vm4 = vcmp.lt.s32.totalorder %v5491_v16, 0  ;;  %v1967_v1 = vshrl.u32 %v7556_v10, 16 }
 0x24a   : > { %v1977_v60 = vadd.s32 %v1975_v24, %v1973_v29  ;;  %v1987_v15 = vmul.u32 %v1983_v20, %v7552_v44  ;;  %v1902_v33 = vxor.u32 2147483648, %v1896_v26  ;;  %v4393_v27 = vsel %vm4391_vm5, %v1905_v55, %v1896_v26 }
 0x24b   : > { %v1708_v28 = vsel %vm5492_vm4, 0, %v5491_v16  ;;  %v1990_v3 = vshll.u32 %v1986_v21, 16  ;;  %v1906_v39 = vsel %vm1904_vm1, %v1905_v55, %v1896_v26  ;;  %vm1992_vm15 = vc.u32 %v1984_v40, %v1988_v35  ;;  %v8775_v26 = vld [vmem:[#allocation44_spill] sm:$0xff] }
 0x24c   : > { %v1709_v53 = vsub.s32 32, %v1708_v28  ;;  %v1710_v0 = vshll.u32 %v7575_v8, %v1708_v28  ;;  %v1713_v22 = vsub.s32 4294967266, %v1708_v28  ;;  %v4390_v10 = vsel %vm4388_vm7, %v1888_v9, %v1902_v33  ;;  %v8776_v28 = vld [vmem:[#allocation15_spill] sm:$0xff] }
 0x24d   : > { %v1903_v44 = vsel %vm1901_vm0, %v1888_v9, %v1902_v33  ;;  %v1994_v20 = vadd.s32 %v1988_v35, %v1984_v40  ;;  %v4394_v5 = vsel %vm4387_vm8, %v4390_v10, %v4393_v27  ;;  %v1978_v43 = vadd.s32 %v1977_v60, %v1967_v1  ;;  %v8772_v9 = vld [vmem:[#allocation5_spill] sm:$0xff] }
 0x24e   : > { %v1907_v37 = vsel %vm1900_vm12, %v1903_v44, %v1906_v39  ;;  %v1711_v63 = vshrl.u32 %v1693_v2, %v1709_v53  ;;  %v1714_v19 = vadd.s32 127, %v1713_v22  ;;  %v4395_v8 = vsel %vm1897_vm13, nan, %v4394_v5  ;;  %v8777_v53 = vld [vmem:[#allocation20_spill] sm:$0xff] }
 0x24f   : > { %v1908_v49 = vsel %vm1897_vm13, nan, %v1907_v37  ;;  %v1993_v17 = vsel %vm1992_vm15, 1, %v8669_v62  ;;  %5354 = vrot.lane.b32.xlu0 %v4395_v8, %s5606_s23  ;;  %vm1996_vm6 = vc.u32 %v1994_v20, %v1990_v3  ;;  %vm1601_vm3 = vcmp.lt.s32.totalorder %v8760_v54, 0 }
 0x250   : > { %2849 = vst.msk [vmem:[%s6358_s22 + $0x48] sm:$0xff] %vm2839_vm14, %v1908_v49  ;;  %v1712_v50 = vor.u32 %v1711_v63, %v1710_v0  ;;  %v1715_v51 = vshll.u32 %v1714_v19, 23  ;;  %v1995_v29 = vadd.s32 %v1993_v17, %v1987_v15  ;;  %v1969_v25 = vshrl.u32 %v7565_v45, 16  ;;  %v8778_v63 = vld [vmem:[#allocation25_spill] sm:$0xff] }
 0x251   : > { %v1997_v2 = vsel %vm1996_vm6, 1, %v8669_v62  ;;  %v2219_v38 = vand.u32 2147483647, %v8772_v9  ;;  %vm7638_vm5 = vcmp.le.f32.partialorder %v1599_v13, 0.7853982  ;;  %v1989_v16 = vshrl.u32 %v7591_v56, 16 }
 0x252   : > { %v1716_v24 = vor.u32 4788187, %v1715_v51  ;;  %v1999_v40 = vadd.s32 %v1997_v2, %v1995_v29  ;;  %vm2099_vm9 = vcmp.lt.s32.totalorder %v8775_v26, 4  ;;  %v1724_v45 = vsel %vm1601_vm3, %v1723_v18, %v7554_v47  ;;  %v8779_v17 = vld [vmem:[#allocation33_spill] sm:$0xff] }
 0x253   : > { %v1948_v55 = vsel %vm1942_vm10, %v1945_v52, %v1947_v59  ;;  %v7649_v35 = vadd.s32 %v1978_v43, %v1969_v25  ;;  %v2226_v13 = vand.u32 8388607, %v2219_v38  ;;  %v1719_v60 = vcvt.s32.f32 %v1712_v50  ;;  %v8780_v50 = vld [vmem:[#allocation29_spill] sm:$0xff] }
 0x254   : > { %v1717_v1 = vand.u32 2147483647, %v1716_v24  ;;  %v1991_v15 = vshrl.u32 %v1986_v21, 16  ;;  %v2000_v33 = vadd.s32 %v1999_v40, %v1989_v16  ;;  %v7653_v56 = vadd.s32 %v1994_v20, %v1990_v3 }
 0x255   : > { %v2227_v27 = vor.u32 8388608, %v2226_v13  ;;  %v2239_v39 = vshll.u32 %v8680_v41, %v8776_v28  ;;  %v2240_v47 = vshrl.u32 %v8681_v12, %v8777_v53  ;;  %v2242_v59 = vshll.u32 %v8681_v12, %v8776_v28 }
 0x256   : > { %v1720_v23 = vmul.f32 %v1719_v60, %v1717_v1  ;;  %v2001_v52 = vadd.s32 %v2000_v33, %v1991_v15  ;;  %v2243_v18 = vshrl.u32 %v8655_v57, %v8777_v53  ;;  %v7664_v21 = vand.u32 31, %v7570_v30 }
 0x257   : > { %v1726_v3 = vsel %vm7638_vm5, 0, %v1724_v45  ;;  %vm2004_vm10 = vc.u32 %v7649_v35, %v7653_v56  ;;  %v2237_v0 = vshrl.u32 %v8680_v41, %v8777_v53  ;;  %v7672_v44 = vor.u32 %v2240_v47, %v2239_v39 }
 0x258   : > { %v1721_v22 = vxor.u32 2147483648, %v1720_v23  ;;  %v2005_v10 = vadd.s32 1, %v2001_v52  ;;  %v2244_v20 = vor.u32 %v2243_v18, %v2242_v59  ;;  %v2002_v5 = vmul.u32 %v7519_v42, %v1948_v55 }
 0x259   : > { %v2236_v37 = vshll.u32 %v8679_v4, %v8776_v28  ;;  %vm2253_vm1 = vcmp.lt.s32.totalorder %v8778_v63, 3  ;;  %v7678_v19 = vshll.u32 %v2227_v27, 8  ;;  %v1743_v49 = vadd.s32 3, %v1726_v3 }
 0x25a   : > { %v1722_v8 = vsel %vm1601_vm3, %v1721_v22, %v1720_v23  ;;  %v2006_v43 = vsel %vm2004_vm10, %v2005_v10, %v2001_v52  ;;  %v2265_v51 = vsel %vm2253_vm1, %v8780_v50, %v8779_v17  ;;  %vm2251_vm11 = vcmp.lt.s32.totalorder %v8778_v63, 1  ;;  %v8781_v52 = vld [vmem:[#allocation32_spill] sm:$0xff] }
 0x25b   : > { %v7689_v42 = vsel %vm7638_vm5, %v8760_v54, %v1722_v8  ;;  %v2007_v29 = vadd.s32 %v2006_v43, %v2002_v5  ;;  %v7691_v25 = vor.u32 %v2237_v0, %v2236_v37  ;;  %v7697_v2 = vsel %vm2099_vm9, %v7547_v48, 920167782 }
 0x25c   : > { %v1727_v24 = vmul.f32 %v7689_v42, %v7689_v42  ;;  %vm2252_vm0 = vcmp.lt.s32.totalorder %v8778_v63, 2  ;;  %v2263_v32 = vsel %vm2251_vm11, %v7672_v44, %v2244_v20  ;;  %v7706_v16 = vsub.s32 32, %v7664_v21 }
 0x25d   : > { %v2008_v40 = vadd.s32 536870912, %v2007_v29  ;;  %v2266_v45 = vsel %vm2252_vm0, %v2263_v32, %v2265_v51  ;;  %v2268_v55 = vand.u32 65535, %v7678_v19  ;;  %v7711_v33 = vand.u32 3, %v1743_v49 }
 0x25e   : > { %v1728_v13 = vmul.f32 -0.001358992, %v1727_v24  ;;  %v1735_v1 = vmul.f32 -0.00019511016, %v1727_v24  ;;  %v2270_v60 = vand.u32 65535, %v2266_v45  ;;  %v2271_v15 = vshrl.u32 %v2266_v45, 16 }
 0x25f   : > { %v7713_v27 = vand.u32 3, %v1726_v3  ;;  %v7715_v28 = vshrl.u32 %v2008_v40, 30  ;;  %v2259_v39 = vsel %vm2251_vm11, %v7691_v25, %v7672_v44  ;;  %v2261_v59 = vsel %vm2253_vm1, %v2244_v20, %v8781_v52 }
 0x260   : > { %v1729_v47 = vadd.f32 0.041655596, %v1728_v13  ;;  %v1736_v23 = vadd.f32 0.008332121, %v1735_v1  ;;  %v7724_v18 = vmul.u32 %v2271_v15, %v2268_v55  ;;  %v7731_v3 = vsel %vm2099_vm9, %v2095_v34, 1326507024 }
 0x261   : > { %v7734_v0 = vshrl.u32 %v7570_v30, 5  ;;  %v2010_v22 = vshll.u32 %v7715_v28, 30  ;;  %v7738_v10 = vshrl.u32 %v7678_v19, 16  ;;  %v2272_v8 = vmul.u32 %v2270_v60, %v2268_v55 }
 0x262   : > { %v1730_v5 = vmul.f32 %v1729_v47, %v1727_v24  ;;  %v1737_v37 = vmul.f32 %v1736_v23, %v1727_v24  ;;  %v2276_v49 = vshll.u32 %v7724_v18, 16  ;;  %v7743_v7 = vshll.u32 %v8655_v57, %v7664_v21 }
 0x263   : > { %v7747_v46 = vshrl.u32 %v8722_v14, %v7706_v16  ;;  %v7749_v34 = vsub.s32 %v2007_v29, %v2010_v22  ;;  %v2262_v30 = vsel %vm2252_vm0, %v2259_v39, %v2261_v59  ;;  %vm1749_vm7 = vcmp.eq.s32.totalorder %v7711_v33, 2 }
 0x264   : > { %v1731_v43 = vadd.f32 -0.4999988, %v1730_v5  ;;  %v1738_v17 = vadd.f32 -0.16666654, %v1737_v37  ;;  %vm4237_vm2 = vcmp.eq.s32.totalorder %v7713_v27, 2  ;;  %v7756_v50 = vmul.u32 %v2270_v60, %v7738_v10 }
 0x265   : > { %vm2280_vm12 = vc.u32 %v2272_v8, %v2276_v49  ;;  %vm1746_vm8 = vcmp.eq.s32.totalorder %v7711_v33, 0  ;;  %vm4234_vm13 = vcmp.eq.s32.totalorder %v7713_v27, 0  ;;  %vm2012_vm4 = vcmp.lt.s32.totalorder %v7749_v34, 0 }
 0x266   : > { %v2013_v51 = vsub.s32 0, %v7749_v34  ;;  %v2235_v29 = vshrl.u32 %v8679_v4, %v8777_v53  ;;  %vm8782_vm15 = vcmp.lt.s32.totalorder %v8778_v63, 4  ;;  %v1732_v40 = vmul.f32 %v1731_v43, %v1727_v24 }
 0x267   : > { %v2256_v32 = vsel %vm8782_vm15, %v2244_v20, 2102212464  ;;  %v1739_v45 = vmul.f32 %v1738_v17, %v1727_v24  ;;  %vm1745_vm6 = vcmp.lt.s32.totalorder %v7711_v33, 2  ;;  %vm4233_vm3 = vcmp.lt.s32.totalorder %v7713_v27, 2 }
 0x268   : > { %v2281_v13 = vsel %vm2280_vm12, 1, %v8669_v62  ;;  %v2282_v1 = vadd.s32 %v2276_v49, %v2272_v8  ;;  %vm1742_vm5 = vweird.f32 %v8760_v54  ;;  %v2014_v60 = vsel %vm2012_vm4, %v2013_v51, %v7749_v34 }
 0x269   : > { %v2275_v39 = vmul.u32 %v2271_v15, %v7738_v10  ;;  %v2292_v47 = vand.u32 65535, %v2262_v30  ;;  %v2293_v53 = vshrl.u32 %v2262_v30, 16  ;;  %v1733_v23 = vadd.f32 1.0, %v1732_v40 }
 0x26a   : > { %v1740_v52 = vadd.f32 1.0, %v1739_v45  ;;  %v2015_v20 = vclz %v2014_v60  ;;  %v2278_v24 = vshll.u32 %v7756_v50, 16  ;;  %v2003_v59 = vadd.s32 %v7653_v56, %v7649_v35 }
 0x26b   : > { %v2255_v22 = vsel %vm2251_vm11, %v2235_v29, %v7691_v25  ;;  %v2257_v5 = vsel %vm2253_vm1, %v7672_v44, %v2256_v32  ;;  %v2283_v37 = vadd.s32 %v2281_v13, %v2275_v39  ;;  %v1750_v8 = vxor.u32 2147483648, %v1733_v23 }
 0x26c   : > { %v1741_v15 = vmul.f32 %v1740_v52, %v7689_v42  ;;  %v5497_v49 = vadd.s32 4294967294, %v2015_v20  ;;  %vm2284_vm10 = vc.u32 %v2282_v1, %v2278_v24  ;;  %v2294_v43 = vmul.u32 %v2292_v47, %v2268_v55 }
 0x26d   : > { %v2285_v30 = vsel %vm2284_vm10, 1, %v8669_v62  ;;  %v2295_v17 = vmul.u32 %v2293_v53, %v2268_v55  ;;  %v2296_v35 = vmul.u32 %v2292_v47, %v7738_v10  ;;  %v2033_v25 = vsub.s32 4, %v7715_v28 }
 0x26e   : > { %v1747_v56 = vxor.u32 2147483648, %v1741_v15  ;;  %vm5498_vm12 = vcmp.lt.s32.totalorder %v5497_v49, 0  ;;  %v2277_v51 = vshrl.u32 %v7724_v18, 16  ;;  %v1751_v44 = vsel %vm1749_vm7, %v1750_v8, %v1741_v15 }
 0x26f   : > { %v4239_v42 = vsel %vm4237_vm2, %v1750_v8, %v1741_v15  ;;  %v2018_v29 = vsel %vm5498_vm12, 0, %v5497_v49  ;;  %v2298_v32 = vshll.u32 %v2295_v17, 16  ;;  %v2287_v13 = vadd.s32 %v2285_v30, %v2283_v37 }
 0x270   : > { %v1748_v55 = vsel %vm1746_vm8, %v1733_v23, %v1747_v56  ;;  %v4236_v40 = vsel %vm4234_vm13, %v1733_v23, %v1747_v56  ;;  %v2019_v45 = vsub.s32 32, %v2018_v29  ;;  %v2023_v60 = vsub.s32 4294967266, %v2018_v29 }
 0x271   : > { %v1752_v18 = vsel %vm1745_vm6, %v1748_v55, %v1751_v44  ;;  %v4240_v1 = vsel %vm4233_vm3, %v4236_v40, %v4239_v42  ;;  %v2297_v39 = vmul.u32 %v2293_v53, %v7738_v10  ;;  %v2300_v24 = vshll.u32 %v2296_v35, 16  ;;  %v8786_v55 = vld [vmem:[#allocation7_spill] sm:$0xff] }
 0x272   : > { %v1753_v47 = vsel %vm1742_vm5, nan, %v1752_v18  ;;  %v4241_v52 = vsel %vm1742_vm5, nan, %v4240_v1  ;;  %v2021_v20 = vshrl.u32 %v2003_v59, %v2019_v45  ;;  %v2020_v33 = vshll.u32 %v7749_v34, %v2018_v29 }
 0x273   : > { %2848 = vst.msk [vmem:[%s6358_s22 + $0x40] sm:$0xff] %vm2839_vm14, %v1753_v47  ;;  %5352 = vrot.lane.b32.xlu2 %v4241_v52, %s5606_s23  ;;  %v2024_v23 = vadd.s32 127, %v2023_v60  ;;  %vm2302_vm1 = vc.u32 %v2294_v43, %v2298_v32  ;;  %v2304_v27 = vadd.s32 %v2298_v32, %v2294_v43  ;;  %vm7809_vm11 = vcmp.le.f32.partialorder %v1909_v11, 0.7853982  ;;  %v8785_v11 = vld [vmem:[#allocation38_spill] sm:$0xff] }
 0x274   : > { %vm1911_vm7 = vcmp.lt.s32.totalorder %v8771_v36, 0  ;;  %v2288_v54 = vadd.s32 %v2287_v13, %v2277_v51  ;;  %v2303_v53 = vsel %vm2302_vm1, 1, %v8669_v62  ;;  %v2022_v59 = vor.u32 %v2021_v20, %v2020_v33 }
 0x275   : > { %v2025_v37 = vshll.u32 %v2024_v23, 23  ;;  %v2305_v15 = vadd.s32 %v2303_v53, %v2297_v39  ;;  %vm2306_vm2 = vc.u32 %v2304_v27, %v2300_v24  ;;  %v2258_v34 = vsel %vm2252_vm0, %v2255_v22, %v2257_v5 }
 0x276   : > { %v2279_v8 = vshrl.u32 %v7756_v50, 16  ;;  %v2307_v49 = vsel %vm2306_vm2, 1, %v8669_v62  ;;  %v2064_v30 = vand.u32 2147483647, %v8785_v11  ;;  %v2034_v56 = vsel %vm1911_vm7, %v2033_v25, %v7715_v28 }
 0x277   : > { %v2026_v43 = vor.u32 4788187, %v2025_v37  ;;  %v2299_v51 = vshrl.u32 %v2295_v17, 16  ;;  %v2309_v44 = vadd.s32 %v2307_v49, %v2305_v15  ;;  %v2301_v29 = vshrl.u32 %v2296_v35, 16 }
 0x278   : > { %v7823_v42 = vadd.s32 %v2288_v54, %v2279_v8  ;;  %v7825_v32 = vadd.s32 %v2304_v27, %v2300_v24  ;;  %v2071_v63 = vand.u32 8388607, %v2064_v30  ;;  %v2029_v22 = vcvt.s32.f32 %v2022_v59 }
 0x279   : > { %v2027_v50 = vand.u32 2147483647, %v2026_v43  ;;  %v2310_v5 = vadd.s32 %v2309_v44, %v2299_v51  ;;  %v2081_v40 = vshll.u32 %v8679_v4, %v8786_v55  ;;  %v2082_v28 = vshrl.u32 %v8680_v41, %v7180_v58 }
 0x27a   : > { %v2072_v45 = vor.u32 8388608, %v2071_v63  ;;  %v2084_v17 = vshll.u32 %v8680_v41, %v8786_v55  ;;  %v2085_v35 = vshrl.u32 %v8681_v12, %v7180_v58  ;;  %v2087_v18 = vshll.u32 %v8681_v12, %v8786_v55 }
 0x27b   : > { %v2030_v25 = vmul.f32 %v2029_v22, %v2027_v50  ;;  %v2311_v13 = vadd.s32 %v2310_v5, %v2301_v29  ;;  %v2088_v1 = vshrl.u32 %v8655_v57, %v7180_v58  ;;  %v2403_v60 = vshll.u32 %v8722_v14, %v7664_v21 }
 0x27c   : > { %v2036_v39 = vsel %vm7809_vm11, 0, %v2034_v56  ;;  %vm2314_vm0 = vc.u32 %v7823_v42, %v7825_v32  ;;  %v7847_v47 = vor.u32 %v2082_v28, %v2081_v40  ;;  %v7849_v24 = vor.u32 %v2085_v35, %v2084_v17 }
 0x27d   : > { %v2031_v52 = vxor.u32 2147483648, %v2030_v25  ;;  %v2315_v20 = vadd.s32 1, %v2311_v13  ;;  %v7851_v33 = vor.u32 %v2088_v1, %v2087_v18  ;;  %v7855_v23 = vor.u32 %v7747_v46, %v7743_v7 }
 0x27e   : > { %v2404_v27 = vshrl.u32 %v8724_v6, %v7706_v16  ;;  %v2312_v54 = vmul.u32 %v7678_v19, %v2258_v34  ;;  %v7860_v53 = vshll.u32 %v2072_v45, 8  ;;  %v2053_v37 = vadd.s32 3, %v2036_v39 }
 0x27f   : > { %v2032_v59 = vsel %vm1911_vm7, %v2031_v52, %v2030_v25  ;;  %v2316_v15 = vsel %vm2314_vm0, %v2315_v20, %v2311_v13  ;;  %vm2096_vm8 = vcmp.lt.s32.totalorder %v8775_v26, 1  ;;  %vm2097_vm13 = vcmp.lt.s32.totalorder %v8775_v26, 2 }
 0x280   : > { %v7868_v8 = vsel %vm7809_vm11, %v8771_v36, %v2032_v59  ;;  %v2317_v7 = vadd.s32 %v2316_v15, %v2312_v54  ;;  %vm2098_vm4 = vcmp.lt.s32.totalorder %v8775_v26, 3  ;;  %v2104_v46 = vsel %vm2096_vm8, %v7847_v47, %v7849_v24 }
 0x281   : > { %v2037_v19 = vmul.f32 %v7868_v8, %v7868_v8  ;;  %v2108_v10 = vsel %vm2096_vm8, %v7849_v24, %v7851_v33  ;;  %v2110_v34 = vsel %vm2098_vm4, %v7547_v48, %v7731_v3  ;;  %v2106_v43 = vsel %vm2098_vm4, %v7851_v33, %v7697_v2 }
 0x282   : > { %v2318_v49 = vadd.s32 536870912, %v2317_v7  ;;  %v2111_v56 = vsel %vm2097_vm13, %v2108_v10, %v2110_v34  ;;  %v7893_v51 = vand.u32 65535, %v7860_v53  ;;  %v2405_v22 = vor.u32 %v2404_v27, %v2403_v60 }
 0x283   : > { %v2038_v44 = vmul.f32 -0.001358992, %v2037_v19  ;;  %v2045_v29 = vmul.f32 -0.00019511016, %v2037_v19  ;;  %v2115_v63 = vand.u32 65535, %v2111_v56  ;;  %v2116_v50 = vshrl.u32 %v2111_v56, 16 }
 0x284   : > { %v7895_v5 = vand.u32 3, %v2053_v37  ;;  %v7897_v48 = vand.u32 3, %v2036_v39  ;;  %v7899_v3 = vshrl.u32 %v2318_v49, 30  ;;  %v2107_v2 = vsel %vm2097_vm13, %v2104_v46, %v2106_v43 }
 0x285   : > { %v2039_v55 = vadd.f32 0.041655596, %v2038_v44  ;;  %v2046_v40 = vadd.f32 0.008332121, %v2045_v29  ;;  %v7904_v45 = vmul.u32 %v2116_v50, %v7893_v51  ;;  %vm2409_vm15 = vcmp.lt.s32.totalorder %v7734_v0, 4 }
 0x286   : > { %v7908_v28 = vadd.s32 1, %v7572_v31  ;;  %v2320_v17 = vshll.u32 %v7899_v3, 30  ;;  %v2114_v35 = vshrl.u32 %v7860_v53, 16  ;;  %v2117_v18 = vmul.u32 %v2115_v63, %v7893_v51 }
 0x287   : > { %v2040_v25 = vmul.f32 %v2039_v55, %v2037_v19  ;;  %v2047_v13 = vmul.f32 %v2046_v40, %v2037_v19  ;;  %v2121_v1 = vshll.u32 %v7904_v45, 16  ;;  %v7917_v60 = vsel %vm2409_vm15, %v7855_v23, 920167782 }
 0x288   : > { %v7921_v39 = vsel %vm2409_vm15, %v2405_v22, 1326507024  ;;  %v7923_v31 = vsub.s32 %v2317_v7, %v2320_v17  ;;  %v2138_v52 = vshrl.u32 %v2107_v2, 16  ;;  %vm2059_vm6 = vcmp.eq.s32.totalorder %v7895_v5, 2 }
 0x289   : > { %v2041_v20 = vadd.f32 -0.4999988, %v2040_v25  ;;  %v2048_v27 = vadd.f32 -0.16666654, %v2047_v13  ;;  %vm4545_vm3 = vcmp.eq.s32.totalorder %v7897_v48, 2  ;;  %v7927_v54 = vmul.u32 %v2115_v63, %v2114_v35 }
 0x28a   : > { %vm2125_vm5 = vc.u32 %v2117_v18, %v2121_v1  ;;  %vm2056_vm10 = vcmp.eq.s32.totalorder %v7895_v5, 0  ;;  %vm4542_vm12 = vcmp.eq.s32.totalorder %v7897_v48, 0  ;;  %vm2322_vm1 = vcmp.lt.s32.totalorder %v7923_v31, 0 }
 0x28b   : > { %v2323_v59 = vsub.s32 0, %v7923_v31  ;;  %v2080_v37 = vshrl.u32 %v8679_v4, %v7180_v58  ;;  %v2137_v15 = vand.u32 65535, %v2107_v2  ;;  %v2042_v7 = vmul.f32 %v2041_v20, %v2037_v19 }
 0x28c   : > { %v2049_v46 = vmul.f32 %v2048_v27, %v2037_v19  ;;  %vm2055_vm11 = vcmp.lt.s32.totalorder %v7895_v5, 2  ;;  %vm4541_vm7 = vcmp.lt.s32.totalorder %v7897_v48, 2  ;;  %v2126_v10 = vsel %vm2125_vm5, 1, %v8669_v62 }
 0x28d   : > { %v2127_v34 = vadd.s32 %v2121_v1, %v2117_v18  ;;  %vm2052_vm2 = vweird.f32 %v8771_v36  ;;  %v2324_v49 = vsel %vm2322_vm1, %v2323_v59, %v7923_v31  ;;  %v2101_v43 = vsel %vm2099_vm9, %v7851_v33, 2102212464  ;;  %v8791_v36 = vld [vmem:[#allocation45_spill] sm:$0xff] }
 0x28e   : > { %v2120_v56 = vmul.u32 %v2116_v50, %v2114_v35  ;;  %v7944_v58 = vmul.u32 %v2138_v52, %v7893_v51  ;;  %v2043_v19 = vadd.f32 1.0, %v2042_v7  ;;  %v2050_v44 = vadd.f32 1.0, %v2049_v46 }
 0x28f   : > { %v2325_v29 = vclz %v2324_v49  ;;  %v2123_v63 = vshll.u32 %v7927_v54, 16  ;;  %v2313_v22 = vadd.s32 %v7825_v32, %v7823_v42  ;;  %v2100_v55 = vsel %vm2096_vm8, %v2080_v37, %v7847_v47 }
 0x290   : > { %v2128_v40 = vadd.s32 %v2126_v10, %v2120_v56  ;;  %v7952_v2 = vmul.u32 %v2137_v15, %v2114_v35  ;;  %v2051_v33 = vmul.f32 %v2050_v44, %v7868_v8  ;;  %v2060_v50 = vxor.u32 2147483648, %v2043_v19 }
 0x291   : > { %v5503_v17 = vadd.s32 4294967294, %v2325_v29  ;;  %vm2129_vm9 = vc.u32 %v2127_v34, %v2123_v63  ;;  %v2102_v25 = vsel %vm2098_vm4, %v7849_v24, %v2101_v43  ;;  %v2122_v13 = vshrl.u32 %v7904_v45, 16 }
 0x292   : > { %v2130_v42 = vsel %vm2129_vm9, 1, %v8669_v62  ;;  %v2139_v32 = vmul.u32 %v2137_v15, %v7893_v51  ;;  %v2057_v18 = vxor.u32 2147483648, %v2051_v33  ;;  %v2142_v47 = vmul.u32 %v2138_v52, %v2114_v35 }
 0x293   : > { %vm5504_vm0 = vcmp.lt.s32.totalorder %v5503_v17, 0  ;;  %v2143_v1 = vshll.u32 %v7944_v58, 16  ;;  %v4547_v8 = vsel %vm4545_vm3, %v2060_v50, %v2051_v33  ;;  %v2061_v20 = vsel %vm2059_vm6, %v2060_v50, %v2051_v33 }
 0x294   : > { %v2328_v27 = vsel %vm5504_vm0, 0, %v5503_v17  ;;  %v2132_v24 = vadd.s32 %v2130_v42, %v2128_v40  ;;  %v4544_v45 = vsel %vm4542_vm12, %v2043_v19, %v2057_v18  ;;  %v2058_v51 = vsel %vm2056_vm10, %v2043_v19, %v2057_v18  ;;  %v8787_v19 = vld [vmem:[#allocation6_spill] sm:$0xff] }
 0x295   : > { %v2329_v59 = vsub.s32 32, %v2328_v27  ;;  %v2145_v35 = vshll.u32 %v7952_v2, 16  ;;  %v4548_v52 = vsel %vm4541_vm7, %v4544_v45, %v4547_v8  ;;  %v2062_v37 = vsel %vm2055_vm11, %v2058_v51, %v2061_v20 }
 0x296   : > { %v2330_v15 = vshll.u32 %v7923_v31, %v2328_v27  ;;  %v2333_v7 = vsub.s32 4294967266, %v2328_v27  ;;  %v4549_v46 = vsel %vm2052_vm2, nan, %v4548_v52  ;;  %v2063_v10 = vsel %vm2052_vm2, nan, %v2062_v37 }
 0x297   : > { %v2331_v34 = vshrl.u32 %v2313_v22, %v2329_v59  ;;  %vm2147_vm8 = vc.u32 %v2139_v32, %v2143_v1  ;;  %5356 = vrot.lane.b32.xlu1 %v4549_v46, %s5606_s23  ;;  %2850 = vst.msk [vmem:[%s6358_s22 + $0x50] sm:$0xff] %vm2839_vm14, %v2063_v10  ;;  %v2133_v49 = vadd.s32 %v2132_v24, %v2122_v13  ;;  %vm2221_vm4 = vcmp.lt.s32.totalorder %v8772_v9, 0 }
 0x298   : > { %v2334_v48 = vadd.s32 127, %v2333_v7  ;;  %v2148_v5 = vsel %vm2147_vm8, 1, %v8669_v62  ;;  %v2149_v43 = vadd.s32 %v2143_v1, %v2139_v32  ;;  %v2374_v44 = vand.u32 2147483647, %v8787_v19 }
 0x299   : > { %v2332_v31 = vor.u32 %v2331_v34, %v2330_v15  ;;  %v2150_v56 = vadd.s32 %v2148_v5, %v2142_v47  ;;  %vm7988_vm6 = vcmp.le.f32.partialorder %v2219_v38, 0.7853982  ;;  %v2103_v63 = vsel %vm2097_vm13, %v2100_v55, %v2102_v25 }
 0x29a   : > { %v2335_v29 = vshll.u32 %v2334_v48, 23  ;;  %v2124_v22 = vshrl.u32 %v7927_v54, 16  ;;  %vm2151_vm3 = vc.u32 %v2149_v43, %v2145_v35  ;;  %v2343_v40 = vsub.s32 4, %v7899_v3 }
 0x29b   : > { %v2144_v33 = vshrl.u32 %v7944_v58, 16  ;;  %v2152_v50 = vsel %vm2151_vm3, 1, %v8669_v62  ;;  %v2381_v17 = vand.u32 8388607, %v2374_v44  ;;  %v2146_v42 = vshrl.u32 %v7952_v2, 16  ;;  %v8790_v58 = vld [vmem:[#allocation41_spill] sm:$0xff] }
 0x29c   : > { %v2336_v38 = vor.u32 4788187, %v2335_v29  ;;  %v8000_v13 = vadd.s32 %v2133_v49, %v2124_v22  ;;  %v2154_v32 = vadd.s32 %v2152_v50, %v2150_v56  ;;  %v2339_v26 = vcvt.s32.f32 %v2332_v31 }
 0x29d   : > { %v2382_v55 = vor.u32 8388608, %v2381_v17  ;;  %v2391_v54 = vshll.u32 %v8679_v4, %v7664_v21  ;;  %v2392_v25 = vshrl.u32 %v8680_v41, %v7706_v16  ;;  %vm2719_vm13 = vcmp.lt.s32.totalorder %v8790_v58, 4 }
 0x29e   : > { %v2337_v18 = vand.u32 2147483647, %v2336_v38  ;;  %v2155_v47 = vadd.s32 %v2154_v32, %v2144_v33  ;;  %v2394_v1 = vshll.u32 %v8680_v41, %v7664_v21  ;;  %v2395_v8 = vshrl.u32 %v8681_v12, %v7706_v16  ;;  %v8793_v32 = vld [vmem:[#allocation43_spill] sm:$0xff] }
 0x29f   : > { %v2344_v2 = vsel %vm2221_vm4, %v2343_v40, %v7899_v3  ;;  %v8015_v20 = vadd.s32 %v2149_v43, %v2145_v35  ;;  %v2397_v27 = vshll.u32 %v8681_v12, %v7664_v21  ;;  %v2398_v24 = vshrl.u32 %v8655_v57, %v7706_v16 }
 0x2a0   : > { %v2340_v45 = vmul.f32 %v2339_v26, %v2337_v18  ;;  %v2156_v51 = vadd.s32 %v2155_v47, %v2146_v42  ;;  %v8021_v59 = vor.u32 %v2392_v25, %v2391_v54  ;;  %v8023_v52 = vor.u32 %v2395_v8, %v2394_v1  ;;  %v8792_v42 = vld [vmem:[#allocation40_spill] sm:$0xff] }
 0x2a1   : > { %vm2159_vm5 = vc.u32 %v8000_v13, %v8015_v20  ;;  %v8027_v37 = vor.u32 %v2398_v24, %v2397_v27  ;;  %vm2406_vm10 = vcmp.lt.s32.totalorder %v7734_v0, 1  ;;  %vm2408_vm12 = vcmp.lt.s32.totalorder %v7734_v0, 3 }
 0x2a2   : > { %v2341_v3 = vxor.u32 2147483648, %v2340_v45  ;;  %v2160_v21 = vadd.s32 1, %v2156_v51  ;;  %v2420_v35 = vsel %vm2408_vm12, %v7855_v23, %v7921_v39  ;;  %v8035_v15 = vshll.u32 %v2382_v55, 8 }
 0x2a3   : > { %vm2540_vm1 = vcmp.gt.s32.totalorder %v7908_v28, 0  ;;  %v2346_v7 = vsel %vm7988_vm6, 0, %v2344_v2  ;;  %v2157_v46 = vmul.u32 %v7860_v53, %v2103_v63  ;;  %v2418_v10 = vsel %vm2406_vm10, %v8023_v52, %v8027_v37 }
 0x2a4   : > { %v2342_v34 = vsel %vm2221_vm4, %v2341_v3, %v2340_v45  ;;  %v2161_v48 = vsel %vm2159_vm5, %v2160_v21, %v2156_v51  ;;  %vm2407_vm11 = vcmp.lt.s32.totalorder %v7734_v0, 2  ;;  %v2414_v23 = vsel %vm2406_vm10, %v8021_v59, %v8023_v52 }
 0x2a5   : > { %v8055_v53 = vsel %vm7988_vm6, %v8772_v9, %v2342_v34  ;;  %v2162_v39 = vadd.s32 %v2161_v48, %v2157_v46  ;;  %v2416_v49 = vsel %vm2408_vm12, %v8027_v37, %v7917_v60  ;;  %v2421_v5 = vsel %vm2407_vm11, %v2418_v10, %v2420_v35 }
 0x2a6   : > { %v2347_v43 = vmul.f32 %v8055_v53, %v8055_v53  ;;  %v8066_v31 = vand.u32 65535, %v8035_v15  ;;  %v2425_v56 = vand.u32 65535, %v2421_v5  ;;  %v2426_v29 = vshrl.u32 %v2421_v5, 16 }
 0x2a7   : > { %v8071_v63 = vsel %vm2719_vm13, %v8791_v36, 920167782  ;;  %v2541_v60 = vsel %vm2540_vm1, %v7908_v28, 0  ;;  %v2363_v22 = vadd.s32 3, %v2346_v7  ;;  %v2163_v40 = vadd.s32 536870912, %v2162_v39 }
 0x2a8   : > { %v2348_v33 = vmul.f32 -0.001358992, %v2347_v43  ;;  %v2355_v50 = vmul.f32 -0.00019511016, %v2347_v43  ;;  %v2424_v17 = vshrl.u32 %v8035_v15, 16  ;;  %v8078_v38 = vmul.u32 %v2426_v29, %v8066_v31 }
 0x2a9   : > { %v8794_v26 = vor.u32 %v8792_v42, %v8793_v32  ;;  %v8087_v54 = vshrl.u32 %v2163_v40, 30  ;;  %v2417_v28 = vsel %vm2407_vm11, %v2414_v23, %v2416_v49  ;;  %v2427_v25 = vmul.u32 %v2425_v56, %v8066_v31 }
 0x2aa   : > { %v2349_v18 = vadd.f32 0.041655596, %v2348_v33  ;;  %v2356_v47 = vadd.f32 0.008332121, %v2355_v50  ;;  %v8092_v1 = vmul.u32 %v2425_v56, %v2424_v17  ;;  %v2431_v8 = vshll.u32 %v8078_v38, 16 }
 0x2ab   : > { %v8085_v55 = vsel %vm2719_vm13, %v8794_v26, 1326507024  ;;  %v8095_v2 = vshrl.u32 %v2541_v60, 5  ;;  %v2364_v27 = vand.u32 3, %v2363_v22  ;;  %v4848_v24 = vand.u32 3, %v2346_v7 }
 0x2ac   : > { %v2165_v45 = vshll.u32 %v8087_v54, 30  ;;  %v2350_v51 = vmul.f32 %v2349_v18, %v2347_v43  ;;  %v2357_v3 = vmul.f32 %v2356_v47, %v2347_v43  ;;  %vm2435_vm7 = vc.u32 %v2427_v25, %v2431_v8 }
 0x2ad   : > { %v2437_v21 = vadd.s32 %v2431_v8, %v2427_v25  ;;  %v8098_v35 = vand.u32 31, %v2541_v60  ;;  %v2436_v10 = vsel %vm2435_vm7, 1, %v8669_v62  ;;  %v2448_v34 = vshrl.u32 %v2417_v28, 16 }
 0x2ae   : > { %v8100_v46 = vsub.s32 %v2162_v39, %v2165_v45  ;;  %v2351_v48 = vadd.f32 -0.4999988, %v2350_v51  ;;  %v2358_v23 = vadd.f32 -0.16666654, %v2357_v3  ;;  %v2430_v49 = vmul.u32 %v2426_v29, %v2424_v17 }
 0x2af   : > { %v2433_v5 = vshll.u32 %v8092_v1, 16  ;;  %vm2366_vm2 = vcmp.eq.s32.totalorder %v2364_v27, 0  ;;  %vm4850_vm9 = vcmp.eq.s32.totalorder %v4848_v24, 0  ;;  %vm4853_vm0 = vcmp.eq.s32.totalorder %v4848_v24, 2 }
 0x2b0   : > { %vm2167_vm8 = vcmp.lt.s32.totalorder %v8100_v46, 0  ;;  %v2168_v7 = vsub.s32 0, %v8100_v46  ;;  %v2352_v56 = vmul.f32 %v2351_v48, %v2347_v43  ;;  %v2359_v60 = vmul.f32 %v2358_v23, %v2347_v43 }
 0x2b1   : > { %vm2365_vm4 = vcmp.lt.s32.totalorder %v2364_v27, 2  ;;  %vm4849_vm6 = vcmp.lt.s32.totalorder %v4848_v24, 2  ;;  %v2438_v39 = vadd.s32 %v2436_v10, %v2430_v49  ;;  %vm2439_vm3 = vc.u32 %v2437_v21, %v2433_v5 }
 0x2b2   : > { %vm2362_vm5 = vweird.f32 %v8772_v9  ;;  %v2169_v22 = vsel %vm2167_vm8, %v2168_v7, %v8100_v46  ;;  %v2390_v29 = vshrl.u32 %v8679_v4, %v7706_v16  ;;  %v2447_v40 = vand.u32 65535, %v2417_v28 }
 0x2b3   : > { %v8111_v33 = vmul.u32 %v2448_v34, %v8066_v31  ;;  %v2353_v50 = vadd.f32 1.0, %v2352_v56  ;;  %v2360_v42 = vadd.f32 1.0, %v2359_v60  ;;  %v2170_v32 = vclz %v2169_v22 }
 0x2b4   : > { %v2411_v43 = vsel %vm2409_vm15, %v8027_v37, 2102212464  ;;  %vm2369_vm1 = vcmp.eq.s32.totalorder %v2364_v27, 2  ;;  %v2158_v26 = vadd.s32 %v8015_v20, %v8000_v13  ;;  %v2410_v25 = vsel %vm2406_vm10, %v2390_v29, %v8021_v59 }
 0x2b5   : > { %v2440_v16 = vsel %vm2439_vm3, 1, %v8669_v62  ;;  %v2361_v28 = vmul.f32 %v2360_v42, %v8055_v53  ;;  %v2370_v18 = vxor.u32 2147483648, %v2353_v50  ;;  %v5500_v47 = vadd.s32 4294967294, %v2170_v32 }
 0x2b6   : > { %v2442_v8 = vadd.s32 %v2440_v16, %v2438_v39  ;;  %v2412_v45 = vsel %vm2408_vm12, %v8023_v52, %v2411_v43  ;;  %v2432_v37 = vshrl.u32 %v8078_v38, 16  ;;  %v2449_v51 = vmul.u32 %v2447_v40, %v8066_v31 }
 0x2b7   : > { %v2453_v13 = vshll.u32 %v8111_v33, 16  ;;  %v2367_v20 = vxor.u32 2147483648, %v2361_v28  ;;  %vm5501_vm15 = vcmp.lt.s32.totalorder %v5500_v47, 0  ;;  %v2451_v59 = vmul.u32 %v2447_v40, %v2424_v17  ;;  %v8795_v40 = vld [vmem:[#allocation11_spill] sm:$0xff] }
 0x2b8   : > { %v2452_v3 = vmul.u32 %v2448_v34, %v2424_v17  ;;  %v4855_v21 = vsel %vm4853_vm0, %v2370_v18, %v2361_v28  ;;  %v2371_v53 = vsel %vm2369_vm1, %v2370_v18, %v2361_v28  ;;  %v2173_v10 = vsel %vm5501_vm15, 0, %v5500_v47 }
 0x2b9   : > { %vm2457_vm10 = vc.u32 %v2449_v51, %v2453_v13  ;;  %v4852_v48 = vsel %vm4850_vm9, %v2353_v50, %v2367_v20  ;;  %v2368_v52 = vsel %vm2366_vm2, %v2353_v50, %v2367_v20  ;;  %v2174_v38 = vsub.s32 32, %v2173_v10 }
 0x2ba   : > { %v2443_v23 = vadd.s32 %v2442_v8, %v2432_v37  ;;  %v4856_v31 = vsel %vm4849_vm6, %v4852_v48, %v4855_v21  ;;  %v2372_v49 = vsel %vm2365_vm4, %v2368_v52, %v2371_v53  ;;  %v2175_v5 = vshll.u32 %v8100_v46, %v2173_v10  ;;  %v8797_v37 = vld [vmem:[#allocation36_spill] sm:$0xff] }
 0x2bb   : > { %v2178_v17 = vsub.s32 4294967266, %v2173_v10  ;;  %v4857_v34 = vsel %vm2362_vm5, nan, %v4856_v31  ;;  %v2373_v7 = vsel %vm2362_vm5, nan, %v2372_v49  ;;  %v2176_v56 = vshrl.u32 %v2158_v26, %v2174_v38 }
 0x2bc   : > { %v2458_v60 = vsel %vm2457_vm10, 1, %v8669_v62  ;;  %5360 = vrot.lane.b32.xlu0 %v4857_v34, %s5606_s23  ;;  %2852 = vst.msk [vmem:[%s6358_s22 + $0x60] sm:$0xff] %vm2839_vm14, %v2373_v7  ;;  %vm2066_vm12 = vcmp.lt.s32.totalorder %v8785_v11, 0  ;;  %v2455_v24 = vshll.u32 %v2451_v59, 16  ;;  %v2459_v39 = vadd.s32 %v2453_v13, %v2449_v51 }
 0x2bd   : > { %v2179_v27 = vadd.s32 127, %v2178_v17  ;;  %v2460_v46 = vadd.s32 %v2458_v60, %v2452_v3  ;;  %v2177_v22 = vor.u32 %v2176_v56, %v2175_v5  ;;  %v2413_v29 = vsel %vm2407_vm11, %v2410_v25, %v2412_v45 }
 0x2be   : > { %v2434_v9 = vshrl.u32 %v8092_v1, 16  ;;  %v2684_v50 = vand.u32 2147483647, %v8795_v40  ;;  %v2188_v32 = vsub.s32 4, %v8087_v54  ;;  %v2454_v43 = vshrl.u32 %v8111_v33, 16  ;;  %v8796_v1 = vld [vmem:[#allocation34_spill] sm:$0xff] }
 0x2bf   : > { %v2180_v42 = vshll.u32 %v2179_v27, 23  ;;  %vm2461_vm7 = vc.u32 %v2459_v39, %v2455_v24  ;;  %v2456_v16 = vshrl.u32 %v2451_v59, 16  ;;  %v2184_v25 = vcvt.s32.f32 %v2177_v22 }
 0x2c0   : > { %v8151_v26 = vadd.s32 %v2443_v23, %v2434_v9  ;;  %v2462_v28 = vsel %vm2461_vm7, 1, %v8669_v62  ;;  %v2691_v18 = vand.u32 8388607, %v2684_v50  ;;  %v2701_v8 = vshll.u32 %v8679_v4, %v8796_v1 }
 0x2c1   : > { %v2181_v0 = vor.u32 4788187, %v2180_v42  ;;  %v2464_v47 = vadd.s32 %v2462_v28, %v2460_v46  ;;  %v2702_v51 = vshrl.u32 %v8680_v41, %v8797_v37  ;;  %v2704_v33 = vshll.u32 %v8680_v41, %v8796_v1 }
 0x2c2   : > { %v2692_v45 = vor.u32 8388608, %v2691_v18  ;;  %v2705_v13 = vshrl.u32 %v8681_v12, %v8797_v37  ;;  %v2707_v3 = vshll.u32 %v8681_v12, %v8796_v1  ;;  %v2708_v21 = vshrl.u32 %v8655_v57, %v8797_v37 }
 0x2c3   : > { %v2182_v20 = vand.u32 2147483647, %v2181_v0  ;;  %v2465_v59 = vadd.s32 %v2464_v47, %v2454_v43  ;;  %vm8170_vm11 = vcmp.le.f32.partialorder %v2064_v30, 0.7853982  ;;  %v8174_v10 = vadd.s32 %v2459_v39, %v2455_v24 }
 0x2c4   : > { %v8176_v48 = vor.u32 %v2702_v51, %v2701_v8  ;;  %v8178_v52 = vor.u32 %v2705_v13, %v2704_v33  ;;  %v8180_v31 = vor.u32 %v2708_v21, %v2707_v3  ;;  %vm2718_vm2 = vcmp.lt.s32.totalorder %v8790_v58, 3 }
 0x2c5   : > { %v2185_v38 = vmul.f32 %v2184_v25, %v2182_v20  ;;  %v2466_v23 = vadd.s32 %v2465_v59, %v2456_v16  ;;  %v2189_v49 = vsel %vm2066_vm12, %v2188_v32, %v8087_v54  ;;  %v2467_v30 = vmul.u32 %v8035_v15, %v2413_v29 }
 0x2c6   : > { %vm2469_vm9 = vc.u32 %v8151_v26, %v8174_v10  ;;  %v2730_v5 = vsel %vm2718_vm2, %v8791_v36, %v8085_v55  ;;  %vm2716_vm0 = vcmp.lt.s32.totalorder %v8790_v58, 1  ;;  %v8194_v7 = vshll.u32 %v2692_v45, 8 }
 0x2c7   : > { %v2186_v17 = vxor.u32 2147483648, %v2185_v38  ;;  %v2470_v34 = vadd.s32 1, %v2466_v23  ;;  %vm2717_vm8 = vcmp.lt.s32.totalorder %v8790_v58, 2  ;;  %v2724_v15 = vsel %vm2716_vm0, %v8176_v48, %v8178_v52 }
 0x2c8   : > { %v2726_v54 = vsel %vm2718_vm2, %v8180_v31, %v8071_v63  ;;  %v2728_v36 = vsel %vm2716_vm0, %v8178_v52, %v8180_v31  ;;  %v2191_v56 = vsel %vm8170_vm11, 0, %v2189_v49  ;;  %v8216_v24 = vsub.s32 32, %v8098_v35 }
 0x2c9   : > { %v2187_v55 = vsel %vm2066_vm12, %v2186_v17, %v2185_v38  ;;  %v2471_v60 = vsel %vm2469_vm9, %v2470_v34, %v2466_v23  ;;  %v2731_v27 = vsel %vm2717_vm8, %v2728_v36, %v2730_v5  ;;  %v8227_v29 = vsel %vm2717_vm8, %v2724_v15, %v2726_v54 }
 0x2ca   : > { %v8221_v63 = vsel %vm8170_vm11, %v8785_v11, %v2187_v55  ;;  %v2472_v39 = vadd.s32 %v2471_v60, %v2467_v30  ;;  %v2735_v46 = vand.u32 65535, %v2731_v27  ;;  %v2733_v9 = vand.u32 65535, %v8194_v7 }
 0x2cb   : > { %v2192_v22 = vmul.f32 %v8221_v63, %v8221_v63  ;;  %v2736_v42 = vshrl.u32 %v2731_v27, 16  ;;  %v8232_v32 = vshll.u32 %v8655_v57, %v8098_v35  ;;  %v8236_v43 = vshll.u32 %v8722_v14, %v8098_v35 }
 0x2cc   : > { %v2208_v16 = vadd.s32 3, %v2191_v56  ;;  %v2473_v28 = vadd.s32 536870912, %v2472_v39  ;;  %v2734_v25 = vshrl.u32 %v8194_v7, 16  ;;  %v8241_v1 = vand.u32 3, %v2191_v56 }
 0x2cd   : > { %v2193_v18 = vmul.f32 -0.001358992, %v2192_v22  ;;  %v2200_v0 = vmul.f32 -0.00019511016, %v2192_v22  ;;  %v8239_v47 = vmul.u32 %v2736_v42, %v2733_v9  ;;  %v2737_v45 = vmul.u32 %v2735_v46, %v2733_v9 }
 0x2ce   : > { %v8243_v8 = vshrl.u32 %v2473_v28, 30  ;;  %v2758_v51 = vshrl.u32 %v8227_v29, 16  ;;  %v8246_v20 = vmul.u32 %v2735_v46, %v2734_v25  ;;  %v8251_v3 = vshrl.u32 %v8722_v14, %v8216_v24 }
 0x2cf   : > { %v2194_v33 = vadd.f32 0.041655596, %v2193_v18  ;;  %v2201_v13 = vadd.f32 0.008332121, %v2200_v0  ;;  %v2741_v59 = vshll.u32 %v8239_v47, 16  ;;  %v8255_v21 = vshrl.u32 %v8724_v6, %v8216_v24 }
 0x2d0   : > { %v2209_v53 = vand.u32 3, %v2208_v16  ;;  %v2475_v38 = vshll.u32 %v8243_v8, 30  ;;  %v2757_v34 = vand.u32 65535, %v8227_v29  ;;  %v8262_v15 = vmul.u32 %v2758_v51, %v2733_v9 }
 0x2d1   : > { %v2195_v23 = vmul.f32 %v2194_v33, %v2192_v22  ;;  %v2202_v49 = vmul.f32 %v2201_v13, %v2192_v22  ;;  %vm2745_vm4 = vc.u32 %v2737_v45, %v2741_v59  ;;  %v2747_v30 = vadd.s32 %v2741_v59, %v2737_v45 }
 0x2d2   : > { %v8258_v5 = vsub.s32 %v2472_v39, %v2475_v38  ;;  %v2746_v17 = vsel %vm2745_vm4, 1, %v8669_v62  ;;  %vm4699_vm6 = vcmp.eq.s32.totalorder %v8241_v1, 2  ;;  %v2740_v6 = vmul.u32 %v2736_v42, %v2734_v25 }
 0x2d3   : > { %v2196_v14 = vadd.f32 -0.4999988, %v2195_v23  ;;  %v2203_v54 = vadd.f32 -0.16666654, %v2202_v49  ;;  %v2743_v36 = vshll.u32 %v8246_v20, 16  ;;  %vm2211_vm3 = vcmp.eq.s32.totalorder %v2209_v53, 0 }
 0x2d4   : > { %vm2214_vm5 = vcmp.eq.s32.totalorder %v2209_v53, 2  ;;  %vm4696_vm1 = vcmp.eq.s32.totalorder %v8241_v1, 0  ;;  %vm2477_vm15 = vcmp.lt.s32.totalorder %v8258_v5, 0  ;;  %v2478_v55 = vsub.s32 0, %v8258_v5 }
 0x2d5   : > { %v2197_v56 = vmul.f32 %v2196_v14, %v2192_v22  ;;  %v2204_v60 = vmul.f32 %v2203_v54, %v2192_v22  ;;  %vm2210_vm10 = vcmp.lt.s32.totalorder %v2209_v53, 2  ;;  %vm4695_vm12 = vcmp.lt.s32.totalorder %v8241_v1, 2 }
 0x2d6   : > { %v2748_v27 = vadd.s32 %v2746_v17, %v2740_v6  ;;  %vm2749_vm7 = vc.u32 %v2747_v30, %v2743_v36  ;;  %vm2207_vm11 = vweird.f32 %v8785_v11  ;;  %v2468_v39 = vadd.s32 %v8174_v10, %v8151_v26 }
 0x2d7   : > { %v2479_v46 = vsel %vm2477_vm15, %v2478_v55, %v8258_v5  ;;  %v2700_v29 = vshrl.u32 %v8679_v4, %v8797_v37  ;;  %v2763_v42 = vshll.u32 %v8262_v15, 16  ;;  %v2198_v16 = vadd.f32 1.0, %v2197_v56 }
 0x2d8   : > { %v2205_v28 = vadd.f32 1.0, %v2204_v60  ;;  %v2480_v22 = vclz %v2479_v46  ;;  %v2761_v18 = vmul.u32 %v2757_v34, %v2734_v25  ;;  %v2721_v45 = vsel %vm2719_vm13, %v8180_v31, 2102212464 }
 0x2d9   : > { %v2720_v0 = vsel %vm2716_vm0, %v2700_v29, %v8176_v48  ;;  %v2750_v26 = vsel %vm2749_vm7, 1, %v8669_v62  ;;  %v2759_v10 = vmul.u32 %v2757_v34, %v2733_v9  ;;  %v2215_v37 = vxor.u32 2147483648, %v2198_v16 }
 0x2da   : > { %v2206_v33 = vmul.f32 %v2205_v28, %v8221_v63  ;;  %v5506_v13 = vadd.s32 4294967294, %v2480_v22  ;;  %v2752_v59 = vadd.s32 %v2750_v26, %v2748_v27  ;;  %v2742_v38 = vshrl.u32 %v8239_v47, 16 }
 0x2db   : > { %v2744_v23 = vshrl.u32 %v8246_v20, 16  ;;  %v2762_v49 = vmul.u32 %v2758_v51, %v2734_v25  ;;  %vm2767_vm9 = vc.u32 %v2759_v10, %v2763_v42  ;;  %v2765_v17 = vshll.u32 %v2761_v18, 16 }
 0x2dc   : > { %v2212_v30 = vxor.u32 2147483648, %v2206_v33  ;;  %v2216_v48 = vsel %vm2214_vm5, %v2215_v37, %v2206_v33  ;;  %vm5507_vm0 = vcmp.lt.s32.totalorder %v5506_v13, 0  ;;  %v4701_v31 = vsel %vm4699_vm6, %v2215_v37, %v2206_v33 }
 0x2dd   : > { %v2483_v9 = vsel %vm5507_vm0, 0, %v5506_v13  ;;  %v2768_v63 = vsel %vm2767_vm9, 1, %v8669_v62  ;;  %v2769_v34 = vadd.s32 %v2763_v42, %v2759_v10  ;;  %v2753_v51 = vadd.s32 %v2752_v59, %v2742_v38 }
 0x2de   : > { %v2213_v14 = vsel %vm2211_vm3, %v2198_v16, %v2212_v30  ;;  %v4698_v47 = vsel %vm4696_vm1, %v2198_v16, %v2212_v30  ;;  %v2484_v25 = vsub.s32 32, %v2483_v9  ;;  %v2485_v6 = vshll.u32 %v8258_v5, %v2483_v9 }
 0x2df   : > { %v2217_v20 = vsel %vm2210_vm10, %v2213_v14, %v2216_v48  ;;  %v4702_v54 = vsel %vm4695_vm12, %v4698_v47, %v4701_v31  ;;  %v2488_v36 = vsub.s32 4294967266, %v2483_v9  ;;  %vm2564_vm13 = vcmp.lt.s32.totalorder %v8095_v2, 4 }
 0x2e0   : > { %v2218_v55 = vsel %vm2207_vm11, nan, %v2217_v20  ;;  %v4703_v56 = vsel %vm2207_vm11, nan, %v4702_v54  ;;  %v2486_v60 = vshrl.u32 %v2468_v39, %v2484_v25  ;;  %v2770_v27 = vadd.s32 %v2768_v63, %v2762_v49 }
 0x2e1   : > { %2851 = vst.msk [vmem:[%s6358_s22 + $0x58] sm:$0xff] %vm2839_vm14, %v2218_v55  ;;  %5358 = vrot.lane.b32.xlu2 %v4703_v56, %s5606_s23  ;;  %v2489_v53 = vadd.s32 127, %v2488_v36  ;;  %v2498_v1 = vsub.s32 4, %v8243_v8  ;;  %v2722_v5 = vsel %vm2718_vm2, %v8178_v52, %v2721_v45  ;;  %vm2771_vm4 = vc.u32 %v2769_v34, %v2765_v17 }
 0x2e2   : > { %v2487_v46 = vor.u32 %v2486_v60, %v2485_v6  ;;  %v8310_v29 = vadd.s32 %v2753_v51, %v2744_v23  ;;  %v2772_v11 = vsel %vm2771_vm4, 1, %v8669_v62  ;;  %v2529_v39 = vand.u32 2147483647, %v7093_v61 }
 0x2e3   : > { %v2557_v42 = vor.u32 %v8251_v3, %v8232_v32  ;;  %v2490_v16 = vshll.u32 %v2489_v53, 23  ;;  %v2764_v28 = vshrl.u32 %v8262_v15, 16  ;;  %v2774_v22 = vadd.s32 %v2772_v11, %v2770_v27 }
 0x2e4   : > { %v2560_v26 = vor.u32 %v8255_v21, %v8236_v43  ;;  %vm2376_vm2 = vcmp.lt.s32.totalorder %v8787_v19, 0  ;;  %v8320_v52 = vadd.s32 %v2769_v34, %v2765_v17  ;;  %v2536_v45 = vand.u32 8388607, %v2529_v39 }
 0x2e5   : > { %v2491_v10 = vor.u32 4788187, %v2490_v16  ;;  %v2723_v33 = vsel %vm2717_vm8, %v2720_v0, %v2722_v5  ;;  %v2766_v37 = vshrl.u32 %v2761_v18, 16  ;;  %v2775_v32 = vadd.s32 %v2774_v22, %v2764_v28 }
 0x2e6   : > { %v2494_v3 = vcvt.s32.f32 %v2487_v46  ;;  %v2499_v15 = vsel %vm2376_vm2, %v2498_v1, %v8243_v8  ;;  %vm2779_vm6 = vc.u32 %v8310_v29, %v8320_v52  ;;  %v2546_v43 = vshll.u32 %v8679_v4, %v8098_v35 }
 0x2e7   : > { %v2492_v21 = vand.u32 2147483647, %v2491_v10  ;;  %v2776_v13 = vadd.s32 %v2775_v32, %v2766_v37  ;;  %v2547_v59 = vshrl.u32 %v8680_v41, %v8216_v24  ;;  %v2549_v58 = vshll.u32 %v8680_v41, %v8098_v35 }
 0x2e8   : > { %v2537_v18 = vor.u32 8388608, %v2536_v45  ;;  %v2550_v0 = vshrl.u32 %v8681_v12, %v8216_v24  ;;  %v2552_v8 = vshll.u32 %v8681_v12, %v8098_v35  ;;  %v2553_v38 = vshrl.u32 %v8655_v57, %v8216_v24 }
 0x2e9   : > { %v2570_v23 = vsel %vm2564_vm13, %v2557_v42, 920167782  ;;  %v2495_v49 = vmul.f32 %v2494_v3, %v2492_v21  ;;  %v2780_v30 = vadd.s32 1, %v2776_v13  ;;  %v8345_v48 = vor.u32 %v2547_v59, %v2546_v43 }
 0x2ea   : > { %vm8349_vm8 = vcmp.le.f32.partialorder %v2374_v44, 0.7853982  ;;  %v2777_v17 = vmul.u32 %v8194_v7, %v2723_v33  ;;  %v8354_v31 = vor.u32 %v2550_v0, %v2549_v58  ;;  %v8356_v12 = vor.u32 %v2553_v38, %v2552_v8 }
 0x2eb   : > { %v2574_v57 = vsel %vm2564_vm13, %v2560_v26, 1326507024  ;;  %v2496_v35 = vxor.u32 2147483648, %v2495_v49  ;;  %v2501_v9 = vsel %vm8349_vm8, 0, %v2499_v15  ;;  %v2781_v44 = vsel %vm2779_vm6, %v2780_v30, %v2776_v13 }
 0x2ec   : > { %v2782_v63 = vadd.s32 %v2781_v44, %v2777_v17  ;;  %vm2561_vm3 = vcmp.lt.s32.totalorder %v8095_v2, 1  ;;  %vm2562_vm5 = vcmp.lt.s32.totalorder %v8095_v2, 2  ;;  %v8367_v7 = vshll.u32 %v2537_v18, 8 }
 0x2ed   : > { %v2497_v34 = vsel %vm2376_vm2, %v2496_v35, %v2495_v49  ;;  %vm2563_vm1 = vcmp.lt.s32.totalorder %v8095_v2, 3  ;;  %v2569_v14 = vsel %vm2561_vm3, %v8345_v48, %v8354_v31  ;;  %v2573_v47 = vsel %vm2561_vm3, %v8354_v31, %v8356_v12 }
 0x2ee   : > { %v2500_v25 = vsel %vm8349_vm8, %v8787_v19, %v2497_v34  ;;  %v2783_v51 = vadd.s32 536870912, %v2782_v63  ;;  %v2571_v20 = vsel %vm2563_vm1, %v8356_v12, %v2570_v23  ;;  %v2575_v54 = vsel %vm2563_vm1, %v2557_v42, %v2574_v57 }
 0x2ef   : > { %v2502_v6 = vmul.f32 %v2500_v25, %v2500_v25  ;;  %v2576_v36 = vsel %vm2562_vm5, %v2573_v47, %v2575_v54  ;;  %v2518_v55 = vadd.s32 3, %v2501_v9  ;;  %v2578_v60 = vand.u32 65535, %v8367_v7 }
 0x2f0   : > { %v8390_v56 = vshrl.u32 %v2783_v51, 30  ;;  %v2581_v27 = vshrl.u32 %v2576_v36, 16  ;;  %v2572_v5 = vsel %vm2562_vm5, %v2569_v14, %v2571_v20  ;;  %v2580_v46 = vand.u32 65535, %v2576_v36 }
 0x2f1   : > { %v2503_v53 = vmul.f32 -0.001358992, %v2502_v6  ;;  %v2510_v1 = vmul.f32 -0.00019511016, %v2502_v6  ;;  %v5002_v22 = vand.u32 3, %v2501_v9  ;;  %v2579_v45 = vshrl.u32 %v8367_v7, 16 }
 0x2f2   : > { %v2785_v11 = vshll.u32 %v8390_v56, 30  ;;  %v8396_v16 = vmul.u32 %v2581_v27, %v2578_v60  ;;  %v2603_v33 = vshrl.u32 %v2572_v5, 16  ;;  %v2519_v3 = vand.u32 3, %v2518_v55 }
 0x2f3   : > { %v2504_v42 = vadd.f32 0.041655596, %v2503_v53  ;;  %v2511_v28 = vadd.f32 0.008332121, %v2510_v1  ;;  %v2582_v15 = vmul.u32 %v2580_v46, %v2578_v60  ;;  %v8404_v21 = vmul.u32 %v2580_v46, %v2579_v45 }
 0x2f4   : > { %v8398_v26 = vsub.s32 %v2782_v63, %v2785_v11  ;;  %v2586_v10 = vshll.u32 %v8396_v16, 16  ;;  %vm5004_vm12 = vcmp.eq.s32.totalorder %v5002_v22, 0  ;;  %vm5007_vm7 = vcmp.eq.s32.totalorder %v5002_v22, 2 }
 0x2f5   : > { %v2505_v37 = vmul.f32 %v2504_v42, %v2502_v6  ;;  %v2512_v32 = vmul.f32 %v2511_v28, %v2502_v6  ;;  %v8407_v18 = vmul.u32 %v2603_v33, %v2578_v60  ;;  %vm2520_vm11 = vcmp.lt.s32.totalorder %v2519_v3, 2 }
 0x2f6   : > { %vm2787_vm15 = vcmp.lt.s32.totalorder %v8398_v26, 0  ;;  %v2788_v43 = vsub.s32 0, %v8398_v26  ;;  %vm2590_vm10 = vc.u32 %v2582_v15, %v2586_v10  ;;  %vm2521_vm9 = vcmp.eq.s32.totalorder %v2519_v3, 0 }
 0x2f7   : > { %v2506_v13 = vadd.f32 -0.4999988, %v2505_v37  ;;  %v2513_v59 = vadd.f32 -0.16666654, %v2512_v32  ;;  %vm5003_vm0 = vcmp.lt.s32.totalorder %v5002_v22, 2  ;;  %vm2517_vm4 = vweird.f32 %v8787_v19 }
 0x2f8   : > { %v2789_v58 = vsel %vm2787_vm15, %v2788_v43, %v8398_v26  ;;  %v2585_v23 = vmul.u32 %v2581_v27, %v2579_v45  ;;  %v2588_v49 = vshll.u32 %v8404_v21, 16  ;;  %v2591_v30 = vsel %vm2590_vm10, 1, %v8669_v62 }
 0x2f9   : > { %v2507_v0 = vmul.f32 %v2506_v13, %v2502_v6  ;;  %v2514_v8 = vmul.f32 %v2513_v59, %v2502_v6  ;;  %v2790_v38 = vclz %v2789_v58  ;;  %v2602_v41 = vand.u32 65535, %v2572_v5 }
 0x2fa   : > { %v2592_v9 = vadd.s32 %v2586_v10, %v2582_v15  ;;  %vm2524_vm2 = vcmp.eq.s32.totalorder %v2519_v3, 2  ;;  %v2778_v44 = vadd.s32 %v8320_v52, %v8310_v29  ;;  %v2593_v63 = vadd.s32 %v2591_v30, %v2585_v23 }
 0x2fb   : > { %v2508_v17 = vadd.f32 1.0, %v2507_v0  ;;  %v2515_v57 = vadd.f32 1.0, %v2514_v8  ;;  %v5512_v35 = vadd.s32 4294967294, %v2790_v38  ;;  %v2608_v34 = vshll.u32 %v8407_v18, 16 }
 0x2fc   : > { %vm2594_vm8 = vc.u32 %v2592_v9, %v2588_v49  ;;  %v2587_v20 = vshrl.u32 %v8396_v16, 16  ;;  %v2604_v6 = vmul.u32 %v2602_v41, %v2578_v60  ;;  %v2606_v27 = vmul.u32 %v2602_v41, %v2579_v45 }
 0x2fd   : > { %v2516_v14 = vmul.f32 %v2515_v57, %v2500_v25  ;;  %v2525_v47 = vxor.u32 2147483648, %v2508_v17  ;;  %vm5513_vm6 = vcmp.lt.s32.totalorder %v5512_v35, 0  ;;  %v2595_v54 = vsel %vm2594_vm8, 1, %v8669_v62 }
 0x2fe   : > { %v2793_v51 = vsel %vm5513_vm6, 0, %v5512_v35  ;;  %v2607_v53 = vmul.u32 %v2603_v33, %v2579_v45  ;;  %v2597_v25 = vadd.s32 %v2595_v54, %v2593_v63  ;;  %vm2612_vm15 = vc.u32 %v2604_v6, %v2608_v34 }
 0x2ff   : > { %v2522_v36 = vxor.u32 2147483648, %v2516_v14  ;;  %v2794_v55 = vsub.s32 32, %v2793_v51  ;;  %v5009_v1 = vsel %vm5007_vm7, %v2525_v47, %v2516_v14  ;;  %v2526_v29 = vsel %vm2524_vm2, %v2525_v47, %v2516_v14 }
 0x300   : > { %v2798_v52 = vsub.s32 4294967266, %v2793_v51  ;;  %v2795_v42 = vshll.u32 %v8398_v26, %v2793_v51  ;;  %v2610_v33 = vshll.u32 %v2606_v27, 16  ;;  %v2613_v37 = vsel %vm2612_vm15, 1, %v8669_v62 }
 0x301   : > { %v5006_v5 = vsel %vm5004_vm12, %v2508_v17, %v2522_v36  ;;  %v2523_v46 = vsel %vm2521_vm9, %v2508_v17, %v2522_v36  ;;  %v2796_v11 = vshrl.u32 %v2778_v44, %v2794_v55  ;;  %v2614_v3 = vadd.s32 %v2608_v34, %v2604_v6 }
 0x302   : > { %v5010_v16 = vsel %vm5003_vm0, %v5006_v5, %v5009_v1  ;;  %v2527_v60 = vsel %vm2520_vm11, %v2523_v46, %v2526_v29  ;;  %v2799_v28 = vadd.s32 127, %v2798_v52  ;;  %v2615_v15 = vadd.s32 %v2613_v37, %v2607_v53 }
 0x303   : > { %v5011_v45 = vsel %vm2517_vm4, nan, %v5010_v16  ;;  %v2528_v10 = vsel %vm2517_vm4, nan, %v2527_v60  ;;  %v2797_v22 = vor.u32 %v2796_v11, %v2795_v42  ;;  %v2598_v43 = vadd.s32 %v2597_v25, %v2587_v20 }
 0x304   : > { %5362 = vrot.lane.b32.xlu1 %v5011_v45, %s5606_s23  ;;  %2853 = vst.msk [vmem:[%s6358_s22 + $0x68] sm:$0xff] %vm2839_vm14, %v2528_v10  ;;  %v2800_v32 = vshll.u32 %v2799_v28, 23  ;;  %v2566_v13 = vsel %vm2564_vm13, %v8356_v12, 2102212464  ;;  %vm2616_vm10 = vc.u32 %v2614_v3, %v2610_v33  ;;  %v2545_v19 = vshrl.u32 %v8679_v4, %v8216_v24 }
 0x305   : > { %v2589_v59 = vshrl.u32 %v8404_v21, 16  ;;  %v2617_v58 = vsel %vm2616_vm10, 1, %v8669_v62  ;;  %v2804_v8 = vcvt.s32.f32 %v2797_v22  ;;  %v2609_v38 = vshrl.u32 %v8407_v18, 16 }
 0x306   : > { %v2801_v26 = vor.u32 4788187, %v2800_v32  ;;  %v2619_v23 = vadd.s32 %v2617_v58, %v2615_v15  ;;  %v2565_v49 = vsel %vm2561_vm3, %v2545_v19, %v8345_v48  ;;  %v2567_v12 = vsel %vm2563_vm1, %v8354_v31, %v2566_v13 }
 0x307   : > { %v8446_v30 = vadd.s32 %v2598_v43, %v2589_v59  ;;  %v2611_v24 = vshrl.u32 %v2606_v27, 16  ;;  %v2618_v41 = vadd.s32 %v2614_v3, %v2610_v33  ;;  %v2568_v17 = vsel %vm2562_vm5, %v2565_v49, %v2567_v12 }
 0x308   : > { %v2802_v0 = vand.u32 2147483647, %v2801_v26  ;;  %v2620_v21 = vadd.s32 %v2619_v23, %v2609_v38  ;;  %vm2686_vm13 = vcmp.lt.s32.totalorder %v8795_v40, 0  ;;  %vm8454_vm3 = vcmp.le.f32.partialorder %v2684_v50, 0.7853982 }
 0x309   : > { %vm2624_vm12 = vc.u32 %v8446_v30, %v2618_v41  ;;  %v2808_v35 = vsub.s32 4, %v8390_v56  ;;  %v2622_v9 = vmul.u32 %v8367_v7, %v2568_v17  ;;  %vm2827_vm6 = vweird.f32 %v8795_v40 }
 0x30a   : > { %v2805_v4 = vmul.f32 %v2804_v8, %v2802_v0  ;;  %v2621_v18 = vadd.s32 %v2620_v21, %v2611_v24  ;;  %v2623_v58 = vadd.s32 %v2618_v41, %v8446_v30  ;;  %vm5384_vm8 = vcmask 261248   ;;  %v5341_v24 = vpop.permute.xlu2 %5340  ;;  %v5337_v30 = vpop.permute.xlu0 %5336 }
 0x30b   : > { %v2809_v50 = vsel %vm2686_vm13, %v2808_v35, %v8390_v56  ;;  %5387 = vst.msk [vmem:[%s6358_s22 + $0x10] sm:$0xff] %vm5384_vm8, %v5341_v24  ;;  %vm2531_vm15 = vcmp.lt.s32.totalorder %v7093_v61, 0  ;;  %vm2530_vm10 = vcmp.le.f32.partialorder %v2529_v39, 0.7853982 }
 0x30c   : > { %v2806_v62 = vxor.u32 2147483648, %v2805_v4  ;;  %v2625_v57 = vadd.s32 1, %v2621_v18  ;;  %v2811_v36 = vsel %vm8454_vm3, 0, %v2809_v50  ;;  %5385 = vst.msk [vmem:[%s6358_s22] sm:$0xff] %vm5384_vm8, %v5337_v30 }
 0x30d   : > { %v2828_v29 = vadd.s32 3, %v2811_v36  ;;  %v5310_v46 = vand.u32 3, %v2811_v36 }
 0x30e   : > { %v2807_v31 = vsel %vm2686_vm13, %v2806_v62, %v2805_v4  ;;  %v2626_v63 = vsel %vm2624_vm12, %v2625_v57, %v2621_v18  ;;  %v5339_v4 = vpop.permute.xlu1 %5338 }
 0x30f   : > { %v2810_v2 = vsel %vm8454_vm3, %v8795_v40, %v2807_v31  ;;  %v2627_v34 = vadd.s32 %v2626_v63, %v2622_v9  ;;  %v2829_v60 = vand.u32 3, %v2828_v29  ;;  %vm5311_vm1 = vcmp.lt.s32.totalorder %v5310_v46, 2  ;;  %5386 = vst.msk [vmem:[%s6358_s22 + $0x8] sm:$0xff] %vm5384_vm8, %v5339_v4 }
 0x310   : > { %v2812_v44 = vmul.f32 %v2810_v2, %v2810_v2  ;;  %vm5312_vm7 = vcmp.eq.s32.totalorder %v5310_v46, 0  ;;  %vm5315_vm11 = vcmp.eq.s32.totalorder %v5310_v46, 2 }
 0x311   : > { %v2628_v51 = vadd.s32 536870912, %v2627_v34  ;;  %vm2830_vm9 = vcmp.lt.s32.totalorder %v2829_v60, 2  ;;  %vm2831_vm0 = vcmp.eq.s32.totalorder %v2829_v60, 0  ;;  %vm2834_vm4 = vcmp.eq.s32.totalorder %v2829_v60, 2 }
 0x312   : > { %v2813_v14 = vmul.f32 -0.001358992, %v2812_v44  ;;  %v2820_v47 = vmul.f32 -0.00019511016, %v2812_v44  ;;  %v5347_v31 = vpop.permute.xlu2 %5346  ;;  %v5343_v35 = vpop.permute.xlu0 %5342 }
 0x313   : > { %v8464_v6 = vshrl.u32 %v2628_v51, 30  ;;  %5390 = vst.msk [vmem:[%s6358_s22 + $0x28] sm:$0xff] %vm5384_vm8, %v5347_v31 }
 0x314   : > { %v2814_v20 = vadd.f32 0.041655596, %v2813_v14  ;;  %v2821_v54 = vadd.f32 0.008332121, %v2820_v47  ;;  %5388 = vst.msk [vmem:[%s6358_s22 + $0x18] sm:$0xff] %vm5384_vm8, %v5343_v35 }
 0x315   : > { %v2630_v53 = vshll.u32 %v8464_v6, 30 }
 0x316   : > { %v2815_v55 = vmul.f32 %v2814_v20, %v2812_v44  ;;  %v2822_v27 = vmul.f32 %v2821_v54, %v2812_v44  ;;  %v5345_v48 = vpop.permute.xlu1 %5344 }
 0x317   : > { %v2631_v52 = vsub.s32 %v2627_v34, %v2630_v53  ;;  %5389 = vst.msk [vmem:[%s6358_s22 + $0x20] sm:$0xff] %vm5384_vm8, %v5345_v48 }
 0x318   : > { %v2816_v7 = vadd.f32 -0.4999988, %v2815_v55  ;;  %v2823_v1 = vadd.f32 -0.16666654, %v2822_v27 }
 0x319   : > { %vm2632_vm5 = vcmp.lt.s32.totalorder %v2631_v52, 0  ;;  %v2633_v56 = vsub.s32 0, %v2631_v52 }
 0x31a   : > { %v2817_v25 = vmul.f32 %v2816_v7, %v2812_v44  ;;  %v2824_v5 = vmul.f32 %v2823_v1, %v2812_v44  ;;  %v5353_v50 = vpop.permute.xlu2 %5352 }
 0x31b   : > { %v2634_v42 = vsel %vm2632_vm5, %v2633_v56, %v2631_v52  ;;  %5393 = vst.msk [vmem:[%s6358_s22 + $0x40] sm:$0xff] %vm5384_vm8, %v5353_v50 }
 0x31c   : > { %v2818_v11 = vadd.f32 1.0, %v2817_v25  ;;  %v2825_v16 = vadd.f32 1.0, %v2824_v5  ;;  %v2635_v10 = vclz %v2634_v42 }
 0x31e   : > { %v2826_v28 = vmul.f32 %v2825_v16, %v2810_v2  ;;  %v2835_v45 = vxor.u32 2147483648, %v2818_v11  ;;  %v5509_v37 = vadd.s32 4294967294, %v2635_v10  ;;  %v2653_v2 = vsub.s32 4, %v8464_v6 }
 0x320   : > { %v2832_v33 = vxor.u32 2147483648, %v2826_v28  ;;  %v5317_v22 = vsel %vm5315_vm11, %v2835_v45, %v2826_v28  ;;  %v2836_v15 = vsel %vm2834_vm4, %v2835_v45, %v2826_v28  ;;  %vm5510_vm2 = vcmp.lt.s32.totalorder %v5509_v37, 0 }
 0x321   : > { %v2638_v13 = vsel %vm5510_vm2, 0, %v5509_v37  ;;  %v2654_v14 = vsel %vm2531_vm15, %v2653_v2, %v8464_v6  ;;  %vm2672_vm11 = vweird.f32 %v7093_v61  ;;  %v5351_v37 = vpop.permute.xlu1 %5350 }
 0x322   : > { %v5314_v32 = vsel %vm5312_vm7, %v2818_v11, %v2832_v33  ;;  %v2833_v3 = vsel %vm2831_vm0, %v2818_v11, %v2832_v33  ;;  %v2639_v0 = vsub.s32 32, %v2638_v13  ;;  %v2643_v8 = vsub.s32 4294967266, %v2638_v13  ;;  %5392 = vst.msk [vmem:[%s6358_s22 + $0x38] sm:$0xff] %vm5384_vm8, %v5351_v37 }
 0x323   : > { %v5318_v43 = vsel %vm5311_vm1, %v5314_v32, %v5317_v22  ;;  %v2837_v26 = vsel %vm2830_vm9, %v2833_v3, %v2836_v15  ;;  %v2640_v23 = vshll.u32 %v2631_v52, %v2638_v13  ;;  %v2656_v51 = vsel %vm2530_vm10, 0, %v2654_v14  ;;  %v5349_v22 = vpop.permute.xlu0 %5348 }
 0x324   : > { %v5319_v19 = vsel %vm2827_vm6, nan, %v5318_v43  ;;  %v2838_v59 = vsel %vm2827_vm6, nan, %v2837_v26  ;;  %v2641_v38 = vshrl.u32 %v2623_v58, %v2639_v0  ;;  %v2644_v49 = vadd.s32 127, %v2643_v8  ;;  %5391 = vst.msk [vmem:[%s6358_s22 + $0x30] sm:$0xff] %vm5384_vm8, %v5349_v22 }
 0x325   : > { %5366 = vrot.lane.b32.xlu0 %v5319_v19, %s5606_s23  ;;  %2855 = vst.msk [vmem:[%s6358_s22 + $0x78] sm:$0xff] %vm2839_vm14, %v2838_v59  ;;  %v2673_v27 = vadd.s32 3, %v2656_v51  ;;  %v5156_v52 = vand.u32 3, %v2656_v51 }
 0x326   : > { %v2642_v40 = vor.u32 %v2641_v38, %v2640_v23  ;;  %v2645_v12 = vshll.u32 %v2644_v49, 23 }
 0x327   : > { %v2674_v25 = vand.u32 3, %v2673_v27  ;;  %vm5157_vm13 = vcmp.lt.s32.totalorder %v5156_v52, 2  ;;  %vm5158_vm12 = vcmp.eq.s32.totalorder %v5156_v52, 0  ;;  %vm5161_vm7 = vcmp.eq.s32.totalorder %v5156_v52, 2 }
 0x328   : > { %v2646_v21 = vor.u32 4788187, %v2645_v12  ;;  %v2649_v62 = vcvt.s32.f32 %v2642_v40 }
 0x329   : > { %vm2675_vm3 = vcmp.lt.s32.totalorder %v2674_v25, 2  ;;  %vm2676_vm5 = vcmp.eq.s32.totalorder %v2674_v25, 0  ;;  %vm2679_vm1 = vcmp.eq.s32.totalorder %v2674_v25, 2  ;;  %v5357_v32 = vpop.permute.xlu1 %5356 }
 0x32a   : > { %v2647_v41 = vand.u32 2147483647, %v2646_v21  ;;  %5395 = vst.msk [vmem:[%s6358_s22 + $0x50] sm:$0xff] %vm5384_vm8, %v5357_v32 }
 0x32c   : > { %v2650_v17 = vmul.f32 %v2649_v62, %v2647_v41 }
 0x32e   : > { %v2651_v18 = vxor.u32 2147483648, %v2650_v17 }
 0x330   : > { %v2652_v57 = vsel %vm2531_vm15, %v2651_v18, %v2650_v17 }
 0x331   : > { %v2655_v9 = vsel %vm2530_vm10, %v7093_v61, %v2652_v57  ;;  %v5355_v61 = vpop.permute.xlu0 %5354 }
 0x332   : > { %v2657_v44 = vmul.f32 %v2655_v9, %v2655_v9  ;;  %5394 = vst.msk [vmem:[%s6358_s22 + $0x48] sm:$0xff] %vm5384_vm8, %v5355_v61 }
 0x334   : > { %v2658_v63 = vmul.f32 -0.001358992, %v2657_v44  ;;  %v2665_v34 = vmul.f32 -0.00019511016, %v2657_v44 }
 0x336   : > { %v2659_v47 = vadd.f32 0.041655596, %v2658_v63  ;;  %v2666_v39 = vadd.f32 0.008332121, %v2665_v34 }
 0x338   : > { %v2660_v20 = vmul.f32 %v2659_v47, %v2657_v44  ;;  %v2667_v54 = vmul.f32 %v2666_v39, %v2657_v44 }
 0x339   : > { %v5361_v15 = vpop.permute.xlu0 %5360 }
 0x33a   : > { %v2661_v36 = vadd.f32 -0.4999988, %v2660_v20  ;;  %v2668_v55 = vadd.f32 -0.16666654, %v2667_v54  ;;  %5397 = vst.msk [vmem:[%s6358_s22 + $0x60] sm:$0xff] %vm5384_vm8, %v5361_v15 }
 0x33b   : > { %v5359_v5 = vpop.permute.xlu2 %5358 }
 0x33c   : > { %v2662_v53 = vmul.f32 %v2661_v36, %v2657_v44  ;;  %v2669_v7 = vmul.f32 %v2668_v55, %v2657_v44  ;;  %5396 = vst.msk [vmem:[%s6358_s22 + $0x58] sm:$0xff] %vm5384_vm8, %v5359_v5 }
 0x33e   : > { %v2663_v1 = vadd.f32 1.0, %v2662_v53  ;;  %v2670_v29 = vadd.f32 1.0, %v2669_v7 }
 0x340   : > { %v2671_v6 = vmul.f32 %v2670_v29, %v2655_v9  ;;  %v2680_v46 = vxor.u32 2147483648, %v2663_v1 }
 0x342   : > { %v2677_v56 = vxor.u32 2147483648, %v2671_v6  ;;  %v2681_v16 = vsel %vm2679_vm1, %v2680_v46, %v2671_v6  ;;  %v5163_v42 = vsel %vm5161_vm7, %v2680_v46, %v2671_v6 }
 0x344   : > { %v2678_v11 = vsel %vm2676_vm5, %v2663_v1, %v2677_v56  ;;  %v5160_v60 = vsel %vm5158_vm12, %v2663_v1, %v2677_v56 }
 0x345   : > { %v2682_v28 = vsel %vm2675_vm3, %v2678_v11, %v2681_v16  ;;  %v5164_v45 = vsel %vm5157_vm13, %v5160_v60, %v5163_v42 }
 0x346   : > { %v2683_v10 = vsel %vm2672_vm11, nan, %v2682_v28  ;;  %v5165_v33 = vsel %vm2672_vm11, nan, %v5164_v45 }
 0x347   : > { %2854 = vst.msk [vmem:[%s6358_s22 + $0x70] sm:$0xff] %vm2839_vm14, %v2683_v10  ;;  %5364 = vrot.lane.b32.xlu2 %v5165_v33, %s5606_s23 }
 0x376   : > { %v5363_v3 = vpop.permute.xlu1 %5362 }
 0x377   : > { %5398 = vst.msk [vmem:[%s6358_s22 + $0x68] sm:$0xff] %vm5384_vm8, %v5363_v3 }
 0x397   : > { %v5367_v43 = vpop.permute.xlu0 %5366 }
 0x398   : > { %5400 = vst.msk [vmem:[%s6358_s22 + $0x78] sm:$0xff] %vm5384_vm8, %v5367_v43 }
 0x3a1   : > { %v5365_v26 = vpop.permute.xlu2 %5364 }
 0x3a2   : > { %5399 = vst.msk [vmem:[%s6358_s22 + $0x70] sm:$0xff] %vm5384_vm8, %v5365_v26 }
 0x3a3 PF: > { %s12_s9 = sadd.s32 1, %s5596_s9  }
 0x3a4   : > { %p9_p4 = scmp.ge.s32.totalorder %s12_s9, 4  }
 0x3a6   :  { %11 = sbr.rel (!%p9_p4) target bundleno = 1 (0x1), region = 58 }

</bundles_post_ra>
